<compile_context>
chip_gen: v5e
topology: v5e:2x2
jax: 0.10.0
libtpu: 0.0.40
codegen_flags: <defaults>
</compile_context>

<pallas_src>
import functools

import jax
import jax.numpy as jnp
from jax.experimental import pallas as pl
from jax.experimental.pallas import tpu as pltpu


def _wsl1_kernel(x_ref, t_ref, w_ref, cw_ref, o_ref, *, beta: float, codes: int):
    # x/t/o: (TR, L) lane-dense tiles; w: (TR, L // codes) compact anchor weights;
    # cw: (1, L) code-weight row (same block every step -> fetched once).
    x = x_ref[...]
    t = t_ref[...]
    # NaN targets are replaced by the prediction (=> zero diff / zero loss).
    t = jnp.where(jnp.isnan(t), x, t)

    # Code-wise weights applied BEFORE the smooth-L1 nonlinearity (as in torch).
    diff = (x - t) * cw_ref[...]            # (1, L) sublane-broadcast -> (TR, L)

    n = jnp.abs(diff)
    if beta < 1e-5:
        loss = n
    else:
        loss = jnp.where(n < beta, (0.5 / beta) * n * n, n - 0.5 * beta)

    # Expand compact per-anchor weights (TR, 128) -> (TR, 128*codes): anchor j
    # covers lanes [codes*j, codes*(j+1)).  One-hot expansion matrix built from
    # iotas (VPU slack, recomputed per step so it is megacore-safe) and applied
    # on the otherwise-idle MXU; HIGHEST precision keeps f32 weights exact.
    wl = w_ref.shape[-1]                    # anchors per row (128)
    L = o_ref.shape[-1]                     # lanes per row (128 * codes)
    j = jax.lax.broadcasted_iota(jnp.int32, (wl, L), 0)
    l = jax.lax.broadcasted_iota(jnp.int32, (wl, L), 1)
    lo = codes * j
    expand = jnp.logical_and(l >= lo, l < lo + codes).astype(jnp.float32)
    w_exp = jnp.dot(w_ref[...].astype(jnp.float32), expand,
                    precision=jax.lax.Precision.HIGHEST,
                    preferred_element_type=jnp.float32)

    # Anchor-wise weights applied AFTER the nonlinearity.
    o_ref[...] = (loss * w_exp).astype(o_ref.dtype)


def weighted_smooth_l1_loss(inp, tgt, weights=None, code_weights=None,
                            beta=1.0 / 9.0):
    """inp, tgt: (B, A, C) float; weights: (B, A) float; code_weights: (C,)."""
    B, A, C = inp.shape
    dtype = inp.dtype
    n_anchors = B * A

    if weights is None:
        weights = jnp.ones((B, A), dtype=jnp.float32)
    if code_weights is None:
        cw = jnp.ones((C,), dtype=jnp.float32)
    else:
        cw = jnp.asarray(code_weights, dtype=jnp.float32)

    WL = 128                       # anchors per slab row (= lane groups per row)
    lanes = WL * C                 # lane-dense row width, multiple of 128
    # Pad rows only when the anchor count is not a multiple of 128 (or the
    # array is tiny): common pcdet shapes hit the pad-free, slice-free path.
    R = max(pl.cdiv(n_anchors, WL), 8)
    pad_anchors = R * WL - n_anchors

    # Free (metadata-only) reshapes when no padding is required.
    x_flat = inp.reshape(-1)
    t_flat = tgt.reshape(-1)
    w_flat = weights.reshape(-1).astype(jnp.float32)
    if pad_anchors:
        x_flat = jnp.pad(x_flat, (0, pad_anchors * C))
        t_flat = jnp.pad(t_flat, (0, pad_anchors * C))
        w_flat = jnp.pad(w_flat, (0, pad_anchors))   # zero weight -> zero loss
    x2 = x_flat.reshape(R, lanes)
    t2 = t_flat.reshape(R, lanes)
    w2 = w_flat.reshape(R, WL)     # compact anchor weights: 1/C of full traffic

    # Code-weight pattern for one row (~3.5 KiB); constant block index -> one DMA.
    cw_row = jnp.tile(cw, WL).reshape(1, lanes)

    # Row tile: ~2 MiB per streamed array (>=85% of HBM roofline), sublane dim
    # a multiple of 8; capped so the grid keeps >=2 steps when possible (v7x
    # megacore).  Partial final block is handled by Pallas (masked DMA).
    bytes_per_row = lanes * jnp.dtype(dtype).itemsize
    tr = max(8, ((2 << 20) // bytes_per_row) // 8 * 8)
    if tr >= R:
        if R > 8:
            tr = max(8, -(-((R + 1) // 2) // 8) * 8)   # ceil(R/2) rounded up to 8
        else:
            tr = R                                     # single full-extent block
    grid = (pl.cdiv(R, tr),)

    kernel = functools.partial(_wsl1_kernel, beta=float(beta), codes=C)

    out2 = pl.pallas_call(
        kernel,
        out_shape=jax.ShapeDtypeStruct((R, lanes), dtype),
        grid=grid,
        in_specs=[
            pl.BlockSpec((tr, lanes), lambda i: (i, 0)),   # input
            pl.BlockSpec((tr, lanes), lambda i: (i, 0)),   # target
            pl.BlockSpec((tr, WL), lambda i: (i, 0)),      # compact anchor weights
            pl.BlockSpec((1, lanes), lambda i: (0, 0)),    # code-weight row (shared)
        ],
        out_specs=pl.BlockSpec((tr, lanes), lambda i: (i, 0)),
        compiler_params=pltpu.CompilerParams(
            dimension_semantics=("parallel",),
            vmem_limit_bytes=48 * 1024 * 1024),
    )(x2, t2, w2, cw_row)

    if pad_anchors:
        return out2.reshape(-1)[: n_anchors * C].reshape(B, A, C)
    return out2.reshape(B, A, C)


def _reference(inp, tgt, weights, code_weights, beta):
    tgt = jnp.where(jnp.isnan(tgt), inp, tgt)
    diff = (inp - tgt) * code_weights.reshape(1, 1, -1)
    n = jnp.abs(diff)
    if beta < 1e-5:
        loss = n
    else:
        loss = jnp.where(n < beta, 0.5 * n ** 2 / beta, n - 0.5 * beta)
    return loss * weights[..., None]


if __name__ == "__main__":
    key = jax.random.PRNGKey(0)
    k1, k2, k3, k4, k5, k6 = jax.random.split(key, 6)

    # Case 1: pcdet-style shapes (B*A divisible by 128), smooth-L1 branch.
    B, A, C = 2, 128, 7
    beta = 1.0 / 9.0
    inp = jax.random.normal(k1, (B, A, C), dtype=jnp.float32)
    tgt = jax.random.normal(k2, (B, A, C), dtype=jnp.float32)
    tgt = tgt.at[0, 0, 0].set(jnp.nan).at[1, 5, 3].set(jnp.nan)  # exercise isnan
    weights = jax.random.uniform(k3, (B, A), dtype=jnp.float32)
    code_weights = jnp.linspace(0.5, 1.5, C, dtype=jnp.float32)

    loss = weighted_smooth_l1_loss(inp, tgt, weights, code_weights, beta=beta)
    loss = jax.block_until_ready(loss)
    ref = _reference(inp, tgt, weights, code_weights, beta)
    assert loss.shape == (B, A, C)
    assert jnp.allclose(loss, ref, atol=1e-6, rtol=1e-6)

    # Case 2: ragged anchor count (padding path), L1 branch, no code weights.
    B2, A2, C2 = 3, 100, 7
    beta2 = 1e-6
    inp2 = jax.random.normal(k4, (B2, A2, C2), dtype=jnp.float32)
    tgt2 = jax.random.normal(k5, (B2, A2, C2), dtype=jnp.float32)
    tgt2 = tgt2.at[2, 7, 1].set(jnp.nan)
    weights2 = jax.random.uniform(k6, (B2, A2), dtype=jnp.float32)

    loss2 = weighted_smooth_l1_loss(inp2, tgt2, weights2, None, beta=beta2)
    loss2 = jax.block_until_ready(loss2)
    ref2 = _reference(inp2, tgt2, weights2, jnp.ones((C2,), jnp.float32), beta2)
    assert loss2.shape == (B2, A2, C2)
    assert jnp.allclose(loss2, ref2, atol=1e-6, rtol=1e-6)

    print("KERNEL_OK")
</pallas_src>

<mosaic_0001>
module attributes {stable_mosaic.version = 11 : i64} {
  func.func @_wsl1_kernel(%arg0: i32, %arg1: memref<8x896xf32, #tpu.memory_space<vmem>>, %arg2: memref<8x896xf32, #tpu.memory_space<vmem>>, %arg3: memref<8x128xf32, #tpu.memory_space<vmem>>, %arg4: memref<1x896xf32, #tpu.memory_space<vmem>>, %arg5: memref<8x896xf32, #tpu.memory_space<vmem>>) attributes {dimension_semantics = [#tpu.dimension_semantics<parallel>], iteration_bounds = array<i64: 1>, scalar_prefetch = 0 : i64, scratch_operands = 0 : i64, tpu.core_type = #tpu.core_type<tc>, window_params = [{transform_indices = @transform_0, window_bounds = array<i64: 8, 896>}, {transform_indices = @transform_1, window_bounds = array<i64: 8, 896>}, {transform_indices = @transform_2, window_bounds = array<i64: 8, 128>}, {pipeline_mode = #tpu.pipeline_mode<synchronous>, transform_indices = @transform_3, window_bounds = array<i64: 1, 896>}, {transform_indices = @transform_4, window_bounds = array<i64: 8, 896>}]} {
    %c0 = arith.constant 0 : index
    %c0_0 = arith.constant 0 : index
    %0 = vector.load %arg1[%c0, %c0_0] : memref<8x896xf32, #tpu.memory_space<vmem>>, vector<8x896xf32>
    %c0_1 = arith.constant 0 : index
    %c0_2 = arith.constant 0 : index
    %1 = vector.load %arg2[%c0_1, %c0_2] : memref<8x896xf32, #tpu.memory_space<vmem>>, vector<8x896xf32>
    %2 = arith.cmpf one, %1, %1 : vector<8x896xf32>
    %3 = arith.select %2, %0, %1 : vector<8x896xi1>, vector<8x896xf32>
    %4 = arith.subf %0, %3 : vector<8x896xf32>
    %c0_3 = arith.constant 0 : index
    %c0_4 = arith.constant 0 : index
    %5 = vector.load %arg4[%c0_3, %c0_4] : memref<1x896xf32, #tpu.memory_space<vmem>>, vector<1x896xf32>
    %6 = vector.broadcast %5 : vector<1x896xf32> to vector<8x896xf32>
    %7 = arith.mulf %4, %6 : vector<8x896xf32>
    %8 = math.absf %7 : vector<8x896xf32>
    %cst = arith.constant 0.111111112 : f32
    %9 = vector.broadcast %cst : f32 to vector<8x896xf32>
    %10 = arith.cmpf olt, %8, %9 : vector<8x896xf32>
    %cst_5 = arith.constant 4.500000e+00 : f32
    %11 = vector.broadcast %cst_5 : f32 to vector<8x896xf32>
    %12 = arith.mulf %11, %8 : vector<8x896xf32>
    %13 = arith.mulf %12, %8 : vector<8x896xf32>
    %cst_6 = arith.constant 0.055555556 : f32
    %14 = vector.broadcast %cst_6 : f32 to vector<8x896xf32>
    %15 = arith.subf %8, %14 : vector<8x896xf32>
    %16 = arith.select %10, %13, %15 : vector<8x896xi1>, vector<8x896xf32>
    %17 = tpu.iota {dimensions = array<i32: 0>} : vector<128x896xi32>
    %18 = tpu.iota {dimensions = array<i32: 1>} : vector<128x896xi32>
    %c7_i32 = arith.constant 7 : i32
    %19 = vector.broadcast %c7_i32 : i32 to vector<128x896xi32>
    %20 = arith.muli %19, %17 : vector<128x896xi32>
    %21 = arith.cmpi sge, %18, %20 : vector<128x896xi32>
    %c7_i32_7 = arith.constant 7 : i32
    %22 = vector.broadcast %c7_i32_7 : i32 to vector<128x896xi32>
    %23 = arith.addi %20, %22 : vector<128x896xi32>
    %24 = arith.cmpi slt, %18, %23 : vector<128x896xi32>
    %25 = arith.andi %21, %24 : vector<128x896xi1>
    %26 = arith.extui %25 : vector<128x896xi1> to vector<128x896xi32>
    %27 = arith.sitofp %26 : vector<128x896xi32> to vector<128x896xf32>
    %c0_8 = arith.constant 0 : index
    %c0_9 = arith.constant 0 : index
    %28 = vector.load %arg3[%c0_8, %c0_9] : memref<8x128xf32, #tpu.memory_space<vmem>>, vector<8x128xf32>
    %cst_10 = arith.constant dense<0.000000e+00> : vector<8x896xf32>
    %29 = tpu.matmul %28, %27, %cst_10 {dimension_numbers = #tpu.dot_dimension_numbers<[1], [0], [0], [1], [0, 0, 1, 1], [], []>, precision = #tpu.contract_precision<fp32>} : vector<8x128xf32>, vector<128x896xf32>, vector<8x896xf32> -> vector<8x896xf32>
    %30 = arith.mulf %16, %29 : vector<8x896xf32>
    %c0_11 = arith.constant 0 : index
    %c0_12 = arith.constant 0 : index
    %31 = vector.load %arg5[%c0_11, %c0_12] : memref<8x896xf32, #tpu.memory_space<vmem>>, vector<8x896xf32>
    tpu.vector_store %arg5[%c0_11, %c0_12], %30 {strides = array<i32>} : memref<8x896xf32, #tpu.memory_space<vmem>>, vector<8x896xf32>,
    return
  }
  func.func @transform_0(%arg0: i32) -> (i32, i32) {
    %c0_i32 = arith.constant 0 : i32
    %c0_i32_0 = arith.constant 0 : i32
    return %arg0, %c0_i32 : i32, i32
  }
  func.func @transform_1(%arg0: i32) -> (i32, i32) {
    %c0_i32 = arith.constant 0 : i32
    %c0_i32_0 = arith.constant 0 : i32
    return %arg0, %c0_i32 : i32, i32
  }
  func.func @transform_2(%arg0: i32) -> (i32, i32) {
    %c0_i32 = arith.constant 0 : i32
    %c0_i32_0 = arith.constant 0 : i32
    return %arg0, %c0_i32 : i32, i32
  }
  func.func @transform_3(%arg0: i32) -> (i32, i32) {
    %c0_i32 = arith.constant 0 : i32
    %c0_i32_0 = arith.constant 0 : i32
    %c0_i32_1 = arith.constant 0 : i32
    return %c0_i32, %c0_i32_0 : i32, i32
  }
  func.func @transform_4(%arg0: i32) -> (i32, i32) {
    %c0_i32 = arith.constant 0 : i32
    %c0_i32_0 = arith.constant 0 : i32
    return %arg0, %c0_i32 : i32, i32
  }
}

</mosaic_0001>

<bundles_post_ra>
// kernel: tpu_custom_call.1
= control target key start
LH: loop header
LB: loop body
LE: loop exit
PB: predicated region body
PF: predicated region fallthrough
CT: control target
= control target key end

     0   :  { %9 = vsyncpa [#allocation3], 0  ;;  %s7731_s0 = inlined_call_operand.hbm [shape: f32[8,896], index: 0, kind: input, shape index: {}]   ;;  %s7732_s1 = inlined_call_operand.hbm [shape: f32[8,896], index: 1, kind: input, shape index: {}]   ;;  %s7733_s2 = inlined_call_operand.hbm [shape: f32[8,128], index: 2, kind: input, shape index: {}]   ;;  %s7734_s3 = inlined_call_operand.hbm [shape: f32[1,896], index: 3, kind: input, shape index: {}]   ;;  %s7735_s4 = inlined_call_operand.hbm [shape: f32[8,896], index: 4, kind: output, shape index: {}]  }
   0x1   :  { %10 = vsyncpa [#allocation6], 0 }
   0x2   :  { %11 = vsyncpa [#allocation9], 0  ;;  %s29_s17 = sshll.u32 %s7732_s1, 4  ;;  %s30_s17 = int_to_ptr.hbm [resolvable:$true] %s29_s17 }
   0x3   :  { %12 = vsyncpa [#allocation4], 0  ;;  %s3802_s18 = smov [#allocation5]   ;;  %s18_s22 = sshll.u32 %s7731_s0, 4  ;;  %s19_s22 = int_to_ptr.hbm [resolvable:$true] %s18_s22 }
   0x4   :  { %s31_s19 = sshll.u32 %s3802_s18, 4  ;;  %s3803_s23 = smov [#allocation2]   ;;  %s32_s19 = int_to_ptr.vmem [resolvable:$true] %s31_s19 }
   0x5   :  { %34 = dma.hbm_to_vmem [thread:$0]  %s30_s17, 896, %s32_s19, [#allocation6]  }
   0x6   :  { %s20_s24 = sshll.u32 %s3803_s23, 4  ;;  %s40_s27 = sshll.u32 %s7733_s2, 4  ;;  %s21_s24 = int_to_ptr.vmem [resolvable:$true] %s20_s24  ;;  %s41_s27 = int_to_ptr.hbm [resolvable:$true] %s40_s27 }
   0x7   :  { %23 = dma.hbm_to_vmem [thread:$0]  %s19_s22, 896, %s21_s24, [#allocation3]  }
   0x8   :  { %s51_s29 = sshll.u32 %s7734_s3, 4  ;;  %s3804_s30 = smov [#allocation7]   ;;  %s52_s29 = int_to_ptr.hbm [resolvable:$true] %s51_s29 }
   0x9   :  { %s42_s5 = sshll.u32 %s3804_s30, 4  ;;  %s3805_s0 = smov [#allocation8]   ;;  %s43_s5 = int_to_ptr.vmem [resolvable:$true] %s42_s5 }
   0xa   :  { %45 = dma.hbm_to_vmem [thread:$0]  %s41_s27, 128, %s43_s5, [#allocation6]  }
   0xb   :  { %s53_s6 = sshll.u32 %s3805_s0, 4  ;;  %s54_s6 = int_to_ptr.vmem [resolvable:$true] %s53_s6 }
   0xc   :  { %56 = dma.hbm_to_vmem [thread:$0]  %s52_s29, 112, %s54_s6, [#allocation9]  }
   0xd   :  { %3794 = dma.done.wait [#allocation3], 896  }
   0xe   :  { %3795 = vsyncadd [#allocation3], 4294966400 }
   0xf   :  { %3796 = dma.done.wait [#allocation6], 1024  }
  0x10   :  { %3797 = vsyncadd [#allocation6], 4294966272  ;;  %v173_v0 = vlaneseq }
  0x11   :  { %3798 = dma.done.wait [#allocation9], 112  }
  0x12   :  { %3799 = vsyncadd [#allocation9], 4294967184  ;;  %v3846_v1 = vshrl.u32 %v173_v0, 7  ;;  %v3848_v2 = vand.u32 127, %v173_v0  ;;  %v7751_v26 = vmov 1.0   ;;  %v7746_v28 = vmov 0.0  }
  0x13   :  { %v8088_v59 = vmov 0  ;;  %s3808_s2 = smov [#allocation10]   ;;  %s3199_s9 = sshll.u32 %s7735_s4, 4  ;;  %s3200_s9 = int_to_ptr.hbm [resolvable:$true] %s3199_s9 }
  0x14   :  { %8056 = vst [vmem:[#allocation15_spill] sm:$0xff] %v3848_v2  ;;  %v189_v3 = vadd.s32 120, %v3846_v1  ;;  %v188_v4 = vadd.s32 112, %v3846_v1  ;;  %v187_v5 = vadd.s32 104, %v3846_v1  ;;  %v186_v6 = vadd.s32 96, %v3846_v1  ;;  %s3197_s3 = sshll.u32 %s3808_s2, 4  ;;  %s3198_s3 = int_to_ptr.vmem [resolvable:$true] %s3197_s3 }
  0x15   :  { %v185_v7 = vadd.s32 88, %v3846_v1  ;;  %v184_v8 = vadd.s32 80, %v3846_v1  ;;  %v183_v9 = vadd.s32 72, %v3846_v1  ;;  %v182_v10 = vadd.s32 64, %v3846_v1 }
  0x16   :  { %v3858_v11 = vmul.u32 7, %v189_v3  ;;  %v3860_v12 = vmul.u32 7, %v188_v4  ;;  %v3862_v13 = vmul.u32 7, %v187_v5  ;;  %v3864_v14 = vmul.u32 7, %v186_v6 }
  0x17   :  { %v3866_v15 = vmul.u32 7, %v185_v7  ;;  %v3868_v16 = vmul.u32 7, %v184_v8  ;;  %v3870_v17 = vmul.u32 7, %v183_v9  ;;  %v3872_v18 = vmul.u32 7, %v182_v10 }
  0x18   :  { %8057 = vst [vmem:[#allocation16_spill] sm:$0xff] %v3858_v11  ;;  %vm319_vm0 = vcmp.ge.s32.totalorder %v3848_v2, %v3858_v11  ;;  %v3877_v19 = vadd.s32 7, %v3858_v11  ;;  %vm312_vm1 = vcmp.ge.s32.totalorder %v3848_v2, %v3860_v12  ;;  %v3882_v20 = vadd.s32 7, %v3860_v12 }
  0x19   :  { %8058 = vst [vmem:[#allocation17_spill] sm:$0xff] %v3860_v12  ;;  %vm305_vm2 = vcmp.ge.s32.totalorder %v3848_v2, %v3862_v13  ;;  %v3887_v21 = vadd.s32 7, %v3862_v13  ;;  %vm298_vm3 = vcmp.ge.s32.totalorder %v3848_v2, %v3864_v14  ;;  %v3892_v22 = vadd.s32 7, %v3864_v14 }
  0x1a   :  { %8059 = vst [vmem:[#allocation18_spill] sm:$0xff] %v3862_v13  ;;  %vm447_vm4 = vcmp.lt.s32.totalorder %v3848_v2, %v3877_v19  ;;  %vm440_vm5 = vcmp.lt.s32.totalorder %v3848_v2, %v3882_v20  ;;  %vm291_vm6 = vcmp.ge.s32.totalorder %v3848_v2, %v3866_v15  ;;  %v3901_v23 = vadd.s32 7, %v3866_v15 }
  0x1b   :  { %8060 = vst [vmem:[#allocation19_spill] sm:$0xff] %v3864_v14  ;;  %vm3903_vm7 = vmand %vm319_vm0, %vm447_vm4  ;;  %vm433_vm8 = vcmp.lt.s32.totalorder %v3848_v2, %v3887_v21  ;;  %vm426_vm9 = vcmp.lt.s32.totalorder %v3848_v2, %v3892_v22  ;;  %vm284_vm10 = vcmp.ge.s32.totalorder %v3848_v2, %v3868_v16  ;;  %v3914_v25 = vadd.s32 7, %v3868_v16 }
  0x1c   :  { %8061 = vst [vmem:[#allocation20_spill] sm:$0xff] %v3866_v15  ;;  %3330 = vmatpush.msk.msra.mxu0 %vm3903_vm7, %v7751_v26  ;;  %vm3922_vm11 = vmand %vm312_vm1, %vm440_vm5  ;;  %v3323_v29 = vsel %vm3903_vm7, 1.0, %v7746_v28  ;;  %vm419_vm12 = vcmp.lt.s32.totalorder %v3848_v2, %v3901_v23  ;;  %vm277_vm13 = vcmp.ge.s32.totalorder %v3848_v2, %v3870_v17  ;;  %v3934_v30 = vadd.s32 7, %v3870_v17  ;;  %3346 = vmatpush.msk.msra.mxu3 %vm3903_vm7, %v7751_v26 }
  0x1d   :  { %8062 = vst [vmem:[#allocation21_spill] sm:$0xff] %v3868_v16  ;;  %vm3942_vm14 = vmand %vm305_vm2, %vm433_vm8  ;;  %v3946_v32 = vsub.f32 %v3323_v29, %v3323_v29  ;;  %v3316_v33 = vsel %vm3922_vm11, 1.0, %v7746_v28  ;;  %vm412_vm15 = vcmp.lt.s32.totalorder %v3848_v2, %v3914_v25  ;;  %vm270_vm0 = vcmp.ge.s32.totalorder %v3848_v2, %v3872_v18 }
  0x1e   :  { %8063 = vst [vmem:[#allocation22_spill] sm:$0xff] %v3870_v17  ;;  %3331 = vmatpush.msk.msra.mxu0 %vm3922_vm11, %v7751_v26  ;;  %vm3964_vm1 = vmand %vm298_vm3, %vm426_vm9  ;;  %v3968_v35 = vsub.f32 %v3316_v33, %v3316_v33  ;;  %v3309_v36 = vsel %vm3942_vm14, 1.0, %v7746_v28  ;;  %vm405_vm2 = vcmp.lt.s32.totalorder %v3848_v2, %v3934_v30  ;;  %v3976_v37 = vadd.s32 7, %v3872_v18  ;;  %3347 = vmatpush.msk.msra.mxu3 %vm3922_vm11, %v7751_v26 }
  0x1f   :  { %8064 = vst [vmem:[#allocation23_spill] sm:$0xff] %v3872_v18  ;;  %v7744_v38 = vand.u32 4294901760, %v3946_v32  ;;  %vm3988_vm3 = vmand %vm291_vm6, %vm419_vm12  ;;  %v3992_v40 = vsub.f32 %v3309_v36, %v3309_v36  ;;  %v3302_v41 = vsel %vm3964_vm1, 1.0, %v7746_v28  ;;  %v181_v42 = vadd.s32 56, %v3846_v1  ;;  %935 = vmatpush.msra.mxu2 %v3946_v32 }
  0x20   :  { %8065 = vst [vmem:[#allocation24_spill] sm:$0xff] %v3877_v19  ;;  %3332 = vmatpush.msk.msra.mxu0 %vm3942_vm14, %v7751_v26  ;;  %v7743_v43 = vand.u32 4294901760, %v3968_v35  ;;  %vm4009_vm4 = vmand %vm284_vm10, %vm412_vm15  ;;  %v4013_v45 = vsub.f32 %v3302_v41, %v3302_v41  ;;  %v3295_v46 = vsel %vm3988_vm3, 1.0, %v7746_v28  ;;  %vm398_vm5 = vcmp.lt.s32.totalorder %v3848_v2, %v3976_v37  ;;  %3348 = vmatpush.msk.msra.mxu3 %vm3942_vm14, %v7751_v26 }
  0x21   :  { %8066 = vst [vmem:[#allocation25_spill] sm:$0xff] %v3882_v20  ;;  %v835_v47 = vsub.f32 %v3946_v32, %v7744_v38  ;;  %v7742_v48 = vand.u32 4294901760, %v3992_v40  ;;  %vm4033_vm6 = vmand %vm277_vm13, %vm405_vm2  ;;  %v4037_v50 = vsub.f32 %v3295_v46, %v3295_v46  ;;  %v3288_v51 = vsel %vm4009_vm4, 1.0, %v7746_v28  ;;  %938 = vmatpush.msra.mxu2 %v3968_v35 }
  0x22   :  { %8067 = vst [vmem:[#allocation26_spill] sm:$0xff] %v3887_v21  ;;  %3333 = vmatpush.msk.msra.mxu0 %vm3964_vm1, %v7751_v26  ;;  %v841_v52 = vsub.f32 %v3968_v35, %v7743_v43  ;;  %v7741_v53 = vand.u32 4294901760, %v4013_v45  ;;  %v4050_v54 = vsub.f32 %v3288_v51, %v3288_v51  ;;  %v4052_v55 = vmul.u32 7, %v181_v42  ;;  %3349 = vmatpush.msk.msra.mxu3 %vm3964_vm1, %v7751_v26  ;;  %vm4067_vm8 = vmand %vm270_vm0, %vm398_vm5 }
  0x23   :  { %8068 = vst [vmem:[#allocation27_spill] sm:$0xff] %v3892_v22  ;;  %v836_v56 = vand.u32 4294901760, %v835_v47  ;;  %v847_v57 = vsub.f32 %v3992_v40, %v7742_v48  ;;  %v7740_v58 = vand.u32 4294901760, %v4037_v50  ;;  %v8089_v59 = vsel %vm4067_vm8, 4294967295, %v8088_v59  ;;  %941 = vmatpush.msra.mxu2 %v3992_v40 }
  0x24   :  { %8069 = vst [vmem:[#allocation28_spill] sm:$0xff] %v3901_v23  ;;  %v3281_v60 = vsel %vm4033_vm6, 1.0, %v7746_v28  ;;  %v842_v61 = vand.u32 4294901760, %v841_v52  ;;  %3334 = vmatpush.msk.msra.mxu0 %vm3988_vm3, %v7751_v26  ;;  %v853_v62 = vsub.f32 %v4013_v45, %v7741_v53  ;;  %v7739_v63 = vand.u32 4294901760, %v4050_v54  ;;  %3350 = vmatpush.msk.msra.mxu3 %vm3988_vm3, %v7751_v26 }
  0x25   :  { %8072 = vst [vmem:[#allocation29_spill] sm:$0xff] %v3914_v25  ;;  %vm263_vm9 = vcmp.ge.s32.totalorder %v3848_v2, %v4052_v55  ;;  %837 = vmatpush.msra.mxu1 %v836_v56  ;;  %v848_v0 = vand.u32 4294901760, %v847_v57  ;;  %v859_v3 = vsub.f32 %v4037_v50, %v7740_v58  ;;  %v4091_v4 = vadd.s32 7, %v4052_v55  ;;  %944 = vmatpush.msra.mxu2 %v4013_v45 }
  0x26   :  { %8075 = vst [vmem:[#allocation30_spill] sm:$0xff] %v3934_v30  ;;  %v4093_v5 = vsub.f32 %v3281_v60, %v3281_v60  ;;  %3335 = vmatpush.msk.msra.mxu0 %vm4009_vm4, %v7751_v26  ;;  %v854_v6 = vand.u32 4294901760, %v853_v62  ;;  %v865_v7 = vsub.f32 %v4050_v54, %v7739_v63  ;;  %v180_v8 = vadd.s32 48, %v3846_v1  ;;  %3351 = vmatpush.msk.msra.mxu3 %vm4009_vm4, %v7751_v26 }
  0x27   :  { %8080 = vst [vmem:[#allocation31_spill] sm:$0xff] %v3976_v37  ;;  %v3274_v9 = vsel %vm4067_vm8, 1.0, %v7746_v28  ;;  %843 = vmatpush.msra.mxu1 %v842_v61  ;;  %v860_v10 = vand.u32 4294901760, %v859_v3  ;;  %vm391_vm10 = vcmp.lt.s32.totalorder %v3848_v2, %v4091_v4  ;;  %947 = vmatpush.msra.mxu2 %v4037_v50  ;;  %v8092_v41 = vmov 0 }
  0x28   :  { %8087 = vst [vmem:[#allocation32_spill] sm:$0xff] %v4052_v55  ;;  %v7738_v29 = vand.u32 4294901760, %v4093_v5  ;;  %v4112_v33 = vsub.f32 %v3274_v9, %v3274_v9  ;;  %3336 = vmatpush.msk.msra.mxu0 %vm4033_vm6, %v7751_v26  ;;  %v866_v36 = vand.u32 4294901760, %v865_v7  ;;  %vm4121_vm12 = vmand %vm263_vm9, %vm391_vm10  ;;  %v4125_v42 = vmul.u32 7, %v180_v8  ;;  %3352 = vmatpush.msk.msra.mxu3 %vm4033_vm6, %v7751_v26 }
  0x29   :  { %8090 = vst [vmem:[#allocation33_spill] sm:$0xff] %v8089_v59  ;;  %v8093_v41 = vsel %vm4121_vm12, 4294967295, %v8092_v41  ;;  %v179_v46 = vadd.s32 40, %v3846_v1  ;;  %v178_v47 = vadd.s32 32, %v3846_v1  ;;  %849 = vmatpush.msra.mxu1 %v848_v0  ;;  %v3267_v56 = vsel %vm4121_vm12, 1.0, %v7746_v28  ;;  %950 = vmatpush.msra.mxu2 %v4050_v54 }
  0x2a   :  { %8091 = vst [vmem:[#allocation34_spill] sm:$0xff] %v4091_v4  ;;  %v871_v51 = vsub.f32 %v4093_v5, %v7738_v29  ;;  %v7737_v52 = vand.u32 4294901760, %v4112_v33  ;;  %v177_v57 = vadd.s32 24, %v3846_v1  ;;  %3337 = vmatpush.msk.msra.mxu0 %vm4067_vm8, %v7751_v26  ;;  %vm256_vm13 = vcmp.ge.s32.totalorder %v3848_v2, %v4125_v42  ;;  %3353 = vmatpush.msk.msra.mxu3 %vm4067_vm8, %v7751_v26 }
  0x2b   :  { %8094 = vst [vmem:[#allocation35_spill] sm:$0xff] %v8093_v41  ;;  %v4147_v60 = vadd.s32 7, %v4125_v42  ;;  %v4149_v61 = vmul.u32 7, %v179_v46  ;;  %v4151_v62 = vsub.f32 %v3267_v56, %v3267_v56  ;;  %855 = vmatpush.msra.mxu1 %v854_v6  ;;  %v4159_v7 = vmul.u32 7, %v178_v47  ;;  %953 = vmatpush.msra.mxu2 %v4093_v5 }
  0x2c   :  { %8095 = vst [vmem:[#allocation36_spill] sm:$0xff] %v4125_v42  ;;  %v872_v0 = vand.u32 4294901760, %v871_v51  ;;  %v877_v3 = vsub.f32 %v4112_v33, %v7737_v52  ;;  %v4161_v8 = vmul.u32 7, %v177_v57  ;;  %3338 = vmatpush.msk.msra.mxu0 %vm4121_vm12, %v7751_v26  ;;  %3354 = vmatpush.msk.msra.mxu3 %vm4121_vm12, %v7751_v26  ;;  %v8101_v46 = vmov 0 }
  0x2d   :  { %8096 = vst [vmem:[#allocation37_spill] sm:$0xff] %v4147_v60  ;;  %vm384_vm15 = vcmp.lt.s32.totalorder %v3848_v2, %v4147_v60  ;;  %vm249_vm0 = vcmp.ge.s32.totalorder %v3848_v2, %v4149_v61  ;;  %v4172_v6 = vadd.s32 7, %v4149_v61  ;;  %v7736_v9 = vand.u32 4294901760, %v4151_v62  ;;  %861 = vmatpush.msra.mxu1 %v860_v10  ;;  %956 = vmatpush.msra.mxu2 %v4112_v33 }
  0x2e   :  { %8097 = vst [vmem:[#allocation38_spill] sm:$0xff] %v4149_v61  ;;  %vm4181_vm2 = vmand %vm256_vm13, %vm384_vm15  ;;  %v878_v47 = vand.u32 4294901760, %v877_v3  ;;  %vm242_vm5 = vcmp.ge.s32.totalorder %v3848_v2, %v4159_v7  ;;  %v4188_v51 = vadd.s32 7, %v4159_v7  ;;  %vm235_vm9 = vcmp.ge.s32.totalorder %v3848_v2, %v4161_v8 }
  0x2f   :  { %8098 = vst [vmem:[#allocation39_spill] sm:$0xff] %v4159_v7  ;;  %v8102_v46 = vsel %vm4181_vm2, 4294967295, %v8101_v46  ;;  %3339 = vmatpush.msk.msra.mxu0 %vm4181_vm2, %v7751_v26  ;;  %vm377_vm10 = vcmp.lt.s32.totalorder %v3848_v2, %v4172_v6  ;;  %v883_v10 = vsub.f32 %v4151_v62, %v7736_v9  ;;  %v3260_v56 = vsel %vm4181_vm2, 1.0, %v7746_v28  ;;  %3355 = vmatpush.msk.msra.mxu3 %vm4181_vm2, %v7751_v26 }
  0x30   :  { %8099 = vst [vmem:[#allocation40_spill] sm:$0xff] %v4161_v8  ;;  %v4205_v57 = vadd.s32 7, %v4161_v8  ;;  %867 = vmatpush.msra.mxu1 %v866_v36  ;;  %vm4213_vm13 = vmand %vm249_vm0, %vm377_vm10  ;;  %v8106_v3 = vmov 0  ;;  %vm370_vm15 = vcmp.lt.s32.totalorder %v3848_v2, %v4188_v51  ;;  %v4219_v9 = vsub.f32 %v3260_v56, %v3260_v56  ;;  %959 = vmatpush.msra.mxu2 %v4151_v62 }
  0x31   :  { %8100 = vst [vmem:[#allocation41_spill] sm:$0xff] %v4172_v6  ;;  %v8107_v3 = vsel %vm4213_vm13, 4294967295, %v8106_v3  ;;  %v176_v52 = vadd.s32 16, %v3846_v1  ;;  %v175_v29 = vadd.s32 8, %v3846_v1  ;;  %3340 = vmatpush.msk.msra.mxu0 %vm4213_vm13, %v7751_v26  ;;  %v884_v36 = vand.u32 4294901760, %v883_v10  ;;  %vm4230_vm0 = vmand %vm242_vm5, %vm370_vm15  ;;  %3356 = vmatpush.msk.msra.mxu3 %vm4213_vm13, %v7751_v26 }
  0x32   :  { %8103 = vst [vmem:[#allocation42_spill] sm:$0xff] %v8102_v46  ;;  %v8109_v63 = vmov 0  ;;  %vm363_vm10 = vcmp.lt.s32.totalorder %v3848_v2, %v4205_v57  ;;  %v3253_v56 = vsel %vm4213_vm13, 1.0, %v7746_v28  ;;  %v4240_v58 = vmul.u32 7, %v3846_v1  ;;  %873 = vmatpush.msra.mxu1 %v872_v0  ;;  %962 = vmatpush.msra.mxu2 %v4219_v9 }
  0x33   :  { %8104 = vst [vmem:[#allocation43_spill] sm:$0xff] %v4188_v51  ;;  %v8110_v63 = vsel %vm4230_vm0, 4294967295, %v8109_v63  ;;  %v7745_v10 = vand.u32 4294901760, %v4219_v9  ;;  %vm4249_vm5 = vmand %vm235_vm9, %vm363_vm10  ;;  %v8113_v53 = vmov 0  ;;  %v4253_v48 = vsub.f32 %v3253_v56, %v3253_v56  ;;  %3341 = vmatpush.msk.msra.mxu0 %vm4230_vm0, %v7751_v26  ;;  %3357 = vmatpush.msk.msra.mxu3 %vm4230_vm0, %v7751_v26 }
  0x34   :  { %8105 = vst [vmem:[#allocation44_spill] sm:$0xff] %v4205_v57  ;;  %v8114_v53 = vsel %vm4249_vm5, 4294967295, %v8113_v53  ;;  %v4255_v43 = vmul.u32 7, %v176_v52  ;;  %v3246_v1 = vsel %vm4230_vm0, 1.0, %v7746_v28  ;;  %v4266_v38 = vmul.u32 7, %v175_v29  ;;  %879 = vmatpush.msra.mxu1 %v878_v47 }
  0x35   :  { %8108 = vst [vmem:[#allocation45_spill] sm:$0xff] %v8107_v3  ;;  %v4264_v0 = vsub.f32 %v3246_v1, %v3246_v1  ;;  %v3239_v56 = vsel %vm4249_vm5, 1.0, %v7746_v28  ;;  %v889_v52 = vsub.f32 %v4219_v9, %v7745_v10  ;;  %965 = vmatpush.msra.mxu2 %v4253_v48  ;;  %3342 = vmatpush.msk.msra.mxu0 %vm4249_vm5, %v7751_v26  ;;  %v4306_v47 = vadd.s32 7, %v4240_v58 }
  0x36   :  { %8111 = vst [vmem:[#allocation46_spill] sm:$0xff] %v8110_v63  ;;  %vm228_vm15 = vcmp.ge.s32.totalorder %v3848_v2, %v4255_v43  ;;  %v4283_v29 = vadd.s32 7, %v4255_v43  ;;  %v4293_v10 = vadd.s32 7, %v4266_v38  ;;  %v4295_v28 = vsub.f32 %v3239_v56, %v3239_v56  ;;  %3358 = vmatpush.msk.msra.mxu3 %vm4249_vm5, %v7751_v26  ;;  %885 = vmatpush.msra.mxu1 %v884_v36  ;;  %v4309_v56 = vld [vmem:[#allocation7] sm:$0xff] }
  0x37   :  { %8112 = vst [vmem:[#allocation47_spill] sm:$0xff] %v4240_v58  ;;  %v890_v1 = vand.u32 4294901760, %v889_v52  ;;  %v8121_v63 = vand.u32 4294901760, %v4253_v48  ;;  %968 = vmatpush.msra.mxu2 %v4264_v0  ;;  %v8123_v36 = vmov 0  ;;  %v8125_v52 = vand.u32 4294901760, %v4264_v0 }
  0x38   :  { %8115 = vst [vmem:[#allocation48_spill] sm:$0xff] %v8114_v53  ;;  %vm356_vm9 = vcmp.lt.s32.totalorder %v3848_v2, %v4283_v29  ;;  %vm349_vm5 = vcmp.lt.s32.totalorder %v3848_v2, %v4293_v10  ;;  %v4325_v53 = vadd.s32 128, %v3848_v2  ;;  %v8126_v41 = vmov 1.0  }
  0x39   :  { %8116 = vst [vmem:[#allocation49_spill] sm:$0xff] %v4255_v43  ;;  %v895_v3 = vsub.f32 %v4253_v48, %v8121_v63  ;;  %vm4314_vm10 = vmand %vm228_vm15, %vm356_vm9  ;;  %v901_v63 = vsub.f32 %v4264_v0, %v8125_v52  ;;  %891 = vmatpush.msra.mxu1 %v890_v1  ;;  %vm8127_vm9 = vcmp.ge.s32.totalorder %v3848_v2, %v4266_v38  ;;  %v8128_v59 = vmov 0 }
  0x3a   :  { %8117 = vst [vmem:[#allocation50_spill] sm:$0xff] %v4264_v0  ;;  %v8124_v36 = vsel %vm4314_vm10, 4294967295, %v8123_v36  ;;  %3343 = vmatpush.msk.msra.mxu0 %vm4314_vm10, %v8126_v41  ;;  %vm4333_vm15 = vmand %vm8127_vm9, %vm349_vm5  ;;  %vm342_vm0 = vcmp.lt.s32.totalorder %v3848_v2, %v4306_v47  ;;  %v8130_v52 = vmov 0.0   ;;  %vm8133_vm5 = vcmp.ge.s32.totalorder %v3848_v2, %v4240_v58  ;;  %971 = vmatpush.msra.mxu2 %v4295_v28 }
  0x3b   :  { %8118 = vst [vmem:[#allocation51_spill] sm:$0xff] %v4266_v38  ;;  %v896_v46 = vand.u32 4294901760, %v895_v3  ;;  %v8129_v59 = vsel %vm4333_vm15, 4294967295, %v8128_v59  ;;  %v3232_v26 = vsel %vm4314_vm10, 1.0, %v8130_v52  ;;  %v4343_v3 = vand.u32 4294901760, %v4309_v56  ;;  %vm4351_vm9 = vmand %vm8133_vm5, %vm342_vm0  ;;  %3359 = vmatpush.msk.msra.mxu3 %vm4314_vm10, %v8126_v41 }
  0x3c   :  { %8119 = vst [vmem:[#allocation52_spill] sm:$0xff] %v4283_v29  ;;  %v902_v1 = vand.u32 4294901760, %v901_v63  ;;  %v8134_v38 = vmov 0  ;;  %v3225_v29 = vsel %vm4333_vm15, 1.0, %v8130_v52  ;;  %3344 = vmatpush.msk.msra.mxu0 %vm4333_vm15, %v8126_v41  ;;  %vm320_vm0 = vcmp.ge.s32.totalorder %v4325_v53, %v3858_v11 }
  0x3d   :  { %8120 = vst [vmem:[#allocation53_spill] sm:$0xff] %v4293_v10  ;;  %v8132_v10 = vand.u32 4294901760, %v4295_v28  ;;  %v8135_v38 = vsel %vm4351_vm9, 4294967295, %v8134_v38  ;;  %897 = vmatpush.msra.mxu1 %v896_v46  ;;  %vm448_vm5 = vcmp.lt.s32.totalorder %v4325_v53, %v3877_v19  ;;  %3360 = vmatpush.msk.msra.mxu3 %vm4333_vm15, %v8126_v41  ;;  %vm313_vm13 = vcmp.ge.s32.totalorder %v4325_v53, %v3860_v12 }
  0x3e   :  { %8122 = vst [vmem:[#allocation54_spill] sm:$0xff] %v4306_v47  ;;  %v4355_v47 = vsub.f32 %v3232_v26, %v3232_v26  ;;  %v3218_v26 = vsel %vm4351_vm9, 1.0, %v8130_v52  ;;  %vm4383_vm10 = vmand %vm320_vm0, %vm448_vm5  ;;  %3345 = vmatpush.msk.msra.mxu0 %vm4351_vm9, %v8126_v41  ;;  %vm441_vm2 = vcmp.lt.s32.totalorder %v4325_v53, %v3882_v20  ;;  %vm306_vm0 = vcmp.ge.s32.totalorder %v4325_v53, %v3862_v13 }
  0x3f   :  { %8131 = vst [vmem:[#allocation55_spill] sm:$0xff] %v4343_v3  ;;  %v907_v0 = vsub.f32 %v4295_v28, %v8132_v10  ;;  %v4367_v10 = vsub.f32 %v3225_v29, %v3225_v29  ;;  %v4377_v46 = vsub.f32 %v3218_v26, %v3218_v26  ;;  %v8137_v29 = vmov 0  ;;  %903 = vmatpush.msra.mxu1 %v902_v1  ;;  %vm4407_vm5 = vmand %vm313_vm13, %vm441_vm2 }
  0x40   :  { %8136 = vst [vmem:[#allocation56_spill] sm:$0xff] %v8135_v38  ;;  %v7781_v2 = vand.u32 4294901760, %v4355_v47  ;;  %974 = vmatpush.msra.mxu2 %v4355_v47  ;;  %v8138_v29 = vsel %vm4383_vm10, 4294967295, %v8137_v29  ;;  %v3324_v26 = vsel %vm4383_vm10, 1.0, %v8130_v52  ;;  %v8139_v12 = vand.u32 4294901760, %v3946_v32  ;;  %3361 = vmatpush.msk.msra.mxu3 %vm4351_vm9, %v8126_v41 }
  0x41   :  { %v908_v63 = vand.u32 4294901760, %v907_v0  ;;  %v7790_v19 = vand.u32 4294901760, %v4377_v46  ;;  %v8140_v0 = vmov 0  ;;  %v4411_v20 = vsub.f32 %v3324_v26, %v3324_v26 }
  0x42   :  { %v913_v1 = vsub.f32 %v4355_v47, %v7781_v2  ;;  %1029 = vmatpush.msrb.mxu0 %v8139_v12  ;;  %977 = vmatpush.msra.mxu2 %v4367_v10  ;;  %v8141_v0 = vsel %vm4407_vm5, 4294967295, %v8140_v0  ;;  %vm434_vm15 = vcmp.lt.s32.totalorder %v4325_v53, %v3887_v21  ;;  %v8142_v13 = vand.u32 4294901760, %v4367_v10 }
  0x43   :  { %909 = vmatpush.msra.mxu1 %v908_v63  ;;  %vm4421_vm12 = vmand %vm306_vm0, %vm434_vm15  ;;  %v8143_v12 = vmov 0  ;;  %v3317_v32 = vsel %vm4407_vm5, 1.0, %v8130_v52  ;;  %vm299_vm2 = vcmp.ge.s32.totalorder %v4325_v53, %v3864_v14  ;;  %vm427_vm13 = vcmp.lt.s32.totalorder %v4325_v53, %v3892_v22 }
  0x44   :  { %v919_v2 = vsub.f32 %v4367_v10, %v8142_v13  ;;  %v8144_v12 = vsel %vm4421_vm12, 4294967295, %v8143_v12  ;;  %v914_v63 = vand.u32 4294901760, %v913_v1  ;;  %v8145_v13 = vand.u32 4294901760, %v3968_v35  ;;  %980 = vmatpush.msra.mxu2 %v4377_v46  ;;  %vm4441_vm15 = vmand %vm299_vm2, %vm427_vm13 }
  0x45   :  { %v925_v26 = vsub.f32 %v4377_v46, %v7790_v19  ;;  %v7795_v21 = vand.u32 4294901760, %v4411_v20  ;;  %v4439_v11 = vsub.f32 %v3317_v32, %v3317_v32  ;;  %v8146_v38 = vmov 0 }
  0x46   :  { %1033 = vmatpush.msrb.mxu0 %v8145_v13  ;;  %v8147_v38 = vsel %vm4441_vm15, 4294967295, %v8146_v38  ;;  %v920_v14 = vand.u32 4294901760, %v919_v2  ;;  %3378 = vmatpush.msk.msrb.mxu2 %vm4383_vm10, %v8126_v41  ;;  %v3310_v35 = vsel %vm4421_vm12, 1.0, %v8130_v52  ;;  %v4453_v1 = vsub.f32 %v4309_v56, %v4343_v3 }
  0x47   :  { %vm292_vm0 = vcmp.ge.s32.totalorder %v4325_v53, %v3866_v15  ;;  %915 = vmatpush.msra.mxu1 %v914_v63  ;;  %v926_v32 = vand.u32 4294901760, %v925_v26  ;;  %v8149_v13 = vand.u32 4294901760, %v3992_v40  ;;  %v1176_v2 = vsub.f32 %v4411_v20, %v7795_v21 }
  0x48   :  { %8148 = vst [vmem:[#allocation57_spill] sm:$0xff] %v4453_v1  ;;  %v7798_v19 = vand.u32 4294901760, %v4439_v11  ;;  %v4463_v22 = vsub.f32 %v3310_v35, %v3310_v35  ;;  %3379 = vmatpush.msk.msrb.mxu2 %vm4407_vm5, %v8126_v41  ;;  %vm420_vm2 = vcmp.lt.s32.totalorder %v4325_v53, %v3901_v23  ;;  %v3303_v40 = vsel %vm4441_vm15, 1.0, %v8130_v52 }
  0x49   :  { %1037 = vmatpush.msrb.mxu0 %v8149_v13  ;;  %v4474_v56 = vand.u32 4294901760, %v4453_v1  ;;  %921 = vmatpush.msra.mxu1 %v920_v14  ;;  %v8151_v63 = vand.u32 4294901760, %v4013_v45  ;;  %v1177_v26 = vand.u32 4294901760, %v1176_v2  ;;  %vm4487_vm5 = vmand %vm292_vm0, %vm420_vm2  ;;  %v4491_v23 = vsub.f32 %v3303_v40, %v3303_v40 }
  0x4a   :  { %v1182_v35 = vsub.f32 %v4439_v11, %v7798_v19  ;;  %v7812_v13 = vand.u32 4294901760, %v4463_v22  ;;  %3380 = vmatpush.msk.msrb.mxu2 %vm4421_vm12, %v8126_v41  ;;  %vm413_vm13 = vcmp.lt.s32.totalorder %v4325_v53, %v3914_v25  ;;  %v3296_v45 = vsel %vm4487_vm5, 1.0, %v8130_v52 }
  0x4b   :  { %8150 = vst [vmem:[#allocation58_spill] sm:$0xff] %v4474_v56  ;;  %1041 = vmatpush.msrb.mxu0 %v8151_v63  ;;  %v826_v14 = vsub.f32 %v4453_v1, %v4474_v56  ;;  %1022 = vmatmul.f32.vlgmr.msra.gmra.mxu3 %v4474_v56  ;;  %v8154_v2 = vand.u32 4294901760, %v4037_v50  ;;  %v7807_v19 = vand.u32 4294901760, %v4491_v23  ;;  %vm8155_vm2 = vcmp.ge.s32.totalorder %v4325_v53, %v3868_v16 }
  0x4c   :  { %927 = vmatpush.msra.mxu1 %v926_v32  ;;  %v1183_v40 = vand.u32 4294901760, %v1182_v35  ;;  %v1188_v63 = vsub.f32 %v4463_v22, %v7812_v13  ;;  %vm4515_vm12 = vmand %vm8155_vm2, %vm413_vm13  ;;  %v4519_v25 = vsub.f32 %v3296_v45, %v3296_v45  ;;  %1178 = vmatpush.msrb.mxu3 %v1177_v26  ;;  %vm406_vm0 = vcmp.lt.s32.totalorder %v4325_v53, %v3934_v30 }
  0x4d   :  { %1045 = vmatpush.msrb.mxu0 %v8154_v2  ;;  %v4524_v50 = vand.u32 4294901760, %v826_v14  ;;  %v3289_v32 = vsel %vm4515_vm12, 1.0, %v8130_v52  ;;  %v8159_v35 = vand.u32 4294901760, %v4050_v54  ;;  %3381 = vmatpush.msk.msrb.mxu2 %vm4441_vm15, %v8126_v41  ;;  %v1194_v26 = vsub.f32 %v4491_v23, %v7807_v19 }
  0x4e   :  { %3362 = vmatpush.msk.msrb.mxu1 %vm3903_vm7, %v8126_v41  ;;  %v1189_v24 = vand.u32 4294901760, %v1188_v63  ;;  %v7811_v14 = vand.u32 4294901760, %v4519_v25  ;;  %vm8160_vm7 = vcmp.ge.s32.totalorder %v4325_v53, %v3870_v17  ;;  %v4549_v54 = vsub.f32 %v3289_v32, %v3289_v32  ;;  %1184 = vmatpush.msrb.mxu3 %v1183_v40 }
  0x4f   :  { %8158 = vst [vmem:[#allocation59_spill] sm:$0xff] %v4524_v50  ;;  %1049 = vmatpush.msrb.mxu0 %v8159_v35  ;;  %vm4545_vm2 = vmand %vm8160_vm7, %vm406_vm0  ;;  %vm399_vm13 = vcmp.lt.s32.totalorder %v4325_v53, %v3976_v37  ;;  %vm264_vm0 = vcmp.ge.s32.totalorder %v4325_v53, %v4052_v55  ;;  %vm392_vm7 = vcmp.lt.s32.totalorder %v4325_v53, %v4091_v4  ;;  %v8163_v63 = vand.u32 4294901760, %v4093_v5 }
  0x50   :  { %3363 = vmatpush.msk.msrb.mxu1 %vm3922_vm11, %v8126_v41  ;;  %v3282_v2 = vsel %vm4545_vm2, 1.0, %v8130_v52  ;;  %983 = vmatmul.f32.vlgmr.msra.gmra.mxu2 %v4453_v1  ;;  %v1195_v27 = vand.u32 4294901760, %v1194_v26  ;;  %v1200_v40 = vsub.f32 %v4519_v25, %v7811_v14  ;;  %v7813_v32 = vand.u32 4294901760, %v4549_v54  ;;  %vm4582_vm10 = vmand %vm264_vm0, %vm392_vm7 }
  0x51   :  { %1053 = vmatpush.msrb.mxu0 %v8163_v63  ;;  %vm8164_vm11 = vcmp.ge.s32.totalorder %v4325_v53, %v3872_v18  ;;  %v4577_v19 = vsub.f32 %v3282_v2, %v3282_v2  ;;  %1190 = vmatpush.msrb.mxu3 %v1189_v24  ;;  %vm250_vm9 = vcmp.ge.s32.totalorder %v4325_v53, %v4149_v61  ;;  %v8169_v31 = vand.u32 4294901760, %v4112_v33 }
  0x52   :  { %vm4573_vm15 = vmand %vm8164_vm11, %vm399_vm13  ;;  %3364 = vmatpush.msk.msrb.mxu1 %vm3942_vm14, %v8126_v41  ;;  %vm257_vm13 = vcmp.ge.s32.totalorder %v4325_v53, %v4125_v42  ;;  %vm385_vm11 = vcmp.lt.s32.totalorder %v4325_v53, %v4147_v60  ;;  %3382 = vmatpush.msk.msrb.mxu2 %vm4487_vm5, %v8126_v41  ;;  %v1201_v24 = vand.u32 4294901760, %v1200_v40  ;;  %v1206_v2 = vsub.f32 %v4549_v54, %v7813_v32 }
  0x53   :  { %v3275_v26 = vsel %vm4573_vm15, 1.0, %v8130_v52  ;;  %1057 = vmatpush.msrb.mxu0 %v8169_v31  ;;  %v7816_v63 = vand.u32 4294901760, %v4577_v19  ;;  %vm4606_vm14 = vmand %vm257_vm13, %vm385_vm11  ;;  %1196 = vmatpush.msrb.mxu3 %v1195_v27  ;;  %v3268_v33 = vsel %vm4582_vm10, 1.0, %v8130_v52  ;;  %vm378_vm0 = vcmp.lt.s32.totalorder %v4325_v53, %v4172_v6 }
  0x54   :  { %v4604_v14 = vsub.f32 %v3275_v26, %v3275_v26  ;;  %3365 = vmatpush.msk.msrb.mxu1 %vm3964_vm1, %v8126_v41  ;;  %v3261_v40 = vsel %vm4606_vm14, 1.0, %v8130_v52  ;;  %vm243_vm7 = vcmp.ge.s32.totalorder %v4325_v53, %v4159_v7  ;;  %v8172_v26 = vand.u32 4294901760, %v4151_v62  ;;  %3383 = vmatpush.msk.msrb.mxu2 %vm4515_vm12, %v8126_v41  ;;  %vm4637_vm1 = vmand %vm250_vm9, %vm378_vm0 }
  0x55   :  { %v1207_v34 = vand.u32 4294901760, %v1206_v2  ;;  %v1212_v27 = vsub.f32 %v4577_v19, %v7816_v63  ;;  %v4632_v32 = vsub.f32 %v3268_v33, %v3268_v33  ;;  %828 = vmatmul.f32.vlgmr.msra.gmra.mxu0 %v4524_v50  ;;  %v4645_v62 = vsub.f32 %v3261_v40, %v3261_v40  ;;  %1202 = vmatpush.msrb.mxu3 %v1201_v24 }
  0x56   :  { %1061 = vmatpush.msrb.mxu0 %v8172_v26  ;;  %v7819_v31 = vand.u32 4294901760, %v4604_v14  ;;  %3366 = vmatpush.msk.msrb.mxu1 %vm3988_vm3, %v8126_v41  ;;  %vm371_vm13 = vcmp.lt.s32.totalorder %v4325_v53, %v4188_v51  ;;  %v3254_v2 = vsel %vm4637_vm1, 1.0, %v8130_v52  ;;  %vm236_vm9 = vcmp.ge.s32.totalorder %v4325_v53, %v4161_v8  ;;  %v8196_v8 = vld [vmem:[#allocation54_spill] sm:$0xff] }
  0x57   :  { %v8175_v33 = vand.u32 4294901760, %v4219_v9  ;;  %v1213_v39 = vand.u32 4294901760, %v1212_v27  ;;  %v7820_v26 = vand.u32 4294901760, %v4632_v32  ;;  %vm4663_vm3 = vmand %vm243_vm7, %vm371_vm13  ;;  %v8176_v63 = vmov 0  ;;  %3384 = vmatpush.msk.msrb.mxu2 %vm4545_vm2, %v8126_v41  ;;  %929 = vmatmul.f32.vlgmr.msra.gmra.mxu1 %v4343_v3 }
  0x58   :  { %v1218_v40 = vsub.f32 %v4604_v14, %v7819_v31  ;;  %v8177_v63 = vsel %vm4663_vm3, 4294967295, %v8176_v63  ;;  %v4667_v50 = vsub.f32 %v3254_v2, %v3254_v2  ;;  %3367 = vmatpush.msk.msrb.mxu1 %vm4009_vm4, %v8126_v41  ;;  %vm364_vm11 = vcmp.lt.s32.totalorder %v4325_v53, %v4205_v57  ;;  %1208 = vmatpush.msrb.mxu3 %v1207_v34 }
  0x59   :  { %1065 = vmatpush.msrb.mxu0 %v8175_v33  ;;  %v3247_v24 = vsel %vm4663_vm3, 1.0, %v8130_v52  ;;  %vm229_vm0 = vcmp.ge.s32.totalorder %v4325_v53, %v4255_v43  ;;  %v8178_v27 = vand.u32 4294901760, %v4253_v48  ;;  %v1224_v2 = vsub.f32 %v4632_v32, %v7820_v26  ;;  %vm4693_vm4 = vmand %vm236_vm9, %vm364_vm11  ;;  %v8183_v33 = vld [vmem:[#allocation51_spill] sm:$0xff]  ;;  %3385 = vmatpush.msk.msrb.mxu2 %vm4573_vm15, %v8126_v41 }
  0x5a   :  { %v1219_v44 = vand.u32 4294901760, %v1218_v40  ;;  %v8179_v31 = vmov 0  ;;  %v4697_v9 = vsub.f32 %v3247_v24, %v3247_v24  ;;  %3368 = vmatpush.msk.msrb.mxu1 %vm4033_vm6, %v8126_v41  ;;  %v8181_v48 = vand.u32 4294901760, %v4645_v62  ;;  %v8184_v24 = vld [vmem:[#allocation50_spill] sm:$0xff]  ;;  %1214 = vmatpush.msrb.mxu3 %v1213_v39 }
  0x5b   :  { %1069 = vmatpush.msrb.mxu0 %v8178_v27  ;;  %v8180_v31 = vsel %vm4693_vm4, 4294967295, %v8179_v31  ;;  %v8182_v27 = vld [vmem:[#allocation52_spill] sm:$0xff]  ;;  %v3240_v26 = vsel %vm4693_vm4, 1.0, %v8130_v52  ;;  %vm222_vm13 = vcmp.ge.s32.totalorder %v4325_v53, %v8183_v33  ;;  %v8185_v57 = vand.u32 4294901760, %v8184_v24  ;;  %v8189_v24 = vld [vmem:[#allocation53_spill] sm:$0xff]  ;;  %3386 = vmatpush.msk.msrb.mxu2 %vm4582_vm10, %v8126_v41 }
  0x5c   :  { %v1230_v40 = vsub.f32 %v4645_v62, %v8181_v48  ;;  %vm357_vm7 = vcmp.lt.s32.totalorder %v4325_v53, %v8182_v27  ;;  %v8186_v34 = vmov 0  ;;  %v4725_v48 = vsub.f32 %v3240_v26, %v3240_v26  ;;  %3369 = vmatpush.msk.msrb.mxu1 %vm4067_vm8, %v8126_v41  ;;  %1220 = vmatpush.msrb.mxu3 %v1219_v44 }
  0x5d   :  { %1073 = vmatpush.msrb.mxu0 %v8185_v57  ;;  %vm4721_vm6 = vmand %vm229_vm0, %vm357_vm7  ;;  %v1225_v57 = vand.u32 4294901760, %v1224_v2  ;;  %vm350_vm9 = vcmp.lt.s32.totalorder %v4325_v53, %v8189_v24  ;;  %vm215_vm11 = vcmp.ge.s32.totalorder %v4325_v53, %v4240_v58  ;;  %v8190_v43 = vand.u32 4294901760, %v4295_v28  ;;  %v8194_v28 = vld [vmem:[#allocation35_spill] sm:$0xff]  ;;  %3387 = vmatpush.msk.msrb.mxu2 %vm4606_vm14, %v8126_v41 }
  0x5e   :  { %v8187_v34 = vsel %vm4721_vm6, 4294967295, %v8186_v34  ;;  %v3233_v49 = vsel %vm4721_vm6, 1.0, %v8130_v52  ;;  %v8191_v39 = vand.u32 4294901760, %v4667_v50  ;;  %vm4749_vm8 = vmand %vm222_vm13, %vm350_vm9  ;;  %v8192_v27 = vmov 0 }
  0x5f   :  { %1077 = vmatpush.msrb.mxu0 %v8190_v43  ;;  %v8193_v27 = vsel %vm4749_vm8, 4294967295, %v8192_v27  ;;  %v4753_v24 = vsub.f32 %v3233_v49, %v3233_v49  ;;  %vm8195_vm0 = vnez %v8194_v28  ;;  %v1231_v43 = vand.u32 4294901760, %v1230_v40  ;;  %1226 = vmatpush.msrb.mxu3 %v1225_v57  ;;  %v8205_v57 = vld [vmem:[#allocation45_spill] sm:$0xff] }
  0x60   :  { %v1236_v26 = vsub.f32 %v4667_v50, %v8191_v39  ;;  %3370 = vmatpush.msk.msrb.mxu1 %vm8195_vm0, %v8126_v41  ;;  %vm343_vm7 = vcmp.lt.s32.totalorder %v4325_v53, %v8196_v8  ;;  %v3226_v39 = vsel %vm4749_vm8, 1.0, %v8130_v52  ;;  %v8197_v2 = vand.u32 4294901760, %v4355_v47  ;;  %v8201_v47 = vld [vmem:[#allocation42_spill] sm:$0xff]  ;;  %3388 = vmatpush.msk.msrb.mxu2 %vm4637_vm1, %v8126_v41 }
  0x61   :  { %v8198_v49 = vand.u32 4294901760, %v4697_v9  ;;  %vm4775_vm13 = vmand %vm215_vm11, %vm343_vm7  ;;  %v8199_v40 = vmov 0  ;;  %v4779_v8 = vsub.f32 %v3226_v39, %v3226_v39  ;;  %vm8202_vm9 = vnez %v8201_v47  ;;  %1232 = vmatpush.msrb.mxu3 %v1231_v43 }
  0x62   :  { %1081 = vmatpush.msrb.mxu0 %v8197_v2  ;;  %v8200_v40 = vsel %vm4775_vm13, 4294967295, %v8199_v40  ;;  %3371 = vmatpush.msk.msrb.mxu1 %vm8202_vm9, %v8126_v41  ;;  %v3219_v2 = vsel %vm4775_vm13, 1.0, %v8130_v52  ;;  %v1237_v53 = vand.u32 4294901760, %v1236_v26  ;;  %v8204_v39 = vand.u32 4294901760, %v4725_v48 }
  0x63   :  { %v1242_v28 = vsub.f32 %v4697_v9, %v8198_v49  ;;  %v8203_v49 = vand.u32 4294901760, %v4367_v10  ;;  %v4795_v58 = vsub.f32 %v3219_v2, %v3219_v2  ;;  %vm8206_vm11 = vnez %v8205_v57  ;;  %3389 = vmatpush.msk.msrb.mxu2 %vm4663_vm3, %v8126_v41 }
  0x64   :  { %v1248_v44 = vsub.f32 %v4725_v48, %v8204_v39  ;;  %3372 = vmatpush.msk.msrb.mxu1 %vm8206_vm11, %v8126_v41  ;;  %v8207_v47 = vand.u32 4294901760, %v4377_v46  ;;  %v8208_v26 = vand.u32 4294901760, %v4753_v24  ;;  %v7840_v2 = vand.u32 4294901760, %v4779_v8  ;;  %v8209_v39 = vld [vmem:[#allocation46_spill] sm:$0xff]  ;;  %1238 = vmatpush.msrb.mxu3 %v1237_v53  ;;  %v8215_v53 = vld [vmem:[#allocation56_spill] sm:$0xff] }
  0x65   :  { %1085 = vmatpush.msrb.mxu0 %v8203_v49  ;;  %v1243_v10 = vand.u32 4294901760, %v1242_v28  ;;  %vm8210_vm0 = vnez %v8209_v39  ;;  %v7839_v43 = vand.u32 4294901760, %v4795_v58  ;;  %v8211_v28 = vld [vmem:[#allocation48_spill] sm:$0xff]  ;;  %3390 = vmatpush.msk.msrb.mxu2 %vm4693_vm4, %v8126_v41  ;;  %vm8213_vm9 = vnez %v8124_v36 }
  0x66   :  { %v1254_v49 = vsub.f32 %v4753_v24, %v8208_v26  ;;  %3373 = vmatpush.msk.msrb.mxu1 %vm8210_vm0, %v8126_v41  ;;  %v1249_v46 = vand.u32 4294901760, %v1248_v44  ;;  %vm8212_vm7 = vnez %v8211_v28  ;;  %vm8214_vm11 = vnez %v8129_v59 }
  0x67   :  { %1089 = vmatpush.msrb.mxu0 %v8207_v47  ;;  %1244 = vmatpush.msrb.mxu3 %v1243_v10  ;;  %v1260_v47 = vsub.f32 %v4779_v8, %v7840_v2  ;;  %v1266_v44 = vsub.f32 %v4795_v58, %v7839_v43  ;;  %vm8216_vm0 = vnez %v8215_v53  ;;  %v8219_v10 = vld [vmem:[#allocation15_spill] sm:$0xff]  ;;  %v8222_v39 = vand.u32 4294901760, %v4439_v11 }
  0x68   :  { %1091 = vmatmul.f32.vlgmr.msrb.gmra.mxu0 %v4343_v3  ;;  %3374 = vmatpush.msk.msrb.mxu1 %vm8212_vm7, %v8126_v41  ;;  %v1255_v57 = vand.u32 4294901760, %v1254_v49  ;;  %vm8217_vm7 = vnez %v8138_v29  ;;  %v4858_v26 = vadd.s32 256, %v8219_v10  ;;  %v8220_v49 = vand.u32 4294901760, %v4411_v20  ;;  %v8228_v29 = vld [vmem:[#allocation25_spill] sm:$0xff]  ;;  %v8374_v2 = vld [vmem:[#allocation43_spill] sm:$0xff] }
  0x69   :  { %1276 = vmatpush.msra.mxu0 %v4411_v20  ;;  %3391 = vmatpush.msk.msrb.mxu2 %vm4721_vm6, %v8126_v41  ;;  %v1261_v36 = vand.u32 4294901760, %v1260_v47  ;;  %v1267_v59 = vand.u32 4294901760, %v1266_v44  ;;  %v8224_v20 = vld [vmem:[#allocation16_spill] sm:$0xff]  ;;  %v8226_v28 = vand.u32 4294901760, %v4463_v22  ;;  %v8233_v47 = vld [vmem:[#allocation26_spill] sm:$0xff]  ;;  %v8239_v53 = vand.u32 4294901760, %v4549_v54 }
  0x6a   :  { %3375 = vmatpush.msk.msrb.mxu1 %vm8213_vm9, %v8126_v41  ;;  %1250 = vmatpush.msrb.mxu3 %v1249_v46  ;;  %vm8218_vm9 = vnez %v8141_v0  ;;  %v8225_v46 = vld [vmem:[#allocation24_spill] sm:$0xff]  ;;  %vm442_vm6 = vcmp.lt.s32.totalorder %v4858_v26, %v8228_v29  ;;  %v8232_v0 = vld [vmem:[#allocation18_spill] sm:$0xff]  ;;  %vm435_vm3 = vcmp.lt.s32.totalorder %v4858_v26, %v8233_v47  ;;  %v8244_v21 = vmov 0 }
  0x6b   :  { %1279 = vmatpush.msra.mxu0 %v4439_v11  ;;  %3392 = vmatpush.msk.msrb.mxu2 %vm4749_vm8, %v8126_v41  ;;  %vm449_vm8 = vcmp.lt.s32.totalorder %v4858_v26, %v8225_v46  ;;  %v8227_v11 = vld [vmem:[#allocation17_spill] sm:$0xff]  ;;  %v8248_v56 = vmov 0  ;;  %v8251_v45 = vmov 0  ;;  %v8254_v35 = vmov 0 }
  0x6c   :  { %3376 = vmatpush.msk.msrb.mxu1 %vm8214_vm11, %v8126_v41  ;;  %1256 = vmatpush.msrb.mxu3 %v1255_v57  ;;  %vm8221_vm11 = vnez %v8144_v12  ;;  %v8229_v57 = vand.u32 4294901760, %v4491_v23  ;;  %v8257_v43 = vand.u32 4294901760, %v4667_v50 }
  0x6d   :  { %1282 = vmatpush.msra.mxu0 %v4463_v22  ;;  %3393 = vmatpush.msk.msrb.mxu2 %vm4775_vm13, %v8126_v41  ;;  %vm321_vm13 = vcmp.ge.s32.totalorder %v4858_v26, %v8224_v20 }
  0x6e   :  { %3377 = vmatpush.msk.msrb.mxu1 %vm8216_vm0, %v8126_v41  ;;  %1262 = vmatpush.msrb.mxu3 %v1261_v36  ;;  %vm8223_vm0 = vnez %v8147_v38  ;;  %vm4895_vm4 = vmand %vm321_vm13, %vm449_vm8  ;;  %v8237_v36 = vld [vmem:[#allocation19_spill] sm:$0xff] }
  0x6f   :  { %1285 = vmatpush.msra.mxu0 %v4491_v23  ;;  %1128 = vmatmul.f32.vlgmr.msrb.gmra.mxu1 %v4343_v3  ;;  %v8234_v23 = vand.u32 4294901760, %v4519_v25  ;;  %v3325_v12 = vsel %vm4895_vm4, 1.0, %v8130_v52  ;;  %vm300_vm13 = vcmp.ge.s32.totalorder %v4858_v26, %v8237_v36 }
  0x70   :  { %3394 = vmatpush.msk.msra.mxu1 %vm8217_vm7, %v8126_v41  ;;  %1370 = vmatpush.msra.mxu2 %v8220_v49  ;;  %v4950_v49 = vsub.f32 %v3325_v12, %v3325_v12 }
  0x71   :  { %1288 = vmatpush.msra.mxu0 %v4519_v25  ;;  %1268 = vmatpush.msrb.mxu3 %v1267_v59  ;;  %v8238_v25 = vld [vmem:[#allocation27_spill] sm:$0xff]  ;;  %v8240_v59 = vmov 0 }
  0x72   :  { %3395 = vmatpush.msk.msra.mxu1 %vm8218_vm9, %v8126_v41  ;;  %1374 = vmatpush.msra.mxu2 %v8222_v39  ;;  %v8243_v39 = vand.u32 4294901760, %v4577_v19 }
  0x73   :  { %1291 = vmatpush.msra.mxu0 %v4549_v54  ;;  %3410 = vmatpush.msk.msra.mxu3 %vm8217_vm7, %v8126_v41  ;;  %vm314_vm7 = vcmp.ge.s32.totalorder %v4858_v26, %v8227_v11  ;;  %v8242_v54 = vld [vmem:[#allocation28_spill] sm:$0xff] }
  0x74   :  { %3396 = vmatpush.msk.msra.mxu1 %vm8221_vm11, %v8126_v41  ;;  %1378 = vmatpush.msra.mxu2 %v8226_v28  ;;  %vm4912_vm8 = vmand %vm314_vm7, %vm442_vm6  ;;  %vm428_vm6 = vcmp.lt.s32.totalorder %v4858_v26, %v8238_v25 }
  0x75   :  { %1294 = vmatpush.msra.mxu0 %v4577_v19  ;;  %3411 = vmatpush.msk.msra.mxu3 %vm8218_vm9, %v8126_v41  ;;  %vm307_vm9 = vcmp.ge.s32.totalorder %v4858_v26, %v8232_v0  ;;  %v3318_v38 = vsel %vm4912_vm8, 1.0, %v8130_v52  ;;  %vm4954_vm7 = vmand %vm300_vm13, %vm428_vm6  ;;  %v8246_v19 = vld [vmem:[#allocation29_spill] sm:$0xff]  ;;  %vm407_vm6 = vcmp.lt.s32.totalorder %v4858_v26, %v3934_v30 }
  0x76   :  { %3397 = vmatpush.msk.msra.mxu1 %vm8223_vm0, %v8126_v41  ;;  %1382 = vmatpush.msra.mxu2 %v8229_v57  ;;  %v8245_v21 = vsel %vm4954_vm7, 4294967295, %v8244_v21  ;;  %v4972_v57 = vsub.f32 %v3318_v38, %v3318_v38  ;;  %v3304_v12 = vsel %vm4954_vm7, 1.0, %v8130_v52  ;;  %v8250_v38 = vand.u32 4294901760, %v4632_v32 }
  0x77   :  { %1297 = vmatpush.msra.mxu0 %v4604_v14  ;;  %3412 = vmatpush.msk.msra.mxu3 %vm8221_vm11, %v8126_v41  ;;  %vm4932_vm11 = vmand %vm307_vm9, %vm435_vm3  ;;  %vm421_vm3 = vcmp.lt.s32.totalorder %v4858_v26, %v8242_v54  ;;  %vm414_vm9 = vcmp.lt.s32.totalorder %v4858_v26, %v8246_v19 }
  0x78   :  { %3398 = vmatpush.msk.msra.mxu1 %vm4487_vm5, %v8126_v41  ;;  %1386 = vmatpush.msra.mxu2 %v8234_v23  ;;  %v8241_v59 = vsel %vm4932_vm11, 4294967295, %v8240_v59  ;;  %v3311_v28 = vsel %vm4932_vm11, 1.0, %v8130_v52  ;;  %v8247_v23 = vand.u32 4294901760, %v4604_v14 }
  0x79   :  { %1300 = vmatpush.msra.mxu0 %v4632_v32  ;;  %3413 = vmatpush.msk.msra.mxu3 %vm8223_vm0, %v8126_v41  ;;  %vm293_vm0 = vcmp.ge.s32.totalorder %v4858_v26, %v3866_v15  ;;  %v4994_v14 = vsub.f32 %v3311_v28, %v3311_v28  ;;  %v7842_v28 = vand.u32 4294901760, %v4972_v57 }
  0x7a   :  { %3399 = vmatpush.msk.msra.mxu1 %vm4515_vm12, %v8126_v41  ;;  %1390 = vmatpush.msra.mxu2 %v8239_v53  ;;  %vm4976_vm13 = vmand %vm293_vm0, %vm421_vm3  ;;  %v7841_v53 = vand.u32 4294901760, %v4950_v49  ;;  %vm272_vm0 = vcmp.ge.s32.totalorder %v4858_v26, %v3872_v18  ;;  %vm400_vm3 = vcmp.lt.s32.totalorder %v4858_v26, %v3976_v37 }
  0x7b   :  { %1303 = vmatpush.msra.mxu0 %v4645_v62  ;;  %3414 = vmatpush.msk.msra.mxu3 %vm4487_vm5, %v8126_v41  ;;  %vm286_vm5 = vcmp.ge.s32.totalorder %v4858_v26, %v3868_v16  ;;  %v8249_v56 = vsel %vm4976_vm13, 4294967295, %v8248_v56  ;;  %v3297_v32 = vsel %vm4976_vm13, 1.0, %v8130_v52  ;;  %v1523_v5 = vsub.f32 %v4972_v57, %v7842_v28 }
  0x7c   :  { %3400 = vmatpush.msk.msra.mxu1 %vm4545_vm2, %v8126_v41  ;;  %1394 = vmatpush.msra.mxu2 %v8243_v39  ;;  %v5020_v39 = vsub.f32 %v3304_v12, %v3304_v12  ;;  %v1517_v12 = vsub.f32 %v4950_v49, %v7841_v53  ;;  %v8261_v53 = vand.u32 4294901760, %v4697_v9 }
  0x7d   :  { %1306 = vmatpush.msra.mxu0 %v4667_v50  ;;  %3415 = vmatpush.msk.msra.mxu3 %vm4515_vm12, %v8126_v41  ;;  %vm279_vm12 = vcmp.ge.s32.totalorder %v4858_v26, %v3870_v17  ;;  %v1524_v1 = vand.u32 4294901760, %v1523_v5  ;;  %v8277_v5 = vmov 0 }
  0x7e   :  { %3401 = vmatpush.msk.msra.mxu1 %vm4573_vm15, %v8126_v41  ;;  %1398 = vmatpush.msra.mxu2 %v8247_v23  ;;  %v8253_v23 = vand.u32 4294901760, %v4645_v62 }
  0x7f   :  { %1309 = vmatpush.msra.mxu0 %v4697_v9  ;;  %3416 = vmatpush.msk.msra.mxu3 %vm4545_vm2, %v8126_v41  ;;  %vm5002_vm2 = vmand %vm286_vm5, %vm414_vm9  ;;  %vm8256_vm5 = vnez %v8177_v63  ;;  %v1518_v9 = vand.u32 4294901760, %v1517_v12  ;;  %v8280_v63 = vld [vmem:[#allocation40_spill] sm:$0xff] }
  0x80   :  { %3402 = vmatpush.msk.msra.mxu1 %vm4582_vm10, %v8126_v41  ;;  %1402 = vmatpush.msra.mxu2 %v8250_v38  ;;  %v8252_v45 = vsel %vm5002_vm2, 4294967295, %v8251_v45  ;;  %v3290_v62 = vsel %vm5002_vm2, 1.0, %v8130_v52  ;;  %v5054_v38 = vsub.f32 %v3297_v32, %v3297_v32 }
  0x81   :  { %1312 = vmatpush.msra.mxu0 %v4725_v48  ;;  %3417 = vmatpush.msk.msra.mxu3 %vm4573_vm15, %v8126_v41  ;;  %vm5031_vm15 = vmand %vm279_vm12, %vm407_vm6  ;;  %vm393_vm12 = vcmp.lt.s32.totalorder %v4858_v26, %v4091_v4  ;;  %v8267_v4 = vand.u32 4294901760, %v4725_v48  ;;  %v8273_v48 = vand.u32 4294901760, %v5020_v39 }
  0x82   :  { %3403 = vmatpush.msk.msra.mxu1 %vm4606_vm14, %v8126_v41  ;;  %1406 = vmatpush.msra.mxu2 %v8253_v23  ;;  %v8255_v35 = vsel %vm5031_vm15, 4294967295, %v8254_v35  ;;  %vm5065_vm6 = vmand %vm272_vm0, %vm400_vm3  ;;  %v3283_v50 = vsel %vm5031_vm15, 1.0, %v8130_v52  ;;  %vm8262_vm3 = vcmp.ge.s32.totalorder %v4858_v26, %v4052_v55  ;;  %vm8269_vm0 = vcmp.ge.s32.totalorder %v4858_v26, %v4125_v42 }
  0x83   :  { %1315 = vmatpush.msra.mxu0 %v4753_v24  ;;  %3418 = vmatpush.msk.msra.mxu3 %vm4582_vm10, %v8126_v41  ;;  %vm8260_vm10 = vnez %v8180_v31  ;;  %vm5099_vm9 = vmand %vm8262_vm3, %vm393_vm12  ;;  %v3276_v13 = vsel %vm5065_vm6, 1.0, %v8130_v52  ;;  %v5122_v28 = vsub.f32 %v3283_v50, %v3283_v50  ;;  %vm8268_vm3 = vcmp.lt.s32.totalorder %v4858_v26, %v4147_v60 }
  0x84   :  { %3404 = vmatpush.msk.msra.mxu1 %vm4637_vm1, %v8126_v41  ;;  %1410 = vmatpush.msra.mxu2 %v8257_v43  ;;  %v5088_v43 = vsub.f32 %v3290_v62, %v3290_v62  ;;  %vm5133_vm12 = vmand %vm8269_vm0, %vm8268_vm3  ;;  %v1535_v50 = vsub.f32 %v5020_v39, %v8273_v48  ;;  %v8274_v60 = vand.u32 4294901760, %v4753_v24  ;;  %vm8275_vm3 = vcmp.lt.s32.totalorder %v4858_v26, %v4172_v6  ;;  %v8281_v24 = vld [vmem:[#allocation44_spill] sm:$0xff] }
  0x85   :  { %1318 = vmatpush.msra.mxu0 %v4779_v8  ;;  %3419 = vmatpush.msk.msra.mxu3 %vm4606_vm14, %v8126_v41  ;;  %vm8265_vm14 = vnez %v8187_v34  ;;  %v8282_v48 = vand.u32 4294901760, %v5054_v38  ;;  %v8287_v31 = vand.u32 4294901760, %v4779_v8  ;;  %v8308_v42 = vmov 0 }
  0x86   :  { %3405 = vmatpush.msk.msra.mxu1 %vm8256_vm5, %v8126_v41  ;;  %1414 = vmatpush.msra.mxu2 %v8261_v53  ;;  %v8266_v53 = vand.u32 4294901760, %v4994_v14 }
  0x87   :  { %1321 = vmatpush.msra.mxu0 %v4795_v58  ;;  %3420 = vmatpush.msk.msra.mxu3 %vm4637_vm1, %v8126_v41  ;;  %vm8272_vm1 = vnez %v8193_v27  ;;  %v1541_v32 = vsub.f32 %v5054_v38, %v8282_v48  ;;  %v8289_v48 = vld [vmem:[#allocation52_spill] sm:$0xff]  ;;  %v8302_v27 = vld [vmem:[#allocation59_spill] sm:$0xff] }
  0x88   :  { %3406 = vmatpush.msk.msra.mxu1 %vm8260_vm10, %v8126_v41  ;;  %v1529_v62 = vsub.f32 %v4994_v14, %v8266_v53  ;;  %1418 = vmatpush.msra.mxu2 %v8267_v4  ;;  %v3269_v4 = vsel %vm5099_vm9, 1.0, %v8130_v52  ;;  %v5156_v53 = vsub.f32 %v3276_v13, %v3276_v13 }
  0x89   :  { %3426 = vmatpush.msk.msrb.mxu0 %vm4895_vm4, %v8126_v41  ;;  %3421 = vmatpush.msk.msra.mxu3 %vm8256_vm5, %v8126_v41  ;;  %vm8279_vm5 = vnez %v8200_v40  ;;  %v5190_v6 = vsub.f32 %v3269_v4, %v3269_v4  ;;  %v8288_v4 = vld [vmem:[#allocation49_spill] sm:$0xff]  ;;  %v8312_v40 = vmov 0 }
  0x8a   :  { %3407 = vmatpush.msk.msra.mxu1 %vm8265_vm14, %v8126_v41  ;;  %1422 = vmatpush.msra.mxu2 %v8274_v60  ;;  %v3262_v60 = vsel %vm5133_vm12, 1.0, %v8130_v52  ;;  %v1530_v13 = vand.u32 4294901760, %v1529_v62 }
  0x8b   :  { %3427 = vmatpush.msk.msrb.mxu0 %vm4912_vm8, %v8126_v41  ;;  %3422 = vmatpush.msk.msra.mxu3 %vm8260_vm10, %v8126_v41  ;;  %v5221_v8 = vsub.f32 %v3262_v60, %v3262_v60  ;;  %vm8292_vm10 = vcmp.ge.s32.totalorder %v4858_v26, %v8280_v63  ;;  %v1542_v60 = vand.u32 4294901760, %v1541_v32  ;;  %v8300_v32 = vmov 0 }
  0x8c   :  { %3408 = vmatpush.msk.msra.mxu1 %vm8272_vm1, %v8126_v41  ;;  %1426 = vmatpush.msra.mxu2 %v8287_v31  ;;  %v8297_v31 = vand.u32 4294901760, %v5122_v28 }
  0x8d   :  { %3428 = vmatpush.msk.msrb.mxu0 %vm4932_vm11, %v8126_v41  ;;  %vm8276_vm11 = vcmp.ge.s32.totalorder %v4858_v26, %v4149_v61  ;;  %v1536_v61 = vand.u32 4294901760, %v1535_v50  ;;  %3423 = vmatpush.msk.msra.mxu3 %vm8265_vm14, %v8126_v41  ;;  %v8296_v50 = vld [vmem:[#allocation53_spill] sm:$0xff]  ;;  %vm8299_vm14 = vcmp.ge.s32.totalorder %v4858_v26, %v8288_v4 }
  0x8e   :  { %vm5167_vm0 = vmand %vm8276_vm11, %vm8275_vm3  ;;  %3409 = vmatpush.msk.msra.mxu1 %vm8279_vm5, %v8126_v41  ;;  %vm8283_vm3 = vcmp.lt.s32.totalorder %v4858_v26, %v4188_v51  ;;  %v8290_v51 = vand.u32 4294901760, %v5088_v43  ;;  %1169 = vmatmul.f32.vlgmr.msrb.gmra.mxu2 %v8302_v27 }
  0x8f   :  { %3429 = vmatpush.msk.msrb.mxu0 %vm4954_vm7, %v8126_v41  ;;  %v8278_v5 = vsel %vm5167_vm0, 4294967295, %v8277_v5  ;;  %vm8284_vm7 = vcmp.ge.s32.totalorder %v4858_v26, %v4159_v7  ;;  %v3255_v62 = vsel %vm5167_vm0, 1.0, %v8130_v52  ;;  %3424 = vmatpush.msk.msra.mxu3 %vm8272_vm1, %v8126_v41 }
  0x90   :  { %1519 = vmatpush.msrb.mxu1 %v1518_v9  ;;  %vm5199_vm11 = vmand %vm8284_vm7, %vm8283_vm3  ;;  %v8285_v9 = vmov 0  ;;  %v1547_v7 = vsub.f32 %v5088_v43, %v8290_v51  ;;  %vm8291_vm3 = vcmp.lt.s32.totalorder %v4858_v26, %v8281_v24  ;;  %v8295_v51 = vand.u32 4294901760, %v4795_v58  ;;  %1270 = vmatmul.f32.vlgmr.msrb.gmra.mxu3 %v4343_v3 }
  0x91   :  { %3430 = vmatpush.msk.msrb.mxu0 %vm4976_vm13, %v8126_v41  ;;  %v8286_v9 = vsel %vm5199_vm11, 4294967295, %v8285_v9  ;;  %vm5230_vm7 = vmand %vm8292_vm10, %vm8291_vm3  ;;  %v3248_v34 = vsel %vm5199_vm11, 1.0, %v8130_v52  ;;  %v1553_v24 = vsub.f32 %v5122_v28, %v8297_v31  ;;  %v5252_v58 = vsub.f32 %v3255_v62, %v3255_v62  ;;  %v8303_v62 = vld [vmem:[#allocation47_spill] sm:$0xff]  ;;  %v8304_v31 = vld [vmem:[#allocation54_spill] sm:$0xff]  ;;  %3425 = vmatpush.msk.msra.mxu3 %vm8279_vm5, %v8126_v41 }
  0x92   :  { %1525 = vmatpush.msrb.mxu1 %v1524_v1  ;;  %v8293_v1 = vmov 0  ;;  %1430 = vmatpush.msra.mxu2 %v8295_v51  ;;  %vm8298_vm3 = vcmp.lt.s32.totalorder %v4858_v26, %v8289_v48  ;;  %v1548_v51 = vand.u32 4294901760, %v1547_v7  ;;  %v8305_v48 = vand.u32 4294901760, %v5156_v53 }
  0x93   :  { %3431 = vmatpush.msk.msrb.mxu0 %vm5002_vm2, %v8126_v41  ;;  %v8294_v1 = vsel %vm5230_vm7, 4294967295, %v8293_v1  ;;  %vm5261_vm10 = vmand %vm8299_vm14, %vm8298_vm3  ;;  %v5280_v63 = vsub.f32 %v3248_v34, %v3248_v34  ;;  %vm8306_vm14 = vcmp.lt.s32.totalorder %v4858_v26, %v8296_v50  ;;  %vm8307_vm3 = vcmp.ge.s32.totalorder %v4858_v26, %v8183_v33  ;;  %3442 = vmatpush.msk.msrb.mxu3 %vm4895_vm4, %v8126_v41 }
  0x94   :  { %1531 = vmatpush.msrb.mxu1 %v1530_v13  ;;  %v8301_v32 = vsel %vm5261_vm10, 4294967295, %v8300_v32  ;;  %v3241_v13 = vsel %vm5230_vm7, 1.0, %v8130_v52  ;;  %v1559_v4 = vsub.f32 %v5156_v53, %v8305_v48  ;;  %1617 = vmatpush.msrb.mxu2 %v4950_v49  ;;  %vm5289_vm1 = vmand %vm8307_vm3, %vm8306_vm14  ;;  %v1554_v7 = vand.u32 4294901760, %v1553_v24 }
  0x95   :  { %3432 = vmatpush.msk.msrb.mxu0 %vm5031_vm15, %v8126_v41  ;;  %vm344_vm15 = vcmp.lt.s32.totalorder %v4858_v26, %v8304_v31  ;;  %v8309_v42 = vsel %vm5289_vm1, 4294967295, %v8308_v42  ;;  %v8310_v48 = vand.u32 4294901760, %v5190_v6  ;;  %v5306_v27 = vsub.f32 %v3241_v13, %v3241_v13  ;;  %3443 = vmatpush.msk.msrb.mxu3 %vm4912_vm8, %v8126_v41 }
  0x96   :  { %1537 = vmatpush.msrb.mxu1 %v1536_v61  ;;  %v3234_v61 = vsel %vm5261_vm10, 1.0, %v8130_v52  ;;  %vm8311_vm5 = vcmp.ge.s32.totalorder %v4858_v26, %v8303_v62  ;;  %1620 = vmatpush.msrb.mxu2 %v4972_v57  ;;  %v3227_v24 = vsel %vm5289_vm1, 1.0, %v8130_v52  ;;  %v8314_v13 = vand.u32 4294901760, %v5221_v8 }
  0x97   :  { %3433 = vmatpush.msk.msrb.mxu0 %vm5065_vm6, %v8126_v41  ;;  %v1565_v34 = vsub.f32 %v5190_v6, %v8310_v48  ;;  %vm5315_vm14 = vmand %vm8311_vm5, %vm344_vm15  ;;  %v5332_v48 = vsub.f32 %v3234_v61, %v3234_v61  ;;  %v5348_v61 = vsub.f32 %v3227_v24, %v3227_v24  ;;  %vm8317_vm15 = vnez %v8241_v59 }
  0x98   :  { %1543 = vmatpush.msrb.mxu1 %v1542_v60  ;;  %v8313_v40 = vsel %vm5315_vm14, 4294967295, %v8312_v40  ;;  %v1560_v60 = vand.u32 4294901760, %v1559_v4  ;;  %v1571_v26 = vsub.f32 %v5221_v8, %v8314_v13  ;;  %1623 = vmatpush.msrb.mxu2 %v4994_v14  ;;  %v3220_v4 = vsel %vm5315_vm14, 1.0, %v8130_v52 }
  0x99   :  { %3434 = vmatpush.msk.msrb.mxu0 %vm5099_vm9, %v8126_v41  ;;  %v8315_v13 = vand.u32 4294901760, %v5252_v58  ;;  %3444 = vmatpush.msk.msrb.mxu3 %vm8317_vm15, %v8126_v41  ;;  %v5361_v24 = vsub.f32 %v3220_v4, %v3220_v4  ;;  %v7873_v50 = vand.u32 4294901760, %v5332_v48  ;;  %vm8319_vm3 = vnez %v8245_v21 }
  0x9a   :  { %1549 = vmatpush.msrb.mxu1 %v1548_v51  ;;  %v1566_v51 = vand.u32 4294901760, %v1565_v34  ;;  %1626 = vmatpush.msrb.mxu2 %v5020_v39  ;;  %v8316_v34 = vand.u32 4294901760, %v5280_v63  ;;  %v5380_v4 = vadd.s32 384, %v8219_v10  ;;  %v8345_v59 = vand.u32 4294901760, %v5156_v53 }
  0x9b   :  { %3435 = vmatpush.msk.msrb.mxu0 %vm5133_vm12, %v8126_v41  ;;  %v1577_v31 = vsub.f32 %v5252_v58, %v8315_v13  ;;  %1432 = vmatmul.f32.vlgmr.msra.gmra.mxu2 %v4343_v3  ;;  %v7888_v62 = vand.u32 4294901760, %v5361_v24 }
  0x9c   :  { %1555 = vmatpush.msrb.mxu1 %v1554_v7  ;;  %v1572_v7 = vand.u32 4294901760, %v1571_v26  ;;  %v1583_v13 = vsub.f32 %v5280_v63, %v8316_v34  ;;  %v8318_v26 = vand.u32 4294901760, %v5306_v27  ;;  %1629 = vmatpush.msrb.mxu2 %v5054_v38  ;;  %vm322_vm5 = vcmp.ge.s32.totalorder %v5380_v4, %v8224_v20 }
  0x9d   :  { %3436 = vmatpush.msk.msrb.mxu0 %vm5167_vm0, %v8126_v41  ;;  %3445 = vmatpush.msk.msrb.mxu3 %vm8319_vm3, %v8126_v41  ;;  %vm436_vm3 = vcmp.lt.s32.totalorder %v5380_v4, %v8233_v47 }
  0x9e   :  { %1561 = vmatpush.msrb.mxu1 %v1560_v60  ;;  %v1578_v60 = vand.u32 4294901760, %v1577_v31  ;;  %v1589_v34 = vsub.f32 %v5306_v27, %v8318_v26  ;;  %v1584_v31 = vand.u32 4294901760, %v1583_v13  ;;  %v8320_v26 = vld [vmem:[#allocation57_spill] sm:$0xff]  ;;  %1469 = vmatmul.f32.vlgmr.msra.gmra.mxu3 %v4343_v3 }
  0x9f   :  { %3437 = vmatpush.msk.msrb.mxu0 %vm5199_vm11, %v8126_v41  ;;  %1632 = vmatpush.msrb.mxu2 %v5088_v43  ;;  %vm429_vm11 = vcmp.lt.s32.totalorder %v5380_v4, %v8238_v25 }
  0xa0   :  { %1567 = vmatpush.msrb.mxu1 %v1566_v51  ;;  %v1595_v51 = vsub.f32 %v5332_v48, %v7873_v50  ;;  %1324 = vmatmul.f32.vlgmr.msra.gmra.mxu0 %v8320_v26  ;;  %v1590_v33 = vand.u32 4294901760, %v1589_v34  ;;  %v8322_v34 = vand.u32 4294901760, %v4950_v49  ;;  %v8323_v50 = vld [vmem:[#allocation58_spill] sm:$0xff]  ;;  %v8324_v49 = vmov 0 }
  0xa1   :  { %3438 = vmatpush.msk.msrb.mxu0 %vm5230_vm7, %v8126_v41  ;;  %3446 = vmatpush.msk.msrb.mxu3 %vm4976_vm13, %v8126_v41  ;;  %vm308_vm7 = vcmp.ge.s32.totalorder %v5380_v4, %v8232_v0 }
  0xa2   :  { %1573 = vmatpush.msrb.mxu1 %v1572_v7  ;;  %v8321_v7 = vand.u32 4294901760, %v5348_v61  ;;  %1635 = vmatpush.msrb.mxu2 %v5122_v28 }
  0xa3   :  { %3439 = vmatpush.msk.msrb.mxu0 %vm5261_vm10, %v8126_v41  ;;  %1363 = vmatmul.f32.vlgmr.msra.gmra.mxu1 %v8323_v50  ;;  %vm443_vm10 = vcmp.lt.s32.totalorder %v5380_v4, %v8228_v29 }
  0xa4   :  { %1579 = vmatpush.msrb.mxu1 %v1578_v60  ;;  %v1601_v13 = vsub.f32 %v5348_v61, %v8321_v7  ;;  %v1596_v60 = vand.u32 4294901760, %v1595_v51  ;;  %v1607_v7 = vsub.f32 %v5361_v24, %v7888_v62  ;;  %3447 = vmatpush.msk.msrb.mxu3 %vm5002_vm2, %v8126_v41  ;;  %v8326_v51 = vand.u32 4294901760, %v4972_v57  ;;  %v8356_v62 = vld [vmem:[#allocation34_spill] sm:$0xff] }
  0xa5   :  { %3440 = vmatpush.msk.msrb.mxu0 %vm5289_vm1, %v8126_v41  ;;  %vm450_vm1 = vcmp.lt.s32.totalorder %v5380_v4, %v8225_v46  ;;  %1638 = vmatpush.msrb.mxu2 %v5156_v53  ;;  %vm8327_vm2 = vnez %v8255_v35  ;;  %v8330_v57 = vand.u32 4294901760, %v4994_v14  ;;  %v8331_v14 = vmov 0 }
  0xa6   :  { %1585 = vmatpush.msrb.mxu1 %v1584_v31  ;;  %v1602_v31 = vand.u32 4294901760, %v1601_v13  ;;  %vm5419_vm13 = vmand %vm322_vm5, %vm450_vm1  ;;  %3448 = vmatpush.msk.msrb.mxu3 %vm8327_vm2, %v8126_v41  ;;  %v8328_v13 = vmov 0  ;;  %vm301_vm5 = vcmp.ge.s32.totalorder %v5380_v4, %v8237_v36  ;;  %v8348_v53 = vand.u32 4294901760, %v5190_v6 }
  0xa7   :  { %3441 = vmatpush.msk.msrb.mxu0 %vm5315_vm14, %v8126_v41  ;;  %vm315_vm14 = vcmp.ge.s32.totalorder %v5380_v4, %v8227_v11  ;;  %v8325_v49 = vsel %vm5419_vm13, 4294967295, %v8324_v49  ;;  %1641 = vmatpush.msrb.mxu2 %v5190_v6 }
  0xa8   :  { %1591 = vmatpush.msrb.mxu1 %v1590_v33  ;;  %v1608_v33 = vand.u32 4294901760, %v1607_v7  ;;  %vm5433_vm1 = vmand %vm315_vm14, %vm443_vm10  ;;  %3449 = vmatpush.msk.msrb.mxu3 %vm5065_vm6, %v8126_v41  ;;  %vm294_vm14 = vcmp.ge.s32.totalorder %v5380_v4, %v3866_v15 }
  0xa9   :  { %1711 = vmatpush.msra.mxu0 %v8322_v34  ;;  %v8329_v13 = vsel %vm5433_vm1, 4294967295, %v8328_v13  ;;  %v3326_v34 = vsel %vm5419_vm13, 1.0, %v8130_v52  ;;  %vm5450_vm10 = vmand %vm308_vm7, %vm436_vm3  ;;  %1644 = vmatpush.msrb.mxu2 %v5221_v8  ;;  %v3319_v7 = vsel %vm5433_vm1, 1.0, %v8130_v52  ;;  %vm415_vm3 = vcmp.lt.s32.totalorder %v5380_v4, %v8246_v19 }
  0xaa   :  { %1597 = vmatpush.msrb.mxu1 %v1596_v60  ;;  %v8332_v14 = vsel %vm5450_vm10, 4294967295, %v8331_v14  ;;  %v8333_v60 = vand.u32 4294901760, %v5020_v39  ;;  %3450 = vmatpush.msk.msrb.mxu3 %vm5099_vm9, %v8126_v41  ;;  %vm5465_vm7 = vmand %vm301_vm5, %vm429_vm11  ;;  %v8336_v39 = vand.u32 4294901760, %v5054_v38  ;;  %vm422_vm11 = vcmp.lt.s32.totalorder %v5380_v4, %v8242_v54 }
  0xab   :  { %1715 = vmatpush.msra.mxu0 %v8326_v51  ;;  %v8334_v51 = vmov 0  ;;  %1647 = vmatpush.msrb.mxu2 %v5252_v58  ;;  %v5485_v22 = vsub.f32 %v3319_v7, %v3319_v7  ;;  %v8337_v38 = vand.u32 4294901760, %v5088_v43  ;;  %vm8341_vm5 = vnez %v8286_v9 }
  0xac   :  { %1603 = vmatpush.msrb.mxu1 %v1602_v31  ;;  %v5463_v31 = vsub.f32 %v3326_v34, %v3326_v34  ;;  %v8335_v51 = vsel %vm5465_vm7, 4294967295, %v8334_v51  ;;  %3451 = vmatpush.msk.msrb.mxu3 %vm5133_vm12, %v8126_v41  ;;  %v8338_v34 = vmov 0 }
  0xad   :  { %1719 = vmatpush.msra.mxu0 %v8330_v57  ;;  %v3305_v57 = vsel %vm5465_vm7, 1.0, %v8130_v52  ;;  %1650 = vmatpush.msrb.mxu2 %v5280_v63  ;;  %v7891_v7 = vand.u32 4294901760, %v5485_v22 }
  0xae   :  { %1609 = vmatpush.msrb.mxu1 %v1608_v33  ;;  %v3312_v33 = vsel %vm5450_vm10, 1.0, %v8130_v52  ;;  %3452 = vmatpush.msk.msrb.mxu3 %vm5167_vm0, %v8126_v41  ;;  %v7887_v44 = vand.u32 4294901760, %v5463_v31  ;;  %vm8344_vm0 = vnez %v8245_v21 }
  0xaf   :  { %1723 = vmatpush.msra.mxu0 %v8333_v60  ;;  %v5504_v43 = vsub.f32 %v3312_v33, %v3312_v33  ;;  %v8340_v60 = vand.u32 4294901760, %v5122_v28  ;;  %1653 = vmatpush.msrb.mxu2 %v5306_v27  ;;  %v8342_v33 = vmov 0 }
  0xb0   :  { %3458 = vmatpush.msk.msra.mxu1 %vm4895_vm4, %v8126_v41  ;;  %vm287_vm4 = vcmp.ge.s32.totalorder %v5380_v4, %v3868_v16  ;;  %3453 = vmatpush.msk.msrb.mxu3 %vm8341_vm5, %v8126_v41  ;;  %vm8351_vm5 = vnez %v8301_v32 }
  0xb1   :  { %1727 = vmatpush.msra.mxu0 %v8336_v39  ;;  %v5520_v39 = vsub.f32 %v3305_v57, %v3305_v57  ;;  %1656 = vmatpush.msrb.mxu2 %v5332_v48  ;;  %v7892_v21 = vand.u32 4294901760, %v5504_v43 }
  0xb2   :  { %3459 = vmatpush.msk.msra.mxu1 %vm4912_vm8, %v8126_v41  ;;  %vm5506_vm8 = vmand %vm294_vm14, %vm422_vm11  ;;  %vm408_vm11 = vcmp.lt.s32.totalorder %v5380_v4, %v3934_v30 }
  0xb3   :  { %1731 = vmatpush.msra.mxu0 %v8337_v38  ;;  %v8339_v34 = vsel %vm5506_vm8, 4294967295, %v8338_v34  ;;  %vm5522_vm14 = vmand %vm287_vm4, %vm415_vm3  ;;  %v3298_v28 = vsel %vm5506_vm8, 1.0, %v8130_v52  ;;  %vm8346_vm4 = vnez %v8294_v1  ;;  %v1858_v38 = vsub.f32 %v5463_v31, %v7887_v44  ;;  %1659 = vmatpush.msrb.mxu2 %v5348_v61 }
  0xb4   :  { %3460 = vmatpush.msk.msra.mxu1 %vm8317_vm15, %v8126_v41  ;;  %v8343_v33 = vsel %vm5522_vm14, 4294967295, %v8342_v33  ;;  %vm280_vm15 = vcmp.ge.s32.totalorder %v5380_v4, %v3870_v17  ;;  %3454 = vmatpush.msk.msrb.mxu3 %vm8346_vm4, %v8126_v41  ;;  %vm401_vm3 = vcmp.lt.s32.totalorder %v5380_v4, %v3976_v37  ;;  %vm8347_vm8 = vnez %v8249_v56 }
  0xb5   :  { %1735 = vmatpush.msra.mxu0 %v8340_v60  ;;  %v3291_v57 = vsel %vm5522_vm14, 1.0, %v8130_v52  ;;  %vm5558_vm4 = vmand %vm280_vm15, %vm408_vm11  ;;  %v1864_v56 = vsub.f32 %v5485_v22, %v7891_v7  ;;  %v5569_v6 = vsub.f32 %v3298_v28, %v3298_v28  ;;  %v8354_v44 = vmov 0  ;;  %1662 = vmatpush.msrb.mxu2 %v5361_v24 }
  0xb6   :  { %3461 = vmatpush.msk.msra.mxu1 %vm8344_vm0, %v8126_v41  ;;  %vm273_vm0 = vcmp.ge.s32.totalorder %v5380_v4, %v3872_v18  ;;  %3455 = vmatpush.msk.msrb.mxu3 %vm8351_vm5, %v8126_v41  ;;  %vm266_vm11 = vcmp.ge.s32.totalorder %v5380_v4, %v4052_v55  ;;  %vm394_vm5 = vcmp.lt.s32.totalorder %v5380_v4, %v8356_v62  ;;  %v8358_v7 = vand.u32 4294901760, %v5252_v58  ;;  %v8367_v62 = vld [vmem:[#allocation41_spill] sm:$0xff] }
  0xb7   :  { %1739 = vmatpush.msra.mxu0 %v8345_v59  ;;  %vm5577_vm15 = vmand %vm273_vm0, %vm401_vm3  ;;  %vm8357_vm14 = vnez %v8309_v42  ;;  %v5592_v28 = vsub.f32 %v3291_v57, %v3291_v57  ;;  %v8359_v59 = vld [vmem:[#allocation36_spill] sm:$0xff]  ;;  %3474 = vmatpush.msk.msra.mxu2 %vm5419_vm13, %v8126_v41  ;;  %v1865_v57 = vand.u32 4294901760, %v1864_v56  ;;  %v8362_v35 = vand.u32 4294901760, %v5520_v39 }
  0xb8   :  { %3462 = vmatpush.msk.msra.mxu1 %vm8347_vm8, %v8126_v41  ;;  %vm8352_vm8 = vnez %v8252_v45  ;;  %v8355_v44 = vsel %vm5577_vm15, 4294967295, %v8354_v44  ;;  %3456 = vmatpush.msk.msrb.mxu3 %vm8357_vm14, %v8126_v41  ;;  %v1859_v45 = vand.u32 4294901760, %v1858_v38  ;;  %v8360_v38 = vld [vmem:[#allocation37_spill] sm:$0xff]  ;;  %v8363_v37 = vmov 0 }
  0xb9   :  { %1743 = vmatpush.msra.mxu0 %v8348_v53  ;;  %v8353_v53 = vand.u32 4294901760, %v5221_v8  ;;  %v1870_v8 = vsub.f32 %v5504_v43, %v7892_v21  ;;  %v1876_v58 = vsub.f32 %v5520_v39, %v8362_v35  ;;  %v3277_v21 = vsel %vm5577_vm15, 1.0, %v8130_v52  ;;  %3475 = vmatpush.msk.msra.mxu2 %vm5433_vm1, %v8126_v41 }
  0xba   :  { %3463 = vmatpush.msk.msra.mxu1 %vm8352_vm8, %v8126_v41  ;;  %vm8361_vm8 = vnez %v8313_v40  ;;  %v8365_v56 = vand.u32 4294901760, %v5280_v63  ;;  %vm380_vm3 = vcmp.lt.s32.totalorder %v5380_v4, %v8367_v62  ;;  %v8370_v63 = vmov 0  ;;  %v8380_v62 = vld [vmem:[#allocation40_spill] sm:$0xff]  ;;  %1665 = vmatmul.f32.vlgmr.msrb.gmra.mxu2 %v8320_v26 }
  0xbb   :  { %1747 = vmatpush.msra.mxu0 %v8353_v53  ;;  %v3284_v53 = vsel %vm5558_vm4, 1.0, %v8130_v52  ;;  %3457 = vmatpush.msk.msrb.mxu3 %vm8361_vm8, %v8126_v41  ;;  %v1871_v55 = vand.u32 4294901760, %v1870_v8  ;;  %v1877_v23 = vand.u32 4294901760, %v1876_v58  ;;  %v8382_v12 = vand.u32 4294901760, %v5592_v28 }
  0xbc   :  { %3464 = vmatpush.msk.msra.mxu1 %vm8327_vm2, %v8126_v41  ;;  %vm5625_vm2 = vmand %vm266_vm11, %vm394_vm5  ;;  %v5634_v35 = vsub.f32 %v3284_v53, %v3284_v53  ;;  %vm8369_vm5 = vcmp.ge.s32.totalorder %v5380_v4, %v8359_v59  ;;  %v8372_v53 = vand.u32 4294901760, %v5306_v27  ;;  %3476 = vmatpush.msk.msra.mxu2 %vm5450_vm10, %v8126_v41  ;;  %v8375_v27 = vand.u32 4294901760, %v5569_v6 }
  0xbd   :  { %1751 = vmatpush.msra.mxu0 %v8358_v7  ;;  %v8364_v37 = vsel %vm5625_vm2, 4294967295, %v8363_v37  ;;  %v8366_v7 = vld [vmem:[#allocation38_spill] sm:$0xff]  ;;  %1860 = vmatpush.msra.mxu3 %v1859_v45  ;;  %v5659_v45 = vsub.f32 %v3277_v21, %v3277_v21  ;;  %v3270_v8 = vsel %vm5625_vm2, 1.0, %v8130_v52  ;;  %v8384_v58 = vmov 0 }
  0xbe   :  { %3465 = vmatpush.msk.msra.mxu1 %vm5065_vm6, %v8126_v41  ;;  %vm8368_vm6 = vcmp.lt.s32.totalorder %v5380_v4, %v8360_v38  ;;  %v1882_v21 = vsub.f32 %v5569_v6, %v8375_v27  ;;  %3477 = vmatpush.msk.msra.mxu2 %vm5465_vm7, %v8126_v41  ;;  %vm8386_vm0 = vnez %v8278_v5  ;;  %vm8397_vm10 = vnez %v8339_v34 }
  0xbf   :  { %1755 = vmatpush.msra.mxu0 %v8365_v56  ;;  %vm5650_vm11 = vmand %vm8369_vm5, %vm8368_vm6  ;;  %v8373_v56 = vld [vmem:[#allocation39_spill] sm:$0xff]  ;;  %vm373_vm6 = vcmp.lt.s32.totalorder %v5380_v4, %v8374_v2  ;;  %1866 = vmatpush.msra.mxu3 %v1865_v57  ;;  %v8379_v57 = vand.u32 4294901760, %v5332_v48  ;;  %v1888_v48 = vsub.f32 %v5592_v28, %v8382_v12  ;;  %v8388_v2 = vld [vmem:[#allocation49_spill] sm:$0xff]  ;;  %v8399_v26 = vand.u32 4294901760, %v5361_v24 }
  0xc0   :  { %v8371_v63 = vsel %vm5650_vm11, 4294967295, %v8370_v63  ;;  %3466 = vmatpush.msk.msra.mxu1 %vm5099_vm9, %v8126_v41  ;;  %vm8376_vm9 = vcmp.ge.s32.totalorder %v5380_v4, %v8366_v7  ;;  %v3263_v27 = vsel %vm5650_vm11, 1.0, %v8130_v52  ;;  %v8381_v7 = vld [vmem:[#allocation44_spill] sm:$0xff]  ;;  %v1883_v5 = vand.u32 4294901760, %v1882_v21  ;;  %3478 = vmatpush.msk.msra.mxu2 %vm8397_vm10, %v8126_v41  ;;  %v8405_v24 = vld [vmem:[#allocation59_spill] sm:$0xff] }
  0xc1   :  { %1759 = vmatpush.msra.mxu0 %v8372_v53  ;;  %vm5680_vm5 = vmand %vm8376_vm9, %vm380_vm3  ;;  %v8377_v53 = vmov 0  ;;  %1872 = vmatpush.msra.mxu3 %v1871_v55  ;;  %v8387_v55 = vand.u32 4294901760, %v5348_v61  ;;  %v5729_v38 = vsub.f32 %v3263_v27, %v3263_v27  ;;  %v8392_v61 = vmov 0 }
  0xc2   :  { %v8378_v53 = vsel %vm5680_vm5, 4294967295, %v8377_v53  ;;  %3467 = vmatpush.msk.msra.mxu1 %vm5133_vm12, %v8126_v41  ;;  %vm8383_vm12 = vcmp.ge.s32.totalorder %v5380_v4, %v8373_v56  ;;  %v3256_v12 = vsel %vm5680_vm5, 1.0, %v8130_v52  ;;  %v8389_v56 = vld [vmem:[#allocation52_spill] sm:$0xff]  ;;  %vm8396_vm5 = vnez %v8286_v9  ;;  %1704 = vmatmul.f32.vlgmr.msrb.gmra.mxu3 %v8323_v50  ;;  %v8411_v50 = vld [vmem:[#allocation54_spill] sm:$0xff] }
  0xc3   :  { %1763 = vmatpush.msra.mxu0 %v8379_v57  ;;  %v5703_v57 = vsub.f32 %v3270_v8, %v3270_v8  ;;  %vm5711_vm9 = vmand %vm8383_vm12, %vm373_vm6  ;;  %1878 = vmatpush.msra.mxu3 %v1877_v23  ;;  %vm8391_vm12 = vcmp.ge.s32.totalorder %v5380_v4, %v8380_v62  ;;  %v8395_v8 = vld [vmem:[#allocation53_spill] sm:$0xff]  ;;  %v8398_v23 = vand.u32 4294901760, %v5634_v35  ;;  %v5761_v62 = vsub.f32 %v3256_v12, %v3256_v12 }
  0xc4   :  { %v8385_v58 = vsel %vm5711_vm9, 4294967295, %v8384_v58  ;;  %3468 = vmatpush.msk.msra.mxu1 %vm8386_vm0, %v8126_v41  ;;  %vm8390_vm0 = vcmp.lt.s32.totalorder %v5380_v4, %v8381_v7  ;;  %vm352_vm6 = vcmp.lt.s32.totalorder %v5380_v4, %v8395_v8  ;;  %v3249_v27 = vsel %vm5711_vm9, 1.0, %v8130_v52  ;;  %1510 = vmatmul.f32.vlgmr.msrb.gmra.mxu0 %v8405_v24 }
  0xc5   :  { %1767 = vmatpush.msra.mxu0 %v8387_v55  ;;  %vm5737_vm7 = vmand %vm8391_vm12, %vm8390_vm0  ;;  %v8394_v55 = vld [vmem:[#allocation51_spill] sm:$0xff]  ;;  %v1894_v21 = vsub.f32 %v5634_v35, %v8398_v23  ;;  %v1889_v7 = vand.u32 4294901760, %v1888_v48  ;;  %vm8401_vm0 = vcmp.ge.s32.totalorder %v5380_v4, %v8388_v2  ;;  %vm8404_vm3 = vnez %v8294_v1  ;;  %1884 = vmatpush.msra.mxu3 %v1883_v5 }
  0xc6   :  { %v8393_v61 = vsel %vm5737_vm7, 4294967295, %v8392_v61  ;;  %3469 = vmatpush.msk.msra.mxu1 %vm8396_vm5, %v8126_v41  ;;  %vm8400_vm5 = vcmp.lt.s32.totalorder %v5380_v4, %v8389_v56  ;;  %v3242_v12 = vsel %vm5737_vm7, 1.0, %v8130_v52  ;;  %v8408_v9 = vmov 0  ;;  %v8410_v1 = vld [vmem:[#allocation47_spill] sm:$0xff] }
  0xc7   :  { %1771 = vmatpush.msra.mxu0 %v8399_v26  ;;  %vm5769_vm12 = vmand %vm8401_vm0, %vm8400_vm5  ;;  %v8406_v26 = vand.u32 4294901760, %v5659_v45  ;;  %vm8407_vm5 = vcmp.ge.s32.totalorder %v5380_v4, %v8394_v55  ;;  %vm345_vm10 = vcmp.lt.s32.totalorder %v5380_v4, %v8411_v50  ;;  %vm8412_vm9 = vnez %v8343_v33  ;;  %1611 = vmatmul.f32.vlgmr.msrb.gmra.mxu1 %v4343_v3 }
  0xc8   :  { %3470 = vmatpush.msk.msra.mxu1 %vm8404_vm3, %v8126_v41  ;;  %vm5789_vm0 = vmand %vm8407_vm5, %vm352_vm6  ;;  %vm217_vm3 = vcmp.ge.s32.totalorder %v5380_v4, %v8410_v1  ;;  %3479 = vmatpush.msk.msra.mxu2 %vm8412_vm9, %v8126_v41  ;;  %v5801_v24 = vsub.f32 %v3249_v27, %v3249_v27  ;;  %vm8413_vm6 = vnez %v8301_v32  ;;  %v1895_v8 = vand.u32 4294901760, %v1894_v21 }
  0xc9   :  { %v1900_v48 = vsub.f32 %v5659_v45, %v8406_v26  ;;  %v8409_v9 = vsel %vm5789_vm0, 4294967295, %v8408_v9  ;;  %1958 = vmatpush.msrb.mxu0 %v5463_v31  ;;  %v3235_v55 = vsel %vm5769_vm12, 1.0, %v8130_v52  ;;  %v8414_v5 = vand.u32 4294901760, %v5703_v57  ;;  %vm5829_vm5 = vmand %vm217_vm3, %vm345_vm10  ;;  %1890 = vmatpush.msra.mxu3 %v1889_v7 }
  0xca   :  { %3471 = vmatpush.msk.msra.mxu1 %vm8413_vm6, %v8126_v41  ;;  %3480 = vmatpush.msk.msra.mxu2 %vm5558_vm4, %v8126_v41  ;;  %v5818_v26 = vsub.f32 %v3242_v12, %v3242_v12  ;;  %v3228_v21 = vsel %vm5789_vm0, 1.0, %v8130_v52  ;;  %v7921_v32 = vand.u32 4294901760, %v5801_v24  ;;  %v5844_v50 = vsub.f32 %v3235_v55, %v3235_v55 }
  0xcb   :  { %v1906_v27 = vsub.f32 %v5703_v57, %v8414_v5  ;;  %v1901_v12 = vand.u32 4294901760, %v1900_v48  ;;  %1961 = vmatpush.msrb.mxu0 %v5485_v22  ;;  %v8417_v5 = vand.u32 4294901760, %v5729_v38  ;;  %1896 = vmatpush.msra.mxu3 %v1895_v8  ;;  %v5849_v42 = vsub.f32 %v3228_v21, %v3228_v21 }
  0xcc   :  { %3472 = vmatpush.msk.msra.mxu1 %vm8357_vm14, %v8126_v41  ;;  %3481 = vmatpush.msk.msra.mxu2 %vm5577_vm15, %v8126_v41  ;;  %v3221_v7 = vsel %vm5829_vm5, 1.0, %v8130_v52  ;;  %v8418_v55 = vand.u32 4294901760, %v5761_v62  ;;  %v5866_v8 = vadd.s32 512, %v8219_v10  ;;  %v1924_v21 = vsub.f32 %v5801_v24, %v7921_v32  ;;  %v80_v10 = vld [vmem:[#allocation5] sm:$0xff] }
  0xcd   :  { %v1912_v4 = vsub.f32 %v5729_v38, %v8417_v5  ;;  %1964 = vmatpush.msrb.mxu0 %v5504_v43  ;;  %v1907_v48 = vand.u32 4294901760, %v1906_v27  ;;  %1902 = vmatpush.msra.mxu3 %v1901_v12  ;;  %v5876_v40 = vsub.f32 %v3221_v7, %v3221_v7  ;;  %v7925_v12 = vand.u32 4294901760, %v5849_v42 }
  0xce   :  { %3473 = vmatpush.msk.msra.mxu1 %vm8361_vm8, %v8126_v41  ;;  %v1918_v5 = vsub.f32 %v5761_v62, %v8418_v55  ;;  %3482 = vmatpush.msk.msra.mxu2 %vm5625_vm2, %v8126_v41  ;;  %v7926_v55 = vand.u32 4294901760, %v5844_v50  ;;  %v8419_v1 = vand.u32 4294901760, %v5818_v26  ;;  %vm8420_vm10 = vnez %v8332_v14 }
  0xcf   :  { %1967 = vmatpush.msrb.mxu0 %v5520_v39  ;;  %v1913_v27 = vand.u32 4294901760, %v1912_v4  ;;  %1908 = vmatpush.msra.mxu3 %v1907_v48  ;;  %vm8421_vm14 = vnez %v8378_v53  ;;  %vm451_vm3 = vcmp.lt.s32.totalorder %v5866_v8, %v8225_v46  ;;  %v1925_v7 = vand.u32 4294901760, %v1924_v21 }
  0xd0   :  { %3490 = vmatpush.msk.msrb.mxu1 %vm5419_vm13, %v8126_v41  ;;  %1773 = vmatmul.f32.vlgmr.msra.gmra.mxu0 %v4343_v3  ;;  %v1919_v4 = vand.u32 4294901760, %v1918_v5  ;;  %v1930_v32 = vsub.f32 %v5818_v26, %v8419_v1  ;;  %v1936_v1 = vsub.f32 %v5844_v50, %v7926_v55  ;;  %v7928_v48 = vand.u32 4294901760, %v5876_v40  ;;  %v73_v5 = vld [vmem:[#allocation2] sm:$0xff] }
  0xd1   :  { %3483 = vmatpush.msk.msra.mxu2 %vm5650_vm11, %v8126_v41  ;;  %1970 = vmatpush.msrb.mxu0 %v5569_v6  ;;  %vm87_vm6 = vcmp.ne.f32.partialorder %v80_v10, %v80_v10  ;;  %vm8422_vm8 = vnez %v8335_v51  ;;  %v1942_v46 = vsub.f32 %v5849_v42, %v7925_v12  ;;  %v8425_v21 = vmov 0 }
  0xd2   :  { %3491 = vmatpush.msk.msrb.mxu1 %vm5433_vm1, %v8126_v41  ;;  %1914 = vmatpush.msra.mxu3 %v1913_v27  ;;  %v1931_v27 = vand.u32 4294901760, %v1930_v32  ;;  %vm8424_vm1 = vcmp.ge.s32.totalorder %v5866_v8, %v8224_v20  ;;  %vm316_vm13 = vcmp.ge.s32.totalorder %v5866_v8, %v8227_v11  ;;  %v94_v32 = vsel %vm87_vm6, %v73_v5, %v80_v10 }
  0xd3   :  { %3484 = vmatpush.msk.msra.mxu2 %vm8421_vm14, %v8126_v41  ;;  %1810 = vmatmul.f32.vlgmr.msra.gmra.mxu1 %v4343_v3  ;;  %vm5915_vm14 = vmand %vm8424_vm1, %vm451_vm3  ;;  %v1937_v12 = vand.u32 4294901760, %v1936_v1  ;;  %v1948_v55 = vsub.f32 %v5876_v40, %v7928_v48  ;;  %vm437_vm3 = vcmp.lt.s32.totalorder %v5866_v8, %v8233_v47  ;;  %v1943_v10 = vand.u32 4294901760, %v1942_v46 }
  0xd4   :  { %3492 = vmatpush.msk.msrb.mxu1 %vm8420_vm10, %v8126_v41  ;;  %1973 = vmatpush.msrb.mxu0 %v5592_v28  ;;  %vm8423_vm10 = vnez %v8385_v58  ;;  %v8426_v21 = vsel %vm5915_vm14, 4294967295, %v8425_v21  ;;  %v8429_v1 = vmov 0  ;;  %vm302_vm1 = vcmp.ge.s32.totalorder %v5866_v8, %v8237_v36 }
  0xd5   :  { %3485 = vmatpush.msk.msra.mxu2 %vm8423_vm10, %v8126_v41  ;;  %1920 = vmatpush.msra.mxu3 %v1919_v4  ;;  %vm444_vm10 = vcmp.lt.s32.totalorder %v5866_v8, %v8228_v29  ;;  %v5927_v4 = vld [vmem:[#allocation8] sm:$0xff]  ;;  %v101_v46 = vsub.f32 %v73_v5, %v94_v32  ;;  %v1949_v5 = vand.u32 4294901760, %v1948_v55  ;;  %v8434_v47 = vmov 0 }
  0xd6   :  { %3493 = vmatpush.msk.msrb.mxu1 %vm8422_vm8, %v8126_v41  ;;  %1976 = vmatpush.msrb.mxu0 %v5634_v35  ;;  %vm8427_vm8 = vnez %v8339_v34  ;;  %8428 = vst [vmem:[#allocation50_spill] sm:$0xff] %v5927_v4  ;;  %vm5955_vm6 = vmand %vm316_vm13, %vm444_vm10  ;;  %v110_v48 = vperm.slane %v5927_v4, 0  ;;  %vm8431_vm13 = vcmp.ge.s32.totalorder %v5866_v8, %v8232_v0  ;;  %v8484_v60 = vmov 0 }
  0xd7   :  { %3486 = vmatpush.msk.msra.mxu2 %vm5737_vm7, %v8126_v41  ;;  %1926 = vmatpush.msra.mxu3 %v1925_v7  ;;  %v3327_v7 = vsel %vm5915_vm14, 1.0, %v8130_v52  ;;  %v8430_v1 = vsel %vm5955_vm6, 4294967295, %v8429_v1  ;;  %vm5971_vm10 = vmand %vm8431_vm13, %vm437_vm3  ;;  %v3320_v4 = vsel %vm5955_vm6, 1.0, %v8130_v52  ;;  %vm295_vm13 = vcmp.ge.s32.totalorder %v5866_v8, %v3866_v15 }
  0xd8   :  { %3494 = vmatpush.msk.msrb.mxu1 %vm8427_vm8, %v8126_v41  ;;  %1979 = vmatpush.msrb.mxu0 %v5659_v45  ;;  %v5982_v32 = vsub.f32 %v3327_v7, %v3327_v7  ;;  %v3313_v55 = vsel %vm5971_vm10, 1.0, %v8130_v52  ;;  %v829_v7 = vpop.f32.mrf.mxu0 }
  0xd9   :  { %3487 = vmatpush.msk.msra.mxu2 %vm5769_vm12, %v8126_v41  ;;  %1932 = vmatpush.msra.mxu3 %v1931_v27  ;;  %v8432_v27 = vmov 0 }
  0xda   :  { %3495 = vmatpush.msk.msrb.mxu1 %vm8412_vm9, %v8126_v41  ;;  %vm430_vm9 = vcmp.lt.s32.totalorder %v5866_v8, %v8238_v25  ;;  %1982 = vmatpush.msrb.mxu0 %v5703_v57  ;;  %v8433_v27 = vsel %vm5971_vm10, 4294967295, %v8432_v27  ;;  %v930_v25 = vpop.f32.mrf.mxu1 }
  0xdb   :  { %3488 = vmatpush.msk.msra.mxu2 %vm5789_vm0, %v8126_v41  ;;  %1938 = vmatpush.msra.mxu3 %v1937_v12  ;;  %vm5990_vm3 = vmand %vm302_vm1, %vm430_vm9  ;;  %vm416_vm1 = vcmp.lt.s32.totalorder %v5866_v8, %v8246_v19  ;;  %v124_v12 = vmul.f32 %v110_v48, %v101_v46  ;;  %v8437_v48 = vmov 0  ;;  %v7940_v46 = vand.u32 4294901760, %v5982_v32 }
  0xdc   :  { %3496 = vmatpush.msk.msrb.mxu1 %vm5558_vm4, %v8126_v41  ;;  %1985 = vmatpush.msrb.mxu0 %v5729_v38  ;;  %v8435_v47 = vsel %vm5990_vm3, 4294967295, %v8434_v47  ;;  %v3306_v36 = vsel %vm5990_vm3, 1.0, %v8130_v52  ;;  %vm8448_vm3 = vnez %v8385_v58  ;;  %v8453_v19 = vand.u32 4294901760, %v5520_v39 }
  0xdd   :  { %3489 = vmatpush.msk.msra.mxu2 %vm5829_vm5, %v8126_v41  ;;  %1944 = vmatpush.msra.mxu3 %v1943_v10  ;;  %v8436_v10 = vand.u32 4294901760, %v5463_v31  ;;  %v6028_v31 = vsub.f32 %v3320_v4, %v3320_v4  ;;  %v6048_v4 = vand.u32 2147483647, %v124_v12  ;;  %v8589_v39 = vmov 0 }
  0xde   :  { %3497 = vmatpush.msk.msrb.mxu1 %vm5577_vm15, %v8126_v41  ;;  %vm423_vm15 = vcmp.lt.s32.totalorder %v5866_v8, %v8242_v54  ;;  %1988 = vmatpush.msrb.mxu0 %v5761_v62  ;;  %v931_v54 = vadd.f32 %v930_v25, %v829_v7  ;;  %v6030_v25 = vsub.f32 %v3313_v55, %v3313_v55  ;;  %v8440_v7 = vmov 0 }
  0xdf   :  { %2052 = vmatpush.msrb.mxu2 %v8436_v10  ;;  %1950 = vmatpush.msra.mxu3 %v1949_v5  ;;  %vm6020_vm9 = vmand %vm295_vm13, %vm423_vm15  ;;  %v984_v5 = vpop.f32.mrf.mxu2  ;;  %vm8439_vm15 = vcmp.ge.s32.totalorder %v5866_v8, %v3868_v16  ;;  %v8442_v10 = vand.u32 4294901760, %v5485_v22  ;;  %v6058_v22 = vsub.f32 %v3306_v36, %v3306_v36  ;;  %v8445_v55 = vand.u32 4294901760, %v5504_v43  ;;  %v8447_v36 = vld [vmem:[#allocation31_spill] sm:$0xff]  ;;  %v1023_v43 = vpop.f32.mrf.mxu3 }
  0xe0   :  { %3498 = vmatpush.msk.msrb.mxu1 %vm5625_vm2, %v8126_v41  ;;  %v8438_v48 = vsel %vm6020_vm9, 4294967295, %v8437_v48  ;;  %1991 = vmatpush.msrb.mxu0 %v5801_v24  ;;  %vm6039_vm13 = vmand %vm8439_vm15, %vm416_vm1  ;;  %vm8444_vm1 = vnez %v8378_v53  ;;  %v985_v12 = vadd.f32 %v984_v5, %v931_v54  ;;  %v2199_v54 = vsub.f32 %v5982_v32, %v7940_v46 }
  0xe1   :  { %v8441_v7 = vsel %vm6039_vm13, 4294967295, %v8440_v7  ;;  %2056 = vmatpush.msrb.mxu2 %v8442_v10  ;;  %v3292_v10 = vsel %vm6039_vm13, 1.0, %v8130_v52  ;;  %vm8450_vm15 = vcmp.ge.s32.totalorder %v5866_v8, %v3870_v17  ;;  %v145_v5 = vmul.f32 4.5, %v6048_v4  ;;  %1952 = vmatmul.f32.vlgmr.msra.gmra.mxu3 %v4343_v3 }
  0xe2   :  { %3499 = vmatpush.msk.msrb.mxu1 %vm5650_vm11, %v8126_v41  ;;  %vm8443_vm11 = vnez %v8325_v49  ;;  %1994 = vmatpush.msrb.mxu0 %v5818_v26  ;;  %v3299_v49 = vsel %vm6020_vm9, 1.0, %v8130_v52 }
  0xe3   :  { %3506 = vmatpush.msk.msrb.mxu3 %vm8443_vm11, %v8126_v41  ;;  %2060 = vmatpush.msrb.mxu2 %v8445_v55  ;;  %vm8446_vm11 = vnez %v8329_v13  ;;  %v6099_v46 = vsub.f32 %v3299_v49, %v3299_v49  ;;  %v8455_v13 = vld [vmem:[#allocation32_spill] sm:$0xff]  ;;  %v8461_v49 = vand.u32 4294901760, %v5569_v6  ;;  %v2200_v6 = vand.u32 4294901760, %v2199_v54 }
  0xe4   :  { %3500 = vmatpush.msk.msrb.mxu1 %vm8444_vm1, %v8126_v41  ;;  %1997 = vmatpush.msrb.mxu0 %v5844_v50  ;;  %v8470_v54 = vand.u32 4294901760, %v5592_v28  ;;  %v8472_v28 = vmov 0 }
  0xe5   :  { %3507 = vmatpush.msk.msrb.mxu3 %vm8446_vm11, %v8126_v41  ;;  %vm8449_vm11 = vcmp.lt.s32.totalorder %v5866_v8, %v3934_v30  ;;  %2064 = vmatpush.msrb.mxu2 %v8453_v19  ;;  %v8456_v30 = vld [vmem:[#allocation34_spill] sm:$0xff]  ;;  %v6110_v19 = vsub.f32 %v3292_v10, %v3292_v10  ;;  %v1024_v10 = vadd.f32 %v1023_v43, %v985_v12  ;;  %v8465_v43 = vand.u32 4294901760, %v6030_v25 }
  0xe6   :  { %3501 = vmatpush.msk.msrb.mxu1 %vm8448_vm3, %v8126_v41  ;;  %vm6090_vm2 = vmand %vm8450_vm15, %vm8449_vm11  ;;  %vm8454_vm3 = vnez %v8332_v14  ;;  %2000 = vmatpush.msrb.mxu0 %v5849_v42  ;;  %vm8458_vm11 = vcmp.ge.s32.totalorder %v5866_v8, %v3872_v18  ;;  %vm8462_vm15 = vnez %v8335_v51  ;;  %v8464_v51 = vand.u32 4294901760, %v6028_v31  ;;  %v1092_v18 = vpop.f32.mrf.mxu0 }
  0xe7   :  { %3508 = vmatpush.msk.msrb.mxu3 %vm8454_vm3, %v8126_v41  ;;  %vm8457_vm3 = vcmp.lt.s32.totalorder %v5866_v8, %v8447_v36  ;;  %2068 = vmatpush.msrb.mxu2 %v8461_v49  ;;  %v3285_v14 = vsel %vm6090_vm2, 1.0, %v8130_v52  ;;  %v8463_v36 = vld [vmem:[#allocation37_spill] sm:$0xff]  ;;  %v2211_v49 = vsub.f32 %v6030_v25, %v8465_v43  ;;  %v3211_v43 = vadd.f32 -0.055555556, %v6048_v4 }
  0xe8   :  { %3502 = vmatpush.msk.msrb.mxu1 %vm5737_vm7, %v8126_v41  ;;  %vm6119_vm1 = vmand %vm8458_vm11, %vm8457_vm3  ;;  %vm388_vm3 = vcmp.lt.s32.totalorder %v5866_v8, %v8463_v36  ;;  %2003 = vmatpush.msrb.mxu0 %v5876_v40  ;;  %v2205_v12 = vsub.f32 %v6028_v31, %v8464_v51  ;;  %vm8467_vm11 = vcmp.ge.s32.totalorder %v5866_v8, %v8455_v13  ;;  %v8478_v36 = vand.u32 4294901760, %v6058_v22 }
  0xe9   :  { %3509 = vmatpush.msk.msrb.mxu3 %vm8462_vm15, %v8126_v41  ;;  %vm8466_vm15 = vcmp.lt.s32.totalorder %v5866_v8, %v8456_v30  ;;  %2072 = vmatpush.msrb.mxu2 %v8470_v54  ;;  %v152_v51 = vmul.f32 %v145_v5, %v6048_v4  ;;  %v3278_v13 = vsel %vm6119_vm1, 1.0, %v8130_v52  ;;  %v6173_v34 = vsub.f32 %v3285_v14, %v3285_v14  ;;  %v8474_v5 = vld [vmem:[#allocation38_spill] sm:$0xff]  ;;  %v8475_v54 = vld [vmem:[#allocation41_spill] sm:$0xff] }
  0xea   :  { %3503 = vmatpush.msk.msrb.mxu1 %vm5769_vm12, %v8126_v41  ;;  %vm6151_vm7 = vmand %vm8467_vm11, %vm8466_vm15  ;;  %3522 = vmatpush.msk.msra.mxu0 %vm5915_vm14, %v8126_v41  ;;  %vm8471_vm15 = vcmp.ge.s32.totalorder %v5866_v8, %v8359_v59  ;;  %vm253_vm14 = vcmp.ge.s32.totalorder %v5866_v8, %v8474_v5  ;;  %v8476_v30 = vand.u32 4294901760, %v5634_v35  ;;  %v1093_v14 = vadd.f32 %v1092_v18, %v1024_v10  ;;  %v8480_v35 = vld [vmem:[#allocation43_spill] sm:$0xff] }
  0xeb   :  { %3510 = vmatpush.msk.msrb.mxu3 %vm8427_vm8, %v8126_v41  ;;  %vm6181_vm11 = vmand %vm8471_vm15, %vm388_vm3  ;;  %vm8477_vm8 = vnez %v8343_v33  ;;  %v2217_v59 = vsub.f32 %v6058_v22, %v8478_v36  ;;  %v3271_v15 = vsel %vm6151_vm7, 1.0, %v8130_v52  ;;  %v6207_v18 = vsub.f32 %v3278_v13, %v3278_v13  ;;  %v8479_v33 = vld [vmem:[#allocation39_spill] sm:$0xff] }
  0xec   :  { %3504 = vmatpush.msk.msrb.mxu1 %vm5789_vm0, %v8126_v41  ;;  %v8473_v28 = vsel %vm6181_vm11, 4294967295, %v8472_v28  ;;  %vm381_vm0 = vcmp.lt.s32.totalorder %v5866_v8, %v8475_v54  ;;  %2076 = vmatpush.msrb.mxu2 %v8476_v30  ;;  %v2206_v30 = vand.u32 4294901760, %v2205_v12  ;;  %v8481_v36 = vand.u32 4294901760, %v5659_v45  ;;  %v1129_v45 = vpop.f32.mrf.mxu1 }
  0xed   :  { %3511 = vmatpush.msk.msrb.mxu3 %vm8477_vm8, %v8126_v41  ;;  %3523 = vmatpush.msk.msra.mxu0 %vm5955_vm6, %v8126_v41  ;;  %vm374_vm8 = vcmp.lt.s32.totalorder %v5866_v8, %v8480_v35  ;;  %v2212_v10 = vand.u32 4294901760, %v2211_v49  ;;  %vm8482_vm15 = vcmp.lt.f32.partialorder %v6048_v4, 0.11111111  ;;  %v8483_v13 = vand.u32 4294901760, %v6099_v46  ;;  %vm6232_vm3 = vmand %vm253_vm14, %vm381_vm0 }
  0xee   :  { %3505 = vmatpush.msk.msrb.mxu1 %vm5829_vm5, %v8126_v41  ;;  %2080 = vmatpush.msrb.mxu2 %v8481_v36  ;;  %v166_v16 = vsel %vm8482_vm15, %v152_v51, %v3211_v43  ;;  %v3264_v0 = vsel %vm6181_vm11, 1.0, %v8130_v52  ;;  %v8485_v60 = vsel %vm6232_vm3, 4294967295, %v8484_v60  ;;  %v6239_v4 = vsub.f32 %v3271_v15, %v3271_v15  ;;  %v8486_v51 = vld [vmem:[#allocation40_spill] sm:$0xff] }
  0xef   :  { %3512 = vmatpush.msk.msrb.mxu3 %vm5558_vm4, %v8126_v41  ;;  %v2223_v12 = vsub.f32 %v6099_v46, %v8483_v13  ;;  %3524 = vmatpush.msk.msra.mxu0 %vm5971_vm10, %v8126_v41  ;;  %v8487_v43 = vld [vmem:[#allocation44_spill] sm:$0xff]  ;;  %v8488_v36 = vand.u32 4294901760, %v5703_v57  ;;  %vm8489_vm0 = vnez %v8355_v44  ;;  %v1130_v13 = vadd.f32 %v1129_v45, %v1093_v14 }
  0xf0   :  { %2201 = vmatpush.msra.mxu1 %v2200_v6  ;;  %v8490_v6 = vand.u32 4294901760, %v6110_v19  ;;  %vm8491_vm14 = vcmp.ge.s32.totalorder %v5866_v8, %v8479_v33  ;;  %v8492_v49 = vmov 0  ;;  %vm8494_vm15 = vnez %v8435_v47 }
  0xf1   :  { %2084 = vmatpush.msrb.mxu2 %v8488_v36  ;;  %3513 = vmatpush.msk.msrb.mxu3 %vm8489_vm0, %v8126_v41  ;;  %vm6260_vm4 = vmand %vm8491_vm14, %vm374_vm8  ;;  %v2218_v44 = vand.u32 4294901760, %v2217_v59  ;;  %v6267_v57 = vsub.f32 %v3264_v0, %v3264_v0  ;;  %v7967_v14 = vand.u32 4294901760, %v6207_v18  ;;  %v3257_v45 = vsel %vm6232_vm3, 1.0, %v8130_v52  ;;  %v8501_v59 = vld [vmem:[#allocation52_spill] sm:$0xff] }
  0xf2   :  { %v2229_v15 = vsub.f32 %v6110_v19, %v8490_v6  ;;  %v8493_v49 = vsel %vm6260_vm4, 4294967295, %v8492_v49  ;;  %3525 = vmatpush.msk.msra.mxu0 %vm8494_vm15, %v8126_v41  ;;  %2207 = vmatpush.msra.mxu1 %v2206_v30  ;;  %v8495_v36 = vand.u32 4294901760, %v5729_v38  ;;  %vm8496_vm8 = vnez %v8364_v37 }
  0xf3   :  { %3514 = vmatpush.msk.msrb.mxu3 %vm8496_vm8, %v8126_v41  ;;  %v3178_v6 = vmul.f32 %v1130_v13, %v166_v16  ;;  %vm8497_vm0 = vcmp.lt.s32.totalorder %v5866_v8, %v8487_v43  ;;  %vm8498_vm14 = vcmp.ge.s32.totalorder %v5866_v8, %v8486_v51  ;;  %v8499_v0 = vmov 0 }
  0xf4   :  { %2088 = vmatpush.msrb.mxu2 %v8495_v36  ;;  %vm6284_vm15 = vmand %vm8498_vm14, %vm8497_vm0  ;;  %vm232_vm10 = vcmp.ge.s32.totalorder %v5866_v8, %v8388_v2  ;;  %vm360_vm6 = vcmp.lt.s32.totalorder %v5866_v8, %v8501_v59  ;;  %3526 = vmatpush.msk.msra.mxu0 %vm6020_vm9, %v8126_v41  ;;  %v2224_v16 = vand.u32 4294901760, %v2223_v12  ;;  %v8502_v37 = vand.u32 4294901760, %v6173_v34 }
  0xf5   :  { %v8500_v0 = vsel %vm6284_vm15, 4294967295, %v8499_v0  ;;  %2213 = vmatpush.msra.mxu1 %v2212_v10  ;;  %v7969_v30 = vand.u32 4294901760, %v6239_v4  ;;  %v3250_v13 = vsel %vm6260_vm4, 1.0, %v8130_v52  ;;  %v8503_v36 = vand.u32 4294901760, %v5761_v62  ;;  %3185 = vst [vmem:[#allocation10] sm:$0xff] %v3178_v6  ;;  %vm6324_vm0 = vmand %vm232_vm10, %vm360_vm6 }
  0xf6   :  { %v2235_v38 = vsub.f32 %v6173_v34, %v8502_v37  ;;  %vm8504_vm8 = vnez %v8371_v63  ;;  %v2230_v10 = vand.u32 4294901760, %v2229_v15  ;;  %v6307_v12 = vsub.f32 %v3257_v45, %v3257_v45  ;;  %3527 = vmatpush.msk.msra.mxu0 %vm6039_vm13, %v8126_v41  ;;  %v8507_v15 = vld [vmem:[#allocation51_spill] sm:$0xff] }
  0xf7   :  { %2092 = vmatpush.msrb.mxu2 %v8503_v36  ;;  %3515 = vmatpush.msk.msrb.mxu3 %vm8504_vm8, %v8126_v41  ;;  %v2241_v37 = vsub.f32 %v6207_v18, %v7967_v14  ;;  %v3243_v62 = vsel %vm6284_vm15, 1.0, %v8130_v52  ;;  %v8505_v63 = vmov 0  ;;  %vm225_vm14 = vcmp.ge.s32.totalorder %v5866_v8, %v8507_v15 }
  0xf8   :  { %2219 = vmatpush.msra.mxu1 %v2218_v44  ;;  %v8506_v63 = vsel %vm6324_vm0, 4294967295, %v8505_v63  ;;  %v8508_v44 = vld [vmem:[#allocation53_spill] sm:$0xff]  ;;  %v8509_v45 = vand.u32 4294901760, %v5801_v24  ;;  %vm8510_vm13 = vnez %v8378_v53  ;;  %v6337_v6 = vsub.f32 %v3250_v13, %v3250_v13  ;;  %3528 = vmatpush.msk.msra.mxu0 %vm6090_vm2, %v8126_v41  ;;  %v8511_v24 = vld [vmem:[#allocation47_spill] sm:$0xff] }
  0xf9   :  { %vm353_vm8 = vcmp.lt.s32.totalorder %v5866_v8, %v8508_v44  ;;  %3516 = vmatpush.msk.msrb.mxu3 %vm8510_vm13, %v8126_v41  ;;  %v7990_v36 = vand.u32 4294901760, %v6267_v57  ;;  %v2236_v14 = vand.u32 4294901760, %v2235_v38  ;;  %v2247_v59 = vsub.f32 %v6239_v4, %v7969_v30 }
  0xfa   :  { %2096 = vmatpush.msrb.mxu2 %v8509_v45  ;;  %2225 = vmatpush.msra.mxu1 %v2224_v16  ;;  %v8512_v45 = vld [vmem:[#allocation54_spill] sm:$0xff]  ;;  %v8513_v53 = vand.u32 4294901760, %v5818_v26  ;;  %vm8514_vm13 = vnez %v8385_v58  ;;  %v6355_v13 = vsub.f32 %v3243_v62, %v3243_v62  ;;  %v3236_v38 = vsel %vm6324_vm0, 1.0, %v8130_v52  ;;  %vm6367_vm6 = vmand %vm225_vm14, %vm353_vm8 }
  0xfb   :  { %vm346_vm10 = vcmp.lt.s32.totalorder %v5866_v8, %v8512_v45  ;;  %3517 = vmatpush.msk.msrb.mxu3 %vm8514_vm13, %v8126_v41  ;;  %v8515_v26 = vmov 0  ;;  %3529 = vmatpush.msk.msra.mxu0 %vm6119_vm1, %v8126_v41  ;;  %v2242_v58 = vand.u32 4294901760, %v2241_v37  ;;  %v8517_v62 = vand.u32 4294901760, %v5844_v50 }
  0xfc   :  { %2100 = vmatpush.msrb.mxu2 %v8513_v53  ;;  %v8516_v26 = vsel %vm6367_vm6, 4294967295, %v8515_v26  ;;  %2231 = vmatpush.msra.mxu1 %v2230_v10  ;;  %vm8518_vm13 = vnez %v8393_v61  ;;  %v2253_v53 = vsub.f32 %v6267_v57, %v7990_v36  ;;  %v7986_v30 = vand.u32 4294901760, %v6337_v6 }
  0xfd   :  { %3518 = vmatpush.msk.msrb.mxu3 %vm8518_vm13, %v8126_v41  ;;  %vm8519_vm14 = vcmp.ge.s32.totalorder %v5866_v8, %v8511_v24  ;;  %v8520_v16 = vmov 0  ;;  %3530 = vmatpush.msk.msra.mxu0 %vm6151_vm7, %v8126_v41  ;;  %v2248_v50 = vand.u32 4294901760, %v2247_v59  ;;  %v6393_v61 = vsub.f32 %v3236_v38, %v3236_v38 }
  0xfe   :  { %2104 = vmatpush.msrb.mxu2 %v8517_v62  ;;  %vm6386_vm8 = vmand %vm8519_vm14, %vm346_vm10  ;;  %2237 = vmatpush.msra.mxu1 %v2236_v14  ;;  %v3229_v10 = vsel %vm6367_vm6, 1.0, %v8130_v52  ;;  %v8522_v37 = vand.u32 4294901760, %v5849_v42  ;;  %v8523_v8 = vand.u32 4294901760, %v6307_v12  ;;  %v7985_v14 = vand.u32 4294901760, %v6355_v13 }
  0xff   :  { %v8521_v16 = vsel %vm6386_vm8, 4294967295, %v8520_v16  ;;  %3519 = vmatpush.msk.msrb.mxu3 %vm5769_vm12, %v8126_v41  ;;  %3531 = vmatpush.msk.msra.mxu0 %vm6181_vm11, %v8126_v41  ;;  %v3222_v42 = vsel %vm6386_vm8, 1.0, %v8130_v52  ;;  %v8524_v59 = vand.u32 4294901760, %v5876_v40  ;;  %vm8525_vm12 = vnez %v8409_v9  ;;  %v8526_v40 = vld [vmem:[#allocation59_spill] sm:$0xff] }
 0x100   :  { %2108 = vmatpush.msrb.mxu2 %v8522_v37  ;;  %v2259_v62 = vsub.f32 %v6307_v12, %v8523_v8  ;;  %2243 = vmatpush.msra.mxu1 %v2242_v58  ;;  %v2254_v23 = vand.u32 4294901760, %v2253_v53  ;;  %v2265_v38 = vsub.f32 %v6337_v6, %v7986_v30  ;;  %v6421_v37 = vsub.f32 %v3229_v10, %v3229_v10  ;;  %v8539_v30 = vld [vmem:[#allocation58_spill] sm:$0xff] }
 0x101   :  { %3520 = vmatpush.msk.msrb.mxu3 %vm8525_vm12, %v8126_v41  ;;  %3532 = vmatpush.msk.msra.mxu0 %vm6232_vm3, %v8126_v41  ;;  %v7982_v58 = vand.u32 4294901760, %v6393_v61  ;;  %v2271_v53 = vsub.f32 %v6355_v13, %v7985_v14  ;;  %v6434_v10 = vsub.f32 %v3222_v42, %v3222_v42  ;;  %vm8528_vm10 = vnez %v8430_v1  ;;  %v74_v14 = vld [vmem:[#allocation2 + $0x8] sm:$0xff] }
 0x102   :  { %2112 = vmatpush.msrb.mxu2 %v8524_v59  ;;  %2249 = vmatpush.msra.mxu1 %v2248_v50  ;;  %v2260_v9 = vand.u32 4294901760, %v2259_v62  ;;  %v2266_v50 = vand.u32 4294901760, %v2265_v38  ;;  %v7979_v56 = vand.u32 4294901760, %v6421_v37  ;;  %vm8529_vm13 = vnez %v8433_v27  ;;  %v8530_v38 = vld [vmem:[#allocation15_spill] sm:$0xff] }
 0x103   :  { %1851 = vmatmul.f32.vlgmr.msra.gmra.mxu2 %v8526_v40  ;;  %3521 = vmatpush.msk.msrb.mxu3 %vm5829_vm5, %v8126_v41  ;;  %vm8527_vm5 = vnez %v8426_v21  ;;  %v2277_v8 = vsub.f32 %v6393_v61, %v7982_v58  ;;  %v2272_v62 = vand.u32 4294901760, %v2271_v53  ;;  %v7972_v42 = vand.u32 4294901760, %v6434_v10  ;;  %v8538_v58 = vld [vmem:[#allocation26_spill] sm:$0xff] }
 0x104   :  { %2299 = vmatpush.msra.mxu2 %v5982_v32  ;;  %3533 = vmatpush.msk.msra.mxu0 %vm6260_vm4, %v8126_v41  ;;  %v2283_v59 = vsub.f32 %v6421_v37, %v7979_v56  ;;  %vm8531_vm14 = vnez %v8435_v47  ;;  %v8544_v36 = vmov 0  ;;  %v8559_v27 = vand.u32 4294901760, %v6110_v19 }
 0x105   :  { %2255 = vmatpush.msra.mxu1 %v2254_v23  ;;  %3538 = vmatpush.msk.msra.mxu3 %vm8527_vm5, %v8126_v41  ;;  %v2278_v23 = vand.u32 4294901760, %v2277_v8  ;;  %v2289_v53 = vsub.f32 %v6434_v10, %v7972_v42  ;;  %v8532_v8 = vld [vmem:[#allocation57_spill] sm:$0xff] }
 0x106   :  { %2302 = vmatpush.msra.mxu2 %v6028_v31  ;;  %3534 = vmatpush.msk.msra.mxu0 %vm6284_vm15, %v8126_v41 }
 0x107   :  { %2261 = vmatpush.msra.mxu1 %v2260_v9  ;;  %3539 = vmatpush.msk.msra.mxu3 %vm8528_vm10, %v8126_v41  ;;  %v6468_v9 = vadd.s32 640, %v8530_v38  ;;  %v2290_v42 = vand.u32 4294901760, %v2289_v53  ;;  %v8537_v53 = vld [vmem:[#allocation18_spill] sm:$0xff] }
 0x108   :  { %2305 = vmatpush.msra.mxu2 %v6030_v25  ;;  %3535 = vmatpush.msk.msra.mxu0 %vm6324_vm0, %v8126_v41 }
 0x109   :  { %2267 = vmatpush.msra.mxu1 %v2266_v50  ;;  %3540 = vmatpush.msk.msra.mxu3 %vm8529_vm13, %v8126_v41  ;;  %v2284_v50 = vand.u32 4294901760, %v2283_v59  ;;  %vm324_vm12 = vcmp.ge.s32.totalorder %v6468_v9, %v8224_v20  ;;  %vm317_vm0 = vcmp.ge.s32.totalorder %v6468_v9, %v8227_v11  ;;  %v81_v59 = vld [vmem:[#allocation5 + $0x8] sm:$0xff]  ;;  %vm310_vm4 = vcmp.ge.s32.totalorder %v6468_v9, %v8537_v53 }
 0x10a   :  { %2308 = vmatpush.msra.mxu2 %v6058_v22  ;;  %3536 = vmatpush.msk.msra.mxu0 %vm6367_vm6, %v8126_v41  ;;  %vm438_vm3 = vcmp.lt.s32.totalorder %v6468_v9, %v8538_v58  ;;  %v8546_v58 = vld [vmem:[#allocation19_spill] sm:$0xff]  ;;  %v8579_v11 = vand.u32 4294901760, %v6239_v4 }
 0x10b   :  { %2273 = vmatpush.msra.mxu1 %v2272_v62  ;;  %2114 = vmatmul.f32.vlgmr.msrb.gmra.mxu2 %v4343_v3  ;;  %v8533_v62 = vld [vmem:[#allocation24_spill] sm:$0xff] }
 0x10c   :  { %3541 = vmatpush.msk.msra.mxu3 %vm8531_vm14, %v8126_v41  ;;  %2311 = vmatpush.msra.mxu2 %v6099_v46  ;;  %vm452_vm6 = vcmp.lt.s32.totalorder %v6468_v9, %v8533_v62  ;;  %vm88_vm14 = vcmp.ne.f32.partialorder %v81_v59, %v81_v59 }
 0x10d   :  { %3537 = vmatpush.msk.msra.mxu0 %vm6386_vm8, %v8126_v41  ;;  %2279 = vmatpush.msra.mxu1 %v2278_v23  ;;  %vm445_vm8 = vcmp.lt.s32.totalorder %v6468_v9, %v8228_v29  ;;  %v8534_v23 = vand.u32 4294901760, %v5982_v32  ;;  %vm6501_vm15 = vmand %vm324_vm12, %vm452_vm6  ;;  %v8541_v32 = vmov 0  ;;  %vm8558_vm12 = vnez %v8473_v28 }
 0x10e   :  { %2006 = vmatmul.f32.vlgmr.msrb.gmra.mxu0 %v8532_v8  ;;  %2151 = vmatmul.f32.vlgmr.msrb.gmra.mxu3 %v4343_v3  ;;  %vm6513_vm11 = vmand %vm317_vm0, %vm445_vm8  ;;  %vm303_vm0 = vcmp.ge.s32.totalorder %v6468_v9, %v8546_v58  ;;  %v8552_v58 = vld [vmem:[#allocation50_spill] sm:$0xff]  ;;  %v8597_v28 = vmov 0 }
 0x10f   :  { %2314 = vmatpush.msra.mxu2 %v6110_v19  ;;  %3542 = vmatpush.msk.msra.mxu3 %vm6020_vm9, %v8126_v41  ;;  %vm8540_vm9 = vnez %v8441_v7  ;;  %v8542_v32 = vsel %vm6513_vm11, 4294967295, %v8541_v32  ;;  %vm6526_vm6 = vmand %vm310_vm4, %vm438_vm3  ;;  %v3321_v53 = vsel %vm6513_vm11, 1.0, %v8130_v52  ;;  %v111_v29 = vperm.slane %v8552_v58, 1  ;;  %v8557_v58 = vld [vmem:[#allocation29_spill] sm:$0xff] }
 0x110   :  { %2393 = vmatpush.msrb.mxu0 %v8534_v23  ;;  %2285 = vmatpush.msra.mxu1 %v2284_v50  ;;  %v8543_v50 = vand.u32 4294901760, %v6028_v31  ;;  %v3328_v23 = vsel %vm6501_vm15, 1.0, %v8130_v52  ;;  %v8545_v36 = vsel %vm6526_vm6, 4294967295, %v8544_v36  ;;  %v8547_v31 = vld [vmem:[#allocation27_spill] sm:$0xff]  ;;  %v3314_v21 = vsel %vm6526_vm6, 1.0, %v8130_v52 }
 0x111   :  { %2317 = vmatpush.msra.mxu2 %v6173_v34  ;;  %2045 = vmatmul.f32.vlgmr.msrb.gmra.mxu1 %v8539_v30  ;;  %vm431_vm8 = vcmp.lt.s32.totalorder %v6468_v9, %v8547_v31  ;;  %v8549_v31 = vand.u32 4294901760, %v6058_v22  ;;  %v6565_v1 = vsub.f32 %v3321_v53, %v3321_v53  ;;  %v8553_v22 = vld [vmem:[#allocation20_spill] sm:$0xff]  ;;  %v6584_v53 = vsub.f32 %v3314_v21, %v3314_v21  ;;  %v1170_v19 = vpop.f32.mrf.mxu2 }
 0x112   :  { %3543 = vmatpush.msk.msra.mxu3 %vm8540_vm9, %v8126_v41  ;;  %2397 = vmatpush.msrb.mxu0 %v8543_v50  ;;  %v8548_v50 = vand.u32 4294901760, %v6030_v25  ;;  %v6551_v25 = vsub.f32 %v3328_v23, %v3328_v23  ;;  %vm6556_vm3 = vmand %vm303_vm0, %vm431_vm8  ;;  %vm296_vm4 = vcmp.ge.s32.totalorder %v6468_v9, %v8553_v22  ;;  %v8554_v23 = vld [vmem:[#allocation28_spill] sm:$0xff]  ;;  %vm8563_vm8 = vnez %v8485_v60 }
 0x113   :  { %2291 = vmatpush.msra.mxu1 %v2290_v42  ;;  %2320 = vmatpush.msra.mxu2 %v6207_v18  ;;  %v95_v42 = vsel %vm88_vm14, %v74_v14, %v81_v59  ;;  %v8550_v59 = vmov 0  ;;  %vm417_vm14 = vcmp.lt.s32.totalorder %v6468_v9, %v8557_v58  ;;  %v8564_v21 = vmov 0 }
 0x114   :  { %3544 = vmatpush.msk.msra.mxu3 %vm6090_vm2, %v8126_v41  ;;  %2401 = vmatpush.msrb.mxu0 %v8548_v50  ;;  %v8551_v59 = vsel %vm6556_vm3, 4294967295, %v8550_v59  ;;  %v102_v50 = vsub.f32 %v74_v14, %v95_v42  ;;  %v8556_v14 = vld [vmem:[#allocation21_spill] sm:$0xff]  ;;  %v8574_v42 = vand.u32 4294901760, %v6551_v25  ;;  %v8586_v55 = vand.u32 4294901760, %v6584_v53 }
 0x115   :  { %3554 = vmatpush.msk.msrb.mxu1 %vm8527_vm5, %v8126_v41  ;;  %2323 = vmatpush.msra.mxu2 %v6239_v4  ;;  %vm424_vm5 = vcmp.lt.s32.totalorder %v6468_v9, %v8554_v23  ;;  %v8583_v4 = vld [vmem:[#allocation32_spill] sm:$0xff] }
 0x116   :  { %3545 = vmatpush.msk.msra.mxu3 %vm6119_vm1, %v8126_v41  ;;  %2405 = vmatpush.msrb.mxu0 %v8549_v31  ;;  %v8555_v31 = vand.u32 4294901760, %v6099_v46  ;;  %v3307_v46 = vsel %vm6556_vm3, 1.0, %v8130_v52  ;;  %vm6595_vm0 = vmand %vm296_vm4, %vm424_vm5  ;;  %v125_v58 = vmul.f32 %v111_v29, %v102_v50  ;;  %v8568_v29 = vand.u32 4294901760, %v6173_v34 }
 0x117   :  { %3555 = vmatpush.msk.msrb.mxu1 %vm8528_vm10, %v8126_v41  ;;  %2326 = vmatpush.msra.mxu2 %v6267_v57  ;;  %vm289_vm10 = vcmp.ge.s32.totalorder %v6468_v9, %v8556_v14  ;;  %vm8569_vm5 = vnez %v8438_v48  ;;  %v6617_v50 = vsub.f32 %v3307_v46, %v3307_v46  ;;  %v3300_v34 = vsel %vm6595_vm0, 1.0, %v8130_v52  ;;  %v8571_v14 = vld [vmem:[#allocation23_spill] sm:$0xff] }
 0x118   :  { %3546 = vmatpush.msk.msra.mxu3 %vm6151_vm7, %v8126_v41  ;;  %2409 = vmatpush.msrb.mxu0 %v8555_v31  ;;  %v8561_v31 = vmov 0  ;;  %vm6604_vm3 = vmand %vm289_vm10, %vm417_vm14  ;;  %vm8570_vm10 = vnez %v8493_v49  ;;  %v8572_v48 = vld [vmem:[#allocation31_spill] sm:$0xff]  ;;  %v8573_v46 = vand.u32 4294901760, %v6207_v18  ;;  %v2540_v23 = vsub.f32 %v6551_v25, %v8574_v42 }
 0x119   :  { %3556 = vmatpush.msk.msrb.mxu1 %vm8529_vm13, %v8126_v41  ;;  %2329 = vmatpush.msra.mxu2 %v6307_v12  ;;  %vm8560_vm13 = vnez %v8435_v47  ;;  %v8562_v31 = vsel %vm6595_vm0, 4294967295, %v8561_v31  ;;  %v8565_v21 = vsel %vm6604_vm3, 4294967295, %v8564_v21  ;;  %v8566_v47 = vld [vmem:[#allocation22_spill] sm:$0xff]  ;;  %v3293_v22 = vsel %vm6604_vm3, 1.0, %v8130_v52 }
 0x11a   :  { %3547 = vmatpush.msk.msra.mxu3 %vm8558_vm12, %v8126_v41  ;;  %2413 = vmatpush.msrb.mxu0 %v8559_v27  ;;  %v8567_v27 = vld [vmem:[#allocation30_spill] sm:$0xff]  ;;  %v8575_v18 = vmov 0  ;;  %v6652_v7 = vand.u32 2147483647, %v125_v58  ;;  %v8578_v42 = vand.u32 4294901760, %v6565_v1  ;;  %v6666_v58 = vsub.f32 %v3300_v34, %v3300_v34 }
 0x11b   :  { %3557 = vmatpush.msk.msrb.mxu1 %vm8560_vm13, %v8126_v41  ;;  %2332 = vmatpush.msra.mxu2 %v6337_v6  ;;  %vm282_vm13 = vcmp.ge.s32.totalorder %v6468_v9, %v8566_v47  ;;  %vm410_vm4 = vcmp.lt.s32.totalorder %v6468_v9, %v8567_v27  ;;  %vm268_vm3 = vcmp.ge.s32.totalorder %v6468_v9, %v8583_v4  ;;  %v8609_v49 = vmov 0 }
 0x11c   :  { %3548 = vmatpush.msk.msra.mxu3 %vm8563_vm8, %v8126_v41  ;;  %2417 = vmatpush.msrb.mxu0 %v8568_v29  ;;  %v1271_v29 = vpop.f32.mrf.mxu3  ;;  %vm6648_vm14 = vmand %vm282_vm13, %vm410_vm4  ;;  %vm8580_vm13 = vcmp.ge.s32.totalorder %v6468_v9, %v8571_v14  ;;  %vm8585_vm0 = vnez %v8506_v63  ;;  %v6692_v34 = vsub.f32 %v3293_v22, %v3293_v22  ;;  %v2541_v14 = vand.u32 4294901760, %v2540_v23  ;;  %v8592_v23 = vld [vmem:[#allocation37_spill] sm:$0xff] }
 0x11d   :  { %3558 = vmatpush.msk.msrb.mxu1 %vm8569_vm5, %v8126_v41  ;;  %2335 = vmatpush.msra.mxu2 %v6355_v13  ;;  %vm403_vm5 = vcmp.lt.s32.totalorder %v6468_v9, %v8572_v48  ;;  %v8576_v18 = vsel %vm6648_vm14, 4294967295, %v8575_v18  ;;  %v1272_v27 = vadd.f32 %v1271_v29, %v1170_v19  ;;  %v6690_v19 = vsub.f32 %v6584_v53, %v8586_v55  ;;  %v1325_v29 = vpop.f32.mrf.mxu0 }
 0x11e   :  { %3549 = vmatpush.msk.msra.mxu3 %vm8570_vm10, %v8126_v41  ;;  %2421 = vmatpush.msrb.mxu0 %v8573_v46  ;;  %v2546_v46 = vsub.f32 %v6565_v1, %v8578_v42  ;;  %vm6675_vm4 = vmand %vm8580_vm13, %vm403_vm5  ;;  %v8581_v42 = vmov 0  ;;  %v3286_v47 = vsel %vm6648_vm14, 1.0, %v8130_v52  ;;  %v8587_v48 = vand.u32 4294901760, %v6267_v57  ;;  %v8591_v57 = vld [vmem:[#allocation36_spill] sm:$0xff] }
 0x11f   :  { %3559 = vmatpush.msk.msrb.mxu1 %vm8540_vm9, %v8126_v41  ;;  %2338 = vmatpush.msra.mxu2 %v6393_v61  ;;  %vm8577_vm9 = vnez %v8500_v0  ;;  %v8582_v42 = vsel %vm6675_vm4, 4294967295, %v8581_v42  ;;  %v146_v62 = vmul.f32 4.5, %v6652_v7  ;;  %vm8588_vm5 = vnez %v8516_v26 }
 0x120   :  { %3550 = vmatpush.msk.msra.mxu3 %vm8577_vm9, %v8126_v41  ;;  %2425 = vmatpush.msrb.mxu0 %v8579_v11  ;;  %v8584_v11 = vld [vmem:[#allocation34_spill] sm:$0xff]  ;;  %v1326_v22 = vadd.f32 %v1325_v29, %v1272_v27  ;;  %v3279_v55 = vsel %vm6675_vm4, 1.0, %v8130_v52  ;;  %vm261_vm13 = vcmp.ge.s32.totalorder %v6468_v9, %v8591_v57  ;;  %vm389_vm14 = vcmp.lt.s32.totalorder %v6468_v9, %v8592_v23 }
 0x121   :  { %3560 = vmatpush.msk.msrb.mxu1 %vm6090_vm2, %v8126_v41  ;;  %vm396_vm2 = vcmp.lt.s32.totalorder %v6468_v9, %v8584_v11  ;;  %2341 = vmatpush.msra.mxu2 %v6421_v37  ;;  %v8593_v27 = vand.u32 4294901760, %v6307_v12  ;;  %v8594_v29 = vand.u32 4294901760, %v6617_v50  ;;  %v6733_v20 = vsub.f32 %v3286_v47, %v3286_v47 }
 0x122   :  { %3551 = vmatpush.msk.msra.mxu3 %vm8585_vm0, %v8126_v41  ;;  %2429 = vmatpush.msrb.mxu0 %v8587_v48  ;;  %v2547_v48 = vand.u32 4294901760, %v2546_v46  ;;  %v2553_v17 = vand.u32 4294901760, %v6690_v19  ;;  %v8596_v47 = vand.u32 4294901760, %v6337_v6  ;;  %v1364_v46 = vpop.f32.mrf.mxu1  ;;  %v153_v12 = vmul.f32 %v146_v62, %v6652_v7 }
 0x123   :  { %3561 = vmatpush.msk.msrb.mxu1 %vm6119_vm1, %v8126_v41  ;;  %2344 = vmatpush.msra.mxu2 %v6434_v10  ;;  %vm6716_vm1 = vmand %vm268_vm3, %vm396_vm2  ;;  %v2558_v11 = vsub.f32 %v6617_v50, %v8594_v29  ;;  %vm8595_vm3 = vnez %v8521_v16  ;;  %v1433_v29 = vpop.f32.mrf.mxu2  ;;  %v3212_v4 = vadd.f32 -0.055555556, %v6652_v7  ;;  %v1365_v6 = vadd.f32 %v1364_v46, %v1326_v22 }
 0x124   :  { %3552 = vmatpush.msk.msra.mxu3 %vm8588_vm5, %v8126_v41  ;;  %v8590_v39 = vsel %vm6716_vm1, 4294967295, %v8589_v39  ;;  %2433 = vmatpush.msrb.mxu0 %v8593_v27  ;;  %v6752_v27 = vsub.f32 %v3279_v55, %v3279_v55  ;;  %v3272_v19 = vsel %vm6716_vm1, 1.0, %v8130_v52  ;;  %v8599_v62 = vand.u32 4294901760, %v6355_v13  ;;  %v1470_v46 = vpop.f32.mrf.mxu3 }
 0x125   :  { %3562 = vmatpush.msk.msrb.mxu1 %vm6151_vm7, %v8126_v41  ;;  %3570 = vmatpush.msk.msrb.mxu2 %vm6501_vm15, %v8126_v41  ;;  %vm6765_vm7 = vmand %vm261_vm13, %vm389_vm14  ;;  %v2559_v55 = vand.u32 4294901760, %v2558_v11  ;;  %vm8601_vm14 = vcmp.lt.s32.totalorder %v6468_v9, %v8475_v54  ;;  %vm8602_vm13 = vcmp.ge.s32.totalorder %v6468_v9, %v8474_v5  ;;  %v8603_v13 = vmov 0 }
 0x126   :  { %3553 = vmatpush.msk.msra.mxu3 %vm8595_vm3, %v8126_v41  ;;  %2437 = vmatpush.msrb.mxu0 %v8596_v47  ;;  %v8598_v28 = vsel %vm6765_vm7, 4294967295, %v8597_v28  ;;  %v8600_v47 = vand.u32 4294901760, %v6666_v58  ;;  %vm6792_vm2 = vmand %vm8602_vm13, %vm8601_vm14  ;;  %v1434_v60 = vadd.f32 %v1433_v29, %v1365_v6  ;;  %v3265_v11 = vsel %vm6765_vm7, 1.0, %v8130_v52 }
 0x127   :  { %3563 = vmatpush.msk.msrb.mxu1 %vm8558_vm12, %v8126_v41  ;;  %3571 = vmatpush.msk.msrb.mxu2 %vm6513_vm11, %v8126_v41  ;;  %vm139_vm12 = vcmp.lt.f32.partialorder %v6652_v7, 0.11111111  ;;  %v8604_v13 = vsel %vm6792_vm2, 4294967295, %v8603_v13  ;;  %v6814_v6 = vsub.f32 %v3272_v19, %v3272_v19  ;;  %vm8607_vm14 = vcmp.lt.s32.totalorder %v6468_v9, %v8480_v35 }
 0x128   :  { %2542 = vmatpush.msrb.mxu3 %v2541_v14  ;;  %2441 = vmatpush.msrb.mxu0 %v8599_v62  ;;  %v2564_v14 = vsub.f32 %v6666_v58, %v8600_v47  ;;  %v8605_v62 = vand.u32 4294901760, %v6393_v61  ;;  %v8017_v47 = vand.u32 4294901760, %v6752_v27  ;;  %v167_v22 = vsel %vm139_vm12, %v153_v12, %v3212_v4  ;;  %v8612_v4 = vld [vmem:[#allocation52_spill] sm:$0xff] }
 0x129   :  { %3564 = vmatpush.msk.msrb.mxu1 %vm8563_vm8, %v8126_v41  ;;  %3572 = vmatpush.msk.msrb.mxu2 %vm6526_vm6, %v8126_v41  ;;  %vm8608_vm13 = vcmp.ge.s32.totalorder %v6468_v9, %v8479_v33  ;;  %v1471_v61 = vadd.f32 %v1470_v46, %v1434_v60  ;;  %v3258_v7 = vsel %vm6792_vm2, 1.0, %v8130_v52  ;;  %v8613_v12 = vand.u32 4294901760, %v6421_v37 }
 0x12a   :  { %2548 = vmatpush.msrb.mxu3 %v2547_v48  ;;  %2445 = vmatpush.msrb.mxu0 %v8605_v62  ;;  %v8606_v48 = vand.u32 4294901760, %v6692_v34  ;;  %vm6825_vm8 = vmand %vm8608_vm13, %vm8607_vm14  ;;  %v2565_v19 = vand.u32 4294901760, %v2564_v14  ;;  %v6847_v60 = vsub.f32 %v3265_v11, %v3265_v11  ;;  %vm8615_vm14 = vcmp.lt.s32.totalorder %v6468_v9, %v8487_v43 }
 0x12b   :  { %3565 = vmatpush.msk.msrb.mxu1 %vm8570_vm10, %v8126_v41  ;;  %v8610_v49 = vsel %vm6825_vm8, 4294967295, %v8609_v49  ;;  %vm8611_vm10 = vnez %v8551_v59  ;;  %vm8616_vm13 = vcmp.ge.s32.totalorder %v6468_v9, %v8486_v51  ;;  %v8617_v37 = vmov 0  ;;  %2347 = vmatmul.f32.vlgmr.msra.gmra.mxu2 %v8532_v8  ;;  %v8640_v8 = vld [vmem:[#allocation24_spill] sm:$0xff] }
 0x12c   :  { %v2570_v29 = vsub.f32 %v6692_v34, %v8606_v48  ;;  %3573 = vmatpush.msk.msrb.mxu2 %vm8611_vm10, %v8126_v41  ;;  %2554 = vmatpush.msrb.mxu3 %v2553_v17  ;;  %v8614_v17 = vand.u32 4294901760, %v6733_v20  ;;  %vm6855_vm12 = vmand %vm8616_vm13, %vm8615_vm14  ;;  %v3179_v0 = vmul.f32 %v1471_v61, %v167_v22  ;;  %v3251_v14 = vsel %vm6825_vm8, 1.0, %v8130_v52 }
 0x12d   :  { %2449 = vmatpush.msrb.mxu0 %v8613_v12  ;;  %3566 = vmatpush.msk.msrb.mxu1 %vm8577_vm9, %v8126_v41  ;;  %v8618_v37 = vsel %vm6855_vm12, 4294967295, %v8617_v37  ;;  %vm8619_vm14 = vnez %v8562_v31  ;;  %v8620_v11 = vand.u32 4294901760, %v6434_v10  ;;  %v8014_v22 = vand.u32 4294901760, %v6814_v6 }
 0x12e   :  { %v2576_v46 = vsub.f32 %v6733_v20, %v8614_v17  ;;  %2560 = vmatpush.msrb.mxu3 %v2559_v55  ;;  %3574 = vmatpush.msk.msrb.mxu2 %vm8619_vm14, %v8126_v41  ;;  %v2582_v55 = vsub.f32 %v6752_v27, %v8017_v47  ;;  %v6876_v62 = vsub.f32 %v3258_v7, %v3258_v7  ;;  %v8623_v48 = vmov 0 }
 0x12f   :  { %2453 = vmatpush.msrb.mxu0 %v8620_v11  ;;  %vm8621_vm13 = vcmp.lt.s32.totalorder %v6468_v9, %v8612_v4  ;;  %vm8622_vm9 = vcmp.ge.s32.totalorder %v6468_v9, %v8388_v2  ;;  %3567 = vmatpush.msk.msrb.mxu1 %vm8585_vm0, %v8126_v41  ;;  %v2571_v10 = vand.u32 4294901760, %v2570_v29  ;;  %3186 = vst [vmem:[#allocation10 + $0x8] sm:$0xff] %v3179_v0  ;;  %v3244_v61 = vsel %vm6855_vm12, 1.0, %v8130_v52 }
 0x130   :  { %vm6884_vm1 = vmand %vm8622_vm9, %vm8621_vm13  ;;  %2192 = vmatmul.f32.vlgmr.msra.gmra.mxu0 %v8526_v40  ;;  %2386 = vmatmul.f32.vlgmr.msra.gmra.mxu3 %v8539_v30  ;;  %vm8625_vm13 = vnez %v8565_v21  ;;  %v8015_v63 = vand.u32 4294901760, %v6847_v60  ;;  %v6904_v29 = vsub.f32 %v3251_v14, %v3251_v14  ;;  %vm8627_vm0 = vcmp.lt.s32.totalorder %v6468_v9, %v8508_v44  ;;  %v7030_v40 = vld [vmem:[#allocation8] sm:$0xff] }
 0x131   :  { %v8624_v48 = vsel %vm6884_vm1, 4294967295, %v8623_v48  ;;  %3575 = vmatpush.msk.msrb.mxu2 %vm8625_vm13, %v8126_v41  ;;  %vm8628_vm12 = vcmp.ge.s32.totalorder %v6468_v9, %v8507_v15  ;;  %2566 = vmatpush.msrb.mxu3 %v2565_v19  ;;  %v2577_v12 = vand.u32 4294901760, %v2576_v46  ;;  %v3237_v17 = vsel %vm6884_vm1, 1.0, %v8130_v52  ;;  %8645 = vst [vmem:[#allocation35_spill] sm:$0xff] %v7030_v40 }
 0x132   :  { %8626 = vst [vmem:[#allocation33_spill] sm:$0xff] %v6904_v29  ;;  %vm6912_vm14 = vmand %vm8628_vm12, %vm8627_vm0  ;;  %2640 = vmatpush.msra.mxu0 %v6551_v25  ;;  %3568 = vmatpush.msk.msrb.mxu1 %vm8588_vm5, %v8126_v41  ;;  %vm8631_vm9 = vnez %v8576_v18  ;;  %v2588_v0 = vsub.f32 %v6814_v6, %v8014_v22  ;;  %v8016_v19 = vand.u32 4294901760, %v6876_v62  ;;  %v6930_v14 = vsub.f32 %v3244_v61, %v3244_v61 }
 0x133   :  { %3576 = vmatpush.msk.msrb.mxu2 %vm8631_vm9, %v8126_v41  ;;  %vm8632_vm12 = vcmp.lt.s32.totalorder %v6468_v9, %v8512_v45  ;;  %vm8633_vm0 = vcmp.ge.s32.totalorder %v6468_v9, %v8511_v24  ;;  %2293 = vmatmul.f32.vlgmr.msra.gmra.mxu1 %v4343_v3  ;;  %v2583_v46 = vand.u32 4294901760, %v2582_v55  ;;  %v3230_v11 = vsel %vm6912_vm14, 1.0, %v8130_v52 }
 0x134   :  { %vm6938_vm1 = vmand %vm8633_vm0, %vm8632_vm12  ;;  %2572 = vmatpush.msrb.mxu3 %v2571_v10  ;;  %2643 = vmatpush.msra.mxu0 %v6565_v1  ;;  %v2594_v9 = vsub.f32 %v6847_v60, %v8015_v63  ;;  %v8018_v61 = vand.u32 4294901760, %v6904_v29  ;;  %v6954_v22 = vsub.f32 %v3237_v17, %v3237_v17  ;;  %v2589_v16 = vand.u32 4294901760, %v2588_v0  ;;  %v75_v17 = vld [vmem:[#allocation2 + $0x10] sm:$0xff] }
 0x135   :  { %3569 = vmatpush.msk.msrb.mxu1 %vm8595_vm3, %v8126_v41  ;;  %3577 = vmatpush.msk.msrb.mxu2 %vm6675_vm4, %v8126_v41  ;;  %v3223_v55 = vsel %vm6938_vm1, 1.0, %v8130_v52  ;;  %v2600_v10 = vsub.f32 %v6876_v62, %v8016_v19  ;;  %v6970_v63 = vsub.f32 %v3230_v11, %v3230_v11  ;;  %vm8636_vm5 = vnez %v8590_v39  ;;  %v8639_v11 = vld [vmem:[#allocation16_spill] sm:$0xff] }
 0x136   :  { %2578 = vmatpush.msrb.mxu3 %v2577_v12  ;;  %2646 = vmatpush.msra.mxu0 %v6584_v53  ;;  %v82_v12 = vld [vmem:[#allocation5 + $0x10] sm:$0xff]  ;;  %v2595_v0 = vand.u32 4294901760, %v2594_v9  ;;  %v2606_v19 = vsub.f32 %v6904_v29, %v8018_v61  ;;  %v6983_v47 = vsub.f32 %v3223_v55, %v3223_v55  ;;  %v8637_v61 = vand.u32 4294901760, %v6930_v14 }
 0x137   :  { %3586 = vmatpush.msk.msra.mxu1 %vm6501_vm15, %v8126_v41  ;;  %3578 = vmatpush.msk.msrb.mxu2 %vm8636_vm5, %v8126_v41  ;;  %vm89_vm3 = vcmp.ne.f32.partialorder %v82_v12, %v82_v12  ;;  %v2601_v9 = vand.u32 4294901760, %v2600_v10 }
 0x138   :  { %2584 = vmatpush.msrb.mxu3 %v2583_v46  ;;  %2649 = vmatpush.msra.mxu0 %v6617_v50  ;;  %v6990_v46 = vadd.s32 768, %v8530_v38  ;;  %v2612_v55 = vsub.f32 %v6930_v14, %v8637_v61  ;;  %v2607_v38 = vand.u32 4294901760, %v2606_v19  ;;  %v96_v30 = vsel %vm89_vm3, %v75_v17, %v82_v12  ;;  %v8644_v61 = vld [vmem:[#allocation25_spill] sm:$0xff] }
 0x139   :  { %3587 = vmatpush.msk.msra.mxu1 %vm6513_vm11, %v8126_v41  ;;  %2455 = vmatmul.f32.vlgmr.msrb.gmra.mxu0 %v4343_v3  ;;  %v8641_v12 = vand.u32 4294901760, %v6970_v63  ;;  %vm8642_vm3 = vnez %v8562_v31 }
 0x13a   :  { %3579 = vmatpush.msk.msrb.mxu2 %vm6765_vm7, %v8126_v41  ;;  %2590 = vmatpush.msrb.mxu3 %v2589_v16  ;;  %v8638_v16 = vand.u32 4294901760, %v6954_v22  ;;  %v2613_v19 = vand.u32 4294901760, %v2612_v55  ;;  %vm8648_vm12 = vcmp.lt.s32.totalorder %v6990_v46, %v8640_v8  ;;  %vm8649_vm0 = vcmp.ge.s32.totalorder %v6990_v46, %v8639_v11 }
 0x13b   :  { %2652 = vmatpush.msra.mxu0 %v6666_v58  ;;  %3588 = vmatpush.msk.msra.mxu1 %vm6526_vm6, %v8126_v41  ;;  %v8657_v11 = vmov 0 }
 0x13c   :  { %3580 = vmatpush.msk.msrb.mxu2 %vm6792_vm2, %v8126_v41  ;;  %2492 = vmatmul.f32.vlgmr.msrb.gmra.mxu1 %v4343_v3  ;;  %v2618_v10 = vsub.f32 %v6954_v22, %v8638_v16  ;;  %v8643_v16 = vld [vmem:[#allocation17_spill] sm:$0xff]  ;;  %v103_v3 = vsub.f32 %v75_v17, %v96_v30  ;;  %v8652_v17 = vld [vmem:[#allocation18_spill] sm:$0xff] }
 0x13d   :  { %2596 = vmatpush.msrb.mxu3 %v2595_v0  ;;  %2655 = vmatpush.msra.mxu0 %v6692_v34  ;;  %v2624_v0 = vsub.f32 %v6970_v63, %v8641_v12  ;;  %v8647_v12 = vand.u32 4294901760, %v6983_v47  ;;  %v1666_v15 = vpop.f32.mrf.mxu2 }
 0x13e   :  { %3589 = vmatpush.msk.msra.mxu1 %vm8611_vm10, %v8126_v41  ;;  %3581 = vmatpush.msk.msrb.mxu2 %vm6825_vm8, %v8126_v41  ;;  %vm8646_vm10 = vnez %v8618_v37  ;;  %v2619_v55 = vand.u32 4294901760, %v2618_v10  ;;  %vm8654_vm8 = vnez %v8624_v48  ;;  %v8659_v10 = vld [vmem:[#allocation19_spill] sm:$0xff] }
 0x13f   :  { %2602 = vmatpush.msrb.mxu3 %v2601_v9  ;;  %2658 = vmatpush.msra.mxu0 %v6733_v20  ;;  %v112_v9 = vperm.slane %v7030_v40, 2  ;;  %v2630_v45 = vsub.f32 %v6983_v47, %v8647_v12  ;;  %v2625_v8 = vand.u32 4294901760, %v2624_v0  ;;  %v8660_v12 = vld [vmem:[#allocation27_spill] sm:$0xff] }
 0x140   :  { %3590 = vmatpush.msk.msra.mxu1 %vm8642_vm3, %v8126_v41  ;;  %3582 = vmatpush.msk.msrb.mxu2 %vm8646_vm10, %v8126_v41  ;;  %vm7045_vm3 = vmand %vm8649_vm0, %vm8648_vm12  ;;  %vm8655_vm12 = vcmp.lt.s32.totalorder %v6990_v46, %v8644_v61  ;;  %vm8656_vm0 = vcmp.ge.s32.totalorder %v6990_v46, %v8643_v16  ;;  %v8662_v16 = vmov 0 }
 0x141   :  { %2608 = vmatpush.msrb.mxu3 %v2607_v38  ;;  %2661 = vmatpush.msra.mxu0 %v6752_v27  ;;  %v8653_v38 = vld [vmem:[#allocation26_spill] sm:$0xff]  ;;  %vm7066_vm11 = vmand %vm8656_vm0, %vm8655_vm12  ;;  %v3329_v61 = vsel %vm7045_vm3, 1.0, %v8130_v52  ;;  %v2631_v0 = vand.u32 4294901760, %v2630_v45  ;;  %vm8661_vm12 = vcmp.ge.s32.totalorder %v6990_v46, %v8652_v17  ;;  %v8667_v45 = vmov 0 }
 0x142   :  { %3591 = vmatpush.msk.msra.mxu1 %vm8625_vm13, %v8126_v41  ;;  %vm439_vm6 = vcmp.lt.s32.totalorder %v6990_v46, %v8653_v38  ;;  %3583 = vmatpush.msk.msrb.mxu2 %vm8654_vm8, %v8126_v41  ;;  %v8658_v11 = vsel %vm7066_vm11, 4294967295, %v8657_v11  ;;  %vm432_vm13 = vcmp.lt.s32.totalorder %v6990_v46, %v8660_v12  ;;  %v8664_v38 = vld [vmem:[#allocation20_spill] sm:$0xff] }
 0x143   :  { %2614 = vmatpush.msrb.mxu3 %v2613_v19  ;;  %2664 = vmatpush.msra.mxu0 %v6814_v6  ;;  %v126_v19 = vmul.f32 %v112_v9, %v103_v3  ;;  %vm7087_vm0 = vmand %vm8661_vm12, %vm439_vm6  ;;  %vm297_vm10 = vcmp.ge.s32.totalorder %v6990_v46, %v8664_v38  ;;  %v8665_v12 = vld [vmem:[#allocation28_spill] sm:$0xff]  ;;  %v3322_v3 = vsel %vm7066_vm11, 1.0, %v8130_v52  ;;  %vm8666_vm6 = vcmp.ge.s32.totalorder %v6990_v46, %v8659_v10  ;;  %v8672_v38 = vld [vmem:[#allocation21_spill] sm:$0xff] }
 0x144   :  { %3592 = vmatpush.msk.msra.mxu1 %vm8631_vm9, %v8126_v41  ;;  %3584 = vmatpush.msk.msrb.mxu2 %vm6912_vm14, %v8126_v41  ;;  %v8663_v16 = vsel %vm7087_vm0, 4294967295, %v8662_v16  ;;  %vm425_vm9 = vcmp.lt.s32.totalorder %v6990_v46, %v8665_v12  ;;  %vm7105_vm12 = vmand %vm8666_vm6, %vm432_vm13  ;;  %v7112_v9 = vsub.f32 %v3329_v61, %v3329_v61  ;;  %v3315_v17 = vsel %vm7087_vm0, 1.0, %v8130_v52  ;;  %v1612_v44 = vpop.f32.mrf.mxu1 }
 0x145   :  { %2620 = vmatpush.msrb.mxu3 %v2619_v55  ;;  %2667 = vmatpush.msra.mxu0 %v6847_v60  ;;  %v8668_v45 = vsel %vm7105_vm12, 4294967295, %v8667_v45  ;;  %v1511_v55 = vpop.f32.mrf.mxu0  ;;  %vm7121_vm13 = vmand %vm297_vm10, %vm425_vm9  ;;  %vm290_vm6 = vcmp.ge.s32.totalorder %v6990_v46, %v8672_v38  ;;  %v7129_v61 = vand.u32 2147483647, %v126_v19  ;;  %v8674_v12 = vand.u32 4294901760, %v6551_v25  ;;  %v8675_v19 = vld [vmem:[#allocation22_spill] sm:$0xff] }
 0x146   :  { %3593 = vmatpush.msk.msra.mxu1 %vm6675_vm4, %v8126_v41  ;;  %3585 = vmatpush.msk.msrb.mxu2 %vm6938_vm1, %v8126_v41  ;;  %8669 = vst [vmem:[#allocation42_spill] sm:$0xff] %v7112_v9  ;;  %v7133_v40 = vsub.f32 %v3322_v3, %v3322_v3  ;;  %v3308_v24 = vsel %vm7105_vm12, 1.0, %v8130_v52  ;;  %v8676_v25 = vld [vmem:[#allocation30_spill] sm:$0xff]  ;;  %v1613_v3 = vadd.f32 %v1612_v44, %v1511_v55  ;;  %v1705_v55 = vpop.f32.mrf.mxu3  ;;  %v8685_v44 = vld [vmem:[#allocation23_spill] sm:$0xff] }
 0x147   :  { %2626 = vmatpush.msrb.mxu3 %v2625_v8  ;;  %2670 = vmatpush.msra.mxu0 %v6876_v62  ;;  %v8673_v8 = vld [vmem:[#allocation29_spill] sm:$0xff]  ;;  %vm411_vm9 = vcmp.lt.s32.totalorder %v6990_v46, %v8676_v25  ;;  %v7171_v56 = vsub.f32 %v3308_v24, %v3308_v24  ;;  %v8683_v24 = vmov 0 }
 0x148   :  { %3594 = vmatpush.msk.msra.mxu1 %vm8636_vm5, %v8126_v41  ;;  %vm418_vm4 = vcmp.lt.s32.totalorder %v6990_v46, %v8673_v8  ;;  %2734 = vmatpush.msra.mxu2 %v8674_v12  ;;  %v7151_v12 = vsub.f32 %v3315_v17, %v3315_v17  ;;  %v147_v17 = vmul.f32 4.5, %v7129_v61  ;;  %v8680_v8 = vand.u32 4294901760, %v6584_v53  ;;  %v8686_v53 = vld [vmem:[#allocation31_spill] sm:$0xff] }
 0x149   :  { %2632 = vmatpush.msrb.mxu3 %v2631_v0  ;;  %2673 = vmatpush.msra.mxu0 %v6904_v29  ;;  %v8677_v0 = vand.u32 4294901760, %v6565_v1  ;;  %v3301_v29 = vsel %vm7121_vm13, 1.0, %v8130_v52  ;;  %vm7162_vm10 = vmand %vm290_vm6, %vm418_vm4  ;;  %v8678_v1 = vmov 0  ;;  %v1667_v38 = vadd.f32 %v1666_v15, %v1613_v3 }
 0x14a   :  { %3595 = vmatpush.msk.msra.mxu1 %vm6765_vm7, %v8126_v41  ;;  %v8679_v1 = vsel %vm7162_vm10, 4294967295, %v8678_v1  ;;  %vm8682_vm4 = vcmp.ge.s32.totalorder %v6990_v46, %v8675_v19  ;;  %v7198_v15 = vsub.f32 %v3301_v29, %v3301_v29  ;;  %v8688_v19 = vand.u32 4294901760, %v6617_v50 }
 0x14b   :  { %2738 = vmatpush.msra.mxu2 %v8677_v0  ;;  %3602 = vmatpush.msk.msra.mxu3 %vm6501_vm15, %v8126_v41  ;;  %vm8681_vm15 = vnez %v8542_v32  ;;  %vm7186_vm6 = vmand %vm8682_vm4, %vm411_vm9  ;;  %v3294_v32 = vsel %vm7162_vm10, 1.0, %v8130_v52  ;;  %vm8689_vm9 = vnez %v8545_v36  ;;  %v1706_v25 = vadd.f32 %v1705_v55, %v1667_v38  ;;  %v8691_v0 = vld [vmem:[#allocation34_spill] sm:$0xff] }
 0x14c   :  { %2676 = vmatpush.msra.mxu0 %v6930_v14  ;;  %3596 = vmatpush.msk.msra.mxu1 %vm6792_vm2, %v8126_v41  ;;  %v8684_v24 = vsel %vm7186_vm6, 4294967295, %v8683_v24  ;;  %vm8692_vm7 = vnez %v8618_v37  ;;  %v8693_v50 = vand.u32 4294901760, %v7112_v9  ;;  %v154_v29 = vmul.f32 %v147_v17, %v7129_v61 }
 0x14d   :  { %2742 = vmatpush.msra.mxu2 %v8680_v8  ;;  %3603 = vmatpush.msk.msra.mxu3 %vm8681_vm15, %v8126_v41  ;;  %vm8687_vm15 = vnez %v8610_v49  ;;  %v8690_v8 = vld [vmem:[#allocation32_spill] sm:$0xff]  ;;  %v3213_v55 = vadd.f32 -0.055555556, %v7129_v61  ;;  %v3287_v38 = vsel %vm7186_vm6, 1.0, %v8130_v52  ;;  %vm8695_vm4 = vcmp.ge.s32.totalorder %v6990_v46, %v8685_v44 }
 0x14e   :  { %2679 = vmatpush.msra.mxu0 %v6954_v22  ;;  %3597 = vmatpush.msk.msra.mxu1 %vm8687_vm15, %v8126_v41  ;;  %v2881_v36 = vsub.f32 %v7112_v9, %v8693_v50  ;;  %v8698_v50 = vand.u32 4294901760, %v6666_v58  ;;  %v8700_v17 = vand.u32 4294901760, %v7133_v40  ;;  %v1774_v9 = vpop.f32.mrf.mxu0  ;;  %v2898_v44 = vand.u32 4294901760, %v7171_v56 }
 0x14f   :  { %2746 = vmatpush.msra.mxu2 %v8688_v19  ;;  %3604 = vmatpush.msk.msra.mxu3 %vm8689_vm9, %v8126_v41  ;;  %vm8694_vm9 = vcmp.lt.s32.totalorder %v6990_v46, %v8686_v53  ;;  %v7243_v53 = vsub.f32 %v3294_v32, %v3294_v32  ;;  %v1775_v58 = vadd.f32 %v1774_v9, %v1706_v25  ;;  %v8705_v32 = vand.u32 4294901760, %v6692_v34 }
 0x150   :  { %2682 = vmatpush.msra.mxu0 %v6970_v63  ;;  %3598 = vmatpush.msk.msra.mxu1 %vm8692_vm7, %v8126_v41  ;;  %vm7231_vm2 = vmand %vm8695_vm4, %vm8694_vm9  ;;  %vm8699_vm7 = vnez %v8551_v59  ;;  %v2887_v3 = vsub.f32 %v7133_v40, %v8700_v17  ;;  %vm8702_vm9 = vcmp.ge.s32.totalorder %v6990_v46, %v8690_v8  ;;  %vm390_vm6 = vcmp.lt.s32.totalorder %v6990_v46, %v8592_v23 }
 0x151   :  { %2750 = vmatpush.msra.mxu2 %v8698_v50  ;;  %3605 = vmatpush.msk.msra.mxu3 %vm8699_vm7, %v8126_v41  ;;  %vm8701_vm7 = vcmp.lt.s32.totalorder %v6990_v46, %v8691_v0  ;;  %v8707_v9 = vand.u32 4294901760, %v7151_v12  ;;  %v7273_v25 = vsub.f32 %v3287_v38, %v3287_v38  ;;  %v2904_v8 = vand.u32 4294901760, %v7198_v15  ;;  %v1811_v38 = vpop.f32.mrf.mxu1 }
 0x152   :  { %2685 = vmatpush.msra.mxu0 %v6983_v47  ;;  %3599 = vmatpush.msk.msra.mxu1 %vm8654_vm8, %v8126_v41  ;;  %vm7257_vm15 = vmand %vm8702_vm9, %vm8701_vm7  ;;  %vm8706_vm8 = vnez %v8562_v31  ;;  %v3280_v50 = vsel %vm7231_vm2, 1.0, %v8130_v52  ;;  %v2882_v31 = vand.u32 4294901760, %v2881_v36  ;;  %vm383_vm9 = vcmp.lt.s32.totalorder %v6990_v46, %v8475_v54 }
 0x153   :  { %2754 = vmatpush.msra.mxu2 %v8705_v32  ;;  %3606 = vmatpush.msk.msra.mxu3 %vm8706_vm8, %v8126_v41  ;;  %v2893_v0 = vsub.f32 %v7151_v12, %v8707_v9  ;;  %vm8708_vm8 = vcmp.lt.f32.partialorder %v7129_v61, 0.11111111  ;;  %v8709_v17 = vand.u32 4294901760, %v6733_v20  ;;  %vm8710_vm4 = vnez %v8565_v21 }
 0x154   :  { %3618 = vmatpush.msk.msrb.mxu0 %vm7045_vm3, %v8126_v41  ;;  %3600 = vmatpush.msk.msra.mxu1 %vm6912_vm14, %v8126_v41  ;;  %v168_v34 = vsel %vm8708_vm8, %v154_v29, %v3213_v55  ;;  %v2899_v36 = vsub.f32 %v7171_v56, %v2898_v44  ;;  %v1812_v61 = vadd.f32 %v1811_v38, %v1775_v58  ;;  %v2910_v29 = vand.u32 4294901760, %v7243_v53 }
 0x155   :  { %2758 = vmatpush.msra.mxu2 %v8709_v17  ;;  %3607 = vmatpush.msk.msra.mxu3 %vm8710_vm4, %v8126_v41  ;;  %v3273_v55 = vsel %vm7257_vm15, 1.0, %v8130_v52  ;;  %vm8711_vm8 = vcmp.ge.s32.totalorder %v6990_v46, %v8591_v57  ;;  %v2888_v21 = vand.u32 4294901760, %v2887_v3  ;;  %v7319_v58 = vsub.f32 %v3280_v50, %v3280_v50 }
 0x156   :  { %vm7309_vm7 = vmand %vm8711_vm8, %vm390_vm6  ;;  %3619 = vmatpush.msk.msrb.mxu0 %vm7066_vm11, %v8126_v41  ;;  %3601 = vmatpush.msk.msra.mxu1 %vm6938_vm1, %v8126_v41  ;;  %v8714_v57 = vand.u32 4294901760, %v6752_v27  ;;  %vm8715_vm8 = vnez %v8576_v18  ;;  %v2894_v23 = vand.u32 4294901760, %v2893_v0  ;;  %v3180_v32 = vmul.f32 %v1812_v61, %v168_v34 }
 0x157   :  { %3608 = vmatpush.msk.msra.mxu3 %vm8715_vm8, %v8126_v41  ;;  %v2905_v3 = vsub.f32 %v7198_v15, %v2904_v8  ;;  %v2916_v9 = vand.u32 4294901760, %v7273_v25  ;;  %vm8716_vm4 = vcmp.ge.s32.totalorder %v6990_v46, %v8474_v5  ;;  %v7347_v18 = vsub.f32 %v3273_v55, %v3273_v55  ;;  %v8733_v55 = vld [vmem:[#allocation51_spill] sm:$0xff] }
 0x158   :  { %2762 = vmatpush.msra.mxu2 %v8714_v57  ;;  %vm7340_vm6 = vmand %vm8716_vm4, %vm383_vm9  ;;  %3620 = vmatpush.msk.msrb.mxu0 %vm7087_vm0, %v8126_v41  ;;  %v3266_v0 = vsel %vm7309_vm7, 1.0, %v8130_v52  ;;  %vm369_vm9 = vcmp.lt.s32.totalorder %v6990_v46, %v8487_v43  ;;  %v8719_v5 = vand.u32 4294901760, %v6814_v6  ;;  %vm8720_vm4 = vnez %v8582_v42  ;;  %3187 = vst [vmem:[#allocation10 + $0x10] sm:$0xff] %v3180_v32  ;;  %v8735_v57 = vld [vmem:[#allocation33_spill] sm:$0xff]  ;;  %v77_v43 = vld [vmem:[#allocation2 + $0x20] sm:$0xff] }
 0x159   :  { %2883 = vmatpush.msrb.mxu1 %v2882_v31  ;;  %3609 = vmatpush.msk.msra.mxu3 %vm8720_vm4, %v8126_v41  ;;  %v2911_v54 = vsub.f32 %v7243_v53, %v2910_v29  ;;  %vm8721_vm0 = vcmp.lt.s32.totalorder %v6990_v46, %v8480_v35  ;;  %vm8722_vm8 = vcmp.ge.s32.totalorder %v6990_v46, %v8479_v33  ;;  %v2900_v42 = vand.u32 4294901760, %v2899_v36 }
 0x15a   :  { %2766 = vmatpush.msra.mxu2 %v8719_v5  ;;  %vm7370_vm11 = vmand %vm8722_vm8, %vm8721_vm0  ;;  %3621 = vmatpush.msk.msrb.mxu0 %vm7105_vm12, %v8126_v41  ;;  %v2922_v6 = vand.u32 4294901760, %v7319_v58  ;;  %v3259_v50 = vsel %vm7340_vm6, 1.0, %v8130_v52  ;;  %v8725_v35 = vand.u32 4294901760, %v6847_v60  ;;  %v7386_v33 = vsub.f32 %v3266_v0, %v3266_v0  ;;  %v8739_v0 = vld [vmem:[#allocation47_spill] sm:$0xff]  ;;  %v8740_v5 = vld [vmem:[#allocation54_spill] sm:$0xff] }
 0x15b   :  { %2889 = vmatpush.msrb.mxu1 %v2888_v21  ;;  %3610 = vmatpush.msk.msra.mxu3 %vm8636_vm5, %v8126_v41  ;;  %vm8726_vm0 = vcmp.ge.s32.totalorder %v6990_v46, %v8486_v51  ;;  %vm234_vm4 = vcmp.ge.s32.totalorder %v6990_v46, %v8388_v2  ;;  %vm362_vm12 = vcmp.lt.s32.totalorder %v6990_v46, %v8612_v4  ;;  %v2906_v39 = vand.u32 4294901760, %v2905_v3  ;;  %v8734_v21 = vld [vmem:[#allocation53_spill] sm:$0xff] }
 0x15c   :  { %2770 = vmatpush.msra.mxu2 %v8725_v35  ;;  %vm7391_vm8 = vmand %vm8726_vm0, %vm369_vm9  ;;  %3622 = vmatpush.msk.msrb.mxu0 %vm7121_vm13, %v8126_v41  ;;  %v2917_v51 = vsub.f32 %v7273_v25, %v2916_v9  ;;  %v2928_v60 = vand.u32 4294901760, %v7347_v18  ;;  %v3252_v34 = vsel %vm7370_vm11, 1.0, %v8130_v52  ;;  %v8729_v38 = vand.u32 4294901760, %v6876_v62 }
 0x15d   :  { %2895 = vmatpush.msrb.mxu1 %v2894_v23  ;;  %vm8730_vm5 = vnez %v8598_v28  ;;  %v2912_v17 = vand.u32 4294901760, %v2911_v54  ;;  %v7414_v36 = vsub.f32 %v3259_v50, %v3259_v50  ;;  %v2923_v61 = vsub.f32 %v7319_v58, %v2922_v6  ;;  %vm7431_vm9 = vmand %vm234_vm4, %vm362_vm12 }
 0x15e   :  { %2774 = vmatpush.msra.mxu2 %v8729_v38  ;;  %3611 = vmatpush.msk.msra.mxu3 %vm8730_vm5, %v8126_v41  ;;  %v3245_v62 = vsel %vm7391_vm8, 1.0, %v8130_v52  ;;  %vm355_vm5 = vcmp.lt.s32.totalorder %v6990_v46, %v8734_v21  ;;  %v8736_v23 = vand.u32 4294901760, %v8735_v57  ;;  %v7444_v4 = vsub.f32 %v3252_v34, %v3252_v34 }
 0x15f   :  { %3623 = vmatpush.msk.msrb.mxu0 %vm7162_vm10, %v8126_v41  ;;  %2901 = vmatpush.msrb.mxu1 %v2900_v42  ;;  %vm8737_vm10 = vnez %v8604_v13  ;;  %v2934_v2 = vand.u32 4294901760, %v7386_v33  ;;  %vm8738_vm12 = vnez %v8684_v24  ;;  %v2918_v32 = vand.u32 4294901760, %v2917_v51 }
 0x160   :  { %2778 = vmatpush.msra.mxu2 %v8736_v23  ;;  %3612 = vmatpush.msk.msra.mxu3 %vm8737_vm10, %v8126_v41  ;;  %v2929_v3 = vsub.f32 %v7347_v18, %v2928_v60  ;;  %vm348_vm10 = vcmp.lt.s32.totalorder %v6990_v46, %v8740_v5  ;;  %v8741_v13 = vand.u32 4294901760, %v6930_v14  ;;  %vm8742_vm0 = vnez %v8610_v49 }
 0x161   :  { %3624 = vmatpush.msk.msrb.mxu0 %vm8738_vm12, %v8126_v41  ;;  %2907 = vmatpush.msrb.mxu1 %v2906_v39  ;;  %v7462_v54 = vsub.f32 %v3245_v62, %v3245_v62  ;;  %v2940_v42 = vand.u32 4294901760, %v7414_v36  ;;  %v3238_v50 = vsel %vm7431_vm9, 1.0, %v8130_v52  ;;  %vm8743_vm4 = vcmp.ge.s32.totalorder %v6990_v46, %v8733_v55 }
 0x162   :  { %2782 = vmatpush.msra.mxu2 %v8741_v13  ;;  %3613 = vmatpush.msk.msra.mxu3 %vm8742_vm0, %v8126_v41  ;;  %vm7474_vm12 = vmand %vm8743_vm4, %vm355_vm5  ;;  %v2924_v49 = vand.u32 4294901760, %v2923_v61  ;;  %v8746_v35 = vand.u32 4294901760, %v6954_v22  ;;  %vm8747_vm0 = vnez %v8618_v37  ;;  %v2935_v39 = vsub.f32 %v7386_v33, %v2934_v2 }
 0x163   :  { %3625 = vmatpush.msk.msrb.mxu0 %vm7231_vm2, %v8126_v41  ;;  %2913 = vmatpush.msrb.mxu1 %v2912_v17  ;;  %v2946_v51 = vand.u32 4294901760, %v7444_v4  ;;  %vm8748_vm5 = vcmp.ge.s32.totalorder %v6990_v46, %v8739_v0  ;;  %v8749_v34 = vmov 0  ;;  %v2930_v37 = vand.u32 4294901760, %v2929_v3  ;;  %v8756_v3 = vld [vmem:[#allocation55_spill] sm:$0xff] }
 0x164   :  { %2786 = vmatpush.msra.mxu2 %v8746_v35  ;;  %3614 = vmatpush.msk.msra.mxu3 %vm8747_vm0, %v8126_v41  ;;  %vm7493_vm4 = vmand %vm8748_vm5, %vm348_vm10  ;;  %v7500_v22 = vsub.f32 %v3238_v50, %v3238_v50  ;;  %v3231_v38 = vsel %vm7474_vm12, 1.0, %v8130_v52  ;;  %v8751_v17 = vand.u32 4294901760, %v6970_v63  ;;  %vm8752_vm10 = vnez %v8624_v48  ;;  %v1953_v10 = vpop.f32.mrf.mxu3 }
 0x165   :  { %v8750_v34 = vsel %vm7493_vm4, 4294967295, %v8749_v34  ;;  %3626 = vmatpush.msk.msrb.mxu0 %vm7257_vm15, %v8126_v41  ;;  %2919 = vmatpush.msrb.mxu1 %v2918_v32  ;;  %v2941_v46 = vsub.f32 %v7414_v36, %v2940_v42  ;;  %v2952_v61 = vand.u32 4294901760, %v7462_v54  ;;  %v3224_v63 = vsel %vm7493_vm4, 1.0, %v8130_v52  ;;  %v8755_v32 = vld [vmem:[#allocation42_spill] sm:$0xff] }
 0x166   :  { %2790 = vmatpush.msra.mxu2 %v8751_v17  ;;  %3615 = vmatpush.msk.msra.mxu3 %vm8752_vm10, %v8126_v41  ;;  %v8753_v62 = vand.u32 4294901760, %v6983_v47  ;;  %v2936_v48 = vand.u32 4294901760, %v2935_v39  ;;  %v2947_v55 = vsub.f32 %v7444_v4, %v2946_v51  ;;  %v7528_v21 = vsub.f32 %v3231_v38, %v3231_v38  ;;  %v8754_v47 = vld [vmem:[#allocation59_spill] sm:$0xff]  ;;  %v8760_v38 = vld [vmem:[#allocation57_spill] sm:$0xff] }
 0x167   :  { %3627 = vmatpush.msk.msrb.mxu0 %vm7309_vm7, %v8126_v41  ;;  %2925 = vmatpush.msrb.mxu1 %v2924_v49  ;;  %v2958_v52 = vand.u32 4294901760, %v7500_v22  ;;  %v2942_v7 = vand.u32 4294901760, %v2941_v46  ;;  %v2953_v57 = vsub.f32 %v7462_v54, %v2952_v61  ;;  %v7541_v23 = vsub.f32 %v3224_v63, %v3224_v63  ;;  %v83_v63 = vld [vmem:[#allocation5 + $0x18] sm:$0xff] }
 0x168   :  { %2794 = vmatpush.msra.mxu2 %v8753_v62  ;;  %3616 = vmatpush.msk.msra.mxu3 %vm6912_vm14, %v8126_v41  ;;  %v2948_v0 = vand.u32 4294901760, %v2947_v55  ;;  %v2964_v26 = vand.u32 4294901760, %v7528_v21  ;;  %vm8758_vm14 = vnez %v8663_v16  ;;  %vm8759_vm0 = vnez %v8668_v45  ;;  %v8762_v62 = vld [vmem:[#allocation58_spill] sm:$0xff]  ;;  %v76_v55 = vld [vmem:[#allocation2 + $0x18] sm:$0xff] }
 0x169   :  { %3628 = vmatpush.msk.msrb.mxu0 %vm7340_vm6, %v8126_v41  ;;  %2931 = vmatpush.msrb.mxu1 %v2930_v37  ;;  %v2959_v5 = vsub.f32 %v7500_v22, %v2958_v52  ;;  %v2954_v13 = vand.u32 4294901760, %v2953_v57  ;;  %v2970_v50 = vand.u32 4294901760, %v7541_v23  ;;  %v8761_v46 = vand.u32 4294901760, %v8755_v32 }
 0x16a   :  { %2533 = vmatmul.f32.vlgmr.msrb.gmra.mxu2 %v8754_v47  ;;  %3617 = vmatpush.msk.msra.mxu3 %vm6938_vm1, %v8126_v41  ;;  %vm8757_vm1 = vnez %v8658_v11  ;;  %v2965_v49 = vsub.f32 %v7528_v21, %v2964_v26  ;;  %vm8763_vm5 = vnez %v8679_v1  ;;  %vm90_vm10 = vcmp.ne.f32.partialorder %v83_v63, %v83_v63 }
 0x16b   :  { %2981 = vmatpush.msrb.mxu2 %v8755_v32  ;;  %3629 = vmatpush.msk.msrb.mxu0 %vm7370_vm11, %v8126_v41  ;;  %v2960_v35 = vand.u32 4294901760, %v2959_v5  ;;  %v2971_v39 = vsub.f32 %v7541_v23, %v2970_v50  ;;  %v85_v32 = vld [vmem:[#allocation5 + $0x28] sm:$0xff] }
 0x16c   :  { %2937 = vmatpush.msrb.mxu1 %v2936_v48  ;;  %2634 = vmatmul.f32.vlgmr.msrb.gmra.mxu3 %v8756_v3  ;;  %v2966_v37 = vand.u32 4294901760, %v2965_v49  ;;  %v8764_v48 = vand.u32 4294901760, %v7133_v40 }
 0x16d   :  { %2984 = vmatpush.msrb.mxu2 %v7133_v40  ;;  %3634 = vmatpush.msk.msrb.mxu3 %vm7045_vm3, %v8126_v41  ;;  %v2972_v17 = vand.u32 4294901760, %v2971_v39  ;;  %v97_v40 = vsel %vm90_vm10, %v76_v55, %v83_v63 }
 0x16e   :  { %3630 = vmatpush.msk.msrb.mxu0 %vm7391_vm8, %v8126_v41  ;;  %2943 = vmatpush.msrb.mxu1 %v2942_v7  ;;  %v8766_v7 = vand.u32 4294901760, %v7151_v12  ;;  %v104_v30 = vsub.f32 %v76_v55, %v97_v40 }
 0x16f   :  { %2987 = vmatpush.msrb.mxu2 %v7151_v12  ;;  %3635 = vmatpush.msk.msrb.mxu3 %vm8757_vm1, %v8126_v41  ;;  %v8767_v12 = vld [vmem:[#allocation35_spill] sm:$0xff] }
 0x170   :  { %3631 = vmatpush.msk.msrb.mxu0 %vm7431_vm9, %v8126_v41  ;;  %2949 = vmatpush.msrb.mxu1 %v2948_v0  ;;  %v114_v31 = vperm.slane %v8767_v12, 4  ;;  %v115_v5 = vperm.slane %v8767_v12, 5 }
 0x171   :  { %2990 = vmatpush.msrb.mxu2 %v7171_v56  ;;  %3636 = vmatpush.msk.msrb.mxu3 %vm8758_vm14, %v8126_v41  ;;  %v113_v56 = vperm.slane %v8767_v12, 3 }
 0x172   :  { %3632 = vmatpush.msk.msrb.mxu0 %vm7474_vm12, %v8126_v41  ;;  %2955 = vmatpush.msrb.mxu1 %v2954_v13 }
 0x173   :  { %2796 = vmatmul.f32.vlgmr.msra.gmra.mxu2 %v8756_v3  ;;  %3637 = vmatpush.msk.msrb.mxu3 %vm8759_vm0, %v8126_v41  ;;  %v127_v11 = vmul.f32 %v113_v56, %v104_v30 }
 0x174   :  { %2993 = vmatpush.msrb.mxu2 %v7198_v15  ;;  %3633 = vmatpush.msk.msrb.mxu0 %vm7493_vm4, %v8126_v41  ;;  %vm8765_vm4 = vnez %v8684_v24 }
 0x175   :  { %2961 = vmatpush.msrb.mxu1 %v2960_v35  ;;  %2688 = vmatmul.f32.vlgmr.msra.gmra.mxu0 %v8760_v38  ;;  %v134_v45 = vand.u32 2147483647, %v127_v11  ;;  %v86_v11 = vld [vmem:[#allocation5 + $0x30] sm:$0xff] }
 0x176   :  { %2833 = vmatmul.f32.vlgmr.msra.gmra.mxu3 %v8756_v3  ;;  %2996 = vmatpush.msrb.mxu2 %v7243_v53 }
 0x177   :  { %3638 = vmatpush.msk.msrb.mxu3 %vm7121_vm13, %v8126_v41  ;;  %3075 = vmatpush.msra.mxu0 %v8761_v46  ;;  %v148_v15 = vmul.f32 4.5, %v134_v45 }
 0x178   :  { %2967 = vmatpush.msrb.mxu1 %v2966_v37  ;;  %2999 = vmatpush.msrb.mxu2 %v7273_v25  ;;  %v3214_v25 = vadd.f32 -0.055555556, %v134_v45 }
 0x179   :  { %2727 = vmatmul.f32.vlgmr.msra.gmra.mxu1 %v8762_v62  ;;  %3639 = vmatpush.msk.msrb.mxu3 %vm8763_vm5, %v8126_v41  ;;  %v155_v59 = vmul.f32 %v148_v15, %v134_v45 }
 0x17a   :  { %3079 = vmatpush.msra.mxu0 %v8764_v48  ;;  %2973 = vmatpush.msrb.mxu1 %v2972_v17 }
 0x17b   :  { %3002 = vmatpush.msrb.mxu2 %v7319_v58  ;;  %3640 = vmatpush.msk.msrb.mxu3 %vm8765_vm4, %v8126_v41 }
 0x17c   :  { %3083 = vmatpush.msra.mxu0 %v8766_v7  ;;  %3650 = vmatpush.msk.msra.mxu1 %vm7045_vm3, %v8126_v41  ;;  %vm141_vm3 = vcmp.lt.f32.partialorder %v134_v45, 0.11111111  ;;  %v79_v45 = vld [vmem:[#allocation2 + $0x30] sm:$0xff] }
 0x17d   :  { %3005 = vmatpush.msrb.mxu2 %v7347_v18  ;;  %3641 = vmatpush.msk.msrb.mxu3 %vm7231_vm2, %v8126_v41  ;;  %v169_v58 = vsel %vm141_vm3, %v155_v59, %v3214_v25  ;;  %v84_v18 = vld [vmem:[#allocation5 + $0x20] sm:$0xff] }
 0x17e   :  { %3087 = vmatpush.msra.mxu0 %v2898_v44  ;;  %3651 = vmatpush.msk.msra.mxu1 %vm8757_vm1, %v8126_v41 }
 0x17f   :  { %3008 = vmatpush.msrb.mxu2 %v7386_v33  ;;  %3642 = vmatpush.msk.msrb.mxu3 %vm7257_vm15, %v8126_v41 }
 0x180   :  { %3091 = vmatpush.msra.mxu0 %v2904_v8  ;;  %3652 = vmatpush.msk.msra.mxu1 %vm8758_vm14, %v8126_v41 }
 0x181   :  { %3011 = vmatpush.msrb.mxu2 %v7414_v36  ;;  %3643 = vmatpush.msk.msrb.mxu3 %vm7309_vm7, %v8126_v41 }
 0x182   :  { %3095 = vmatpush.msra.mxu0 %v2910_v29  ;;  %3653 = vmatpush.msk.msra.mxu1 %vm8759_vm0, %v8126_v41 }
 0x183   :  { %3014 = vmatpush.msrb.mxu2 %v7444_v4  ;;  %3644 = vmatpush.msk.msrb.mxu3 %vm7340_vm6, %v8126_v41 }
 0x184   :  { %3099 = vmatpush.msra.mxu0 %v2916_v9  ;;  %3654 = vmatpush.msk.msra.mxu1 %vm7121_vm13, %v8126_v41 }
 0x185   :  { %3017 = vmatpush.msrb.mxu2 %v7462_v54  ;;  %3645 = vmatpush.msk.msrb.mxu3 %vm7370_vm11, %v8126_v41 }
 0x186   :  { %3103 = vmatpush.msra.mxu0 %v2922_v6  ;;  %3655 = vmatpush.msk.msra.mxu1 %vm8763_vm5, %v8126_v41  ;;  %v1852_v16 = vpop.f32.mrf.mxu2 }
 0x187   :  { %3020 = vmatpush.msrb.mxu2 %v7500_v22  ;;  %3646 = vmatpush.msk.msrb.mxu3 %vm7391_vm8, %v8126_v41  ;;  %v1954_v1 = vadd.f32 %v1953_v10, %v1852_v16 }
 0x188   :  { %3107 = vmatpush.msra.mxu0 %v2928_v60  ;;  %3656 = vmatpush.msk.msra.mxu1 %vm8765_vm4, %v8126_v41 }
 0x189   :  { %3023 = vmatpush.msrb.mxu2 %v7528_v21  ;;  %3647 = vmatpush.msk.msrb.mxu3 %vm7431_vm9, %v8126_v41 }
 0x18a   :  { %3111 = vmatpush.msra.mxu0 %v2934_v2  ;;  %3657 = vmatpush.msk.msra.mxu1 %vm7231_vm2, %v8126_v41  ;;  %vm8768_vm2 = vnez %v8750_v34 }
 0x18b   :  { %3026 = vmatpush.msrb.mxu2 %v7541_v23  ;;  %3648 = vmatpush.msk.msrb.mxu3 %vm7474_vm12, %v8126_v41  ;;  %v2007_v24 = vpop.f32.mrf.mxu0 }
 0x18c   :  { %3115 = vmatpush.msra.mxu0 %v2940_v42  ;;  %3658 = vmatpush.msk.msra.mxu1 %vm7257_vm15, %v8126_v41  ;;  %v2008_v19 = vadd.f32 %v2007_v24, %v1954_v1  ;;  %vm92_vm15 = vcmp.ne.f32.partialorder %v85_v32, %v85_v32  ;;  %v116_v24 = vperm.slane %v8767_v12, 6 }
 0x18d   :  { %3029 = vmatmul.f32.vlgmr.msrb.gmra.mxu2 %v8760_v38  ;;  %3649 = vmatpush.msk.msrb.mxu3 %vm8768_vm2, %v8126_v41 }
 0x18e   :  { %3119 = vmatpush.msra.mxu0 %v2946_v51  ;;  %3659 = vmatpush.msk.msra.mxu1 %vm7309_vm7, %v8126_v41  ;;  %v2046_v53 = vpop.f32.mrf.mxu1  ;;  %v2115_v44 = vpop.f32.mrf.mxu2 }
 0x18f   :  { %2874 = vmatmul.f32.vlgmr.msrb.gmra.mxu0 %v8754_v47  ;;  %3068 = vmatmul.f32.vlgmr.msrb.gmra.mxu3 %v8762_v62  ;;  %v2047_v8 = vadd.f32 %v2046_v53, %v2008_v19 }
 0x190   :  { %3123 = vmatpush.msra.mxu0 %v2952_v61  ;;  %3660 = vmatpush.msk.msra.mxu1 %vm7340_vm6, %v8126_v41  ;;  %vm93_vm6 = vcmp.ne.f32.partialorder %v86_v11, %v86_v11 }
 0x191   :  { %2975 = vmatmul.f32.vlgmr.msrb.gmra.mxu1 %v8756_v3  ;;  %v2116_v29 = vadd.f32 %v2115_v44, %v2047_v8  ;;  %v2152_v20 = vpop.f32.mrf.mxu3  ;;  %v100_v10 = vsel %vm93_vm6, %v79_v45, %v86_v11 }
 0x192   :  { %3127 = vmatpush.msra.mxu0 %v2958_v52  ;;  %3661 = vmatpush.msk.msra.mxu1 %vm7370_vm11, %v8126_v41  ;;  %vm91_vm11 = vcmp.ne.f32.partialorder %v84_v18, %v84_v18  ;;  %v107_v1 = vsub.f32 %v79_v45, %v100_v10 }
 0x193   :  { %v2153_v9 = vadd.f32 %v2152_v20, %v2116_v29  ;;  %v98_v6 = vsel %vm91_vm11, %v77_v43, %v84_v18 }
 0x194   :  { %3131 = vmatpush.msra.mxu0 %v2964_v26  ;;  %3662 = vmatpush.msk.msra.mxu1 %vm7391_vm8, %v8126_v41  ;;  %v105_v33 = vsub.f32 %v77_v43, %v98_v6  ;;  %v130_v15 = vmul.f32 %v116_v24, %v107_v1 }
 0x195   :  { %v3181_v27 = vmul.f32 %v2153_v9, %v169_v58 }
 0x196   :  { %3135 = vmatpush.msra.mxu0 %v2970_v50  ;;  %3663 = vmatpush.msk.msra.mxu1 %vm7431_vm9, %v8126_v41  ;;  %v128_v60 = vmul.f32 %v114_v31, %v105_v33  ;;  %v137_v53 = vand.u32 2147483647, %v130_v15 }
 0x197   :  { %3137 = vmatmul.f32.vlgmr.msra.gmra.mxu0 %v8756_v3  ;;  %3188 = vst [vmem:[#allocation10 + $0x18] sm:$0xff] %v3181_v27 }
 0x198   :  { %3664 = vmatpush.msk.msra.mxu1 %vm7474_vm12, %v8126_v41  ;;  %v135_v28 = vand.u32 2147483647, %v128_v60  ;;  %v151_v8 = vmul.f32 4.5, %v137_v53  ;;  %v3217_v18 = vadd.f32 -0.055555556, %v137_v53 }
 0x199   :  { %vm144_vm8 = vcmp.lt.f32.partialorder %v137_v53, 0.11111111 }
 0x19a   :  { %3665 = vmatpush.msk.msra.mxu1 %vm8768_vm2, %v8126_v41  ;;  %v149_v42 = vmul.f32 4.5, %v135_v28  ;;  %v3215_v22 = vadd.f32 -0.055555556, %v135_v28  ;;  %vm142_vm13 = vcmp.lt.f32.partialorder %v135_v28, 0.11111111  ;;  %v158_v27 = vmul.f32 %v151_v8, %v137_v53 }
 0x19b   :  { %3174 = vmatmul.f32.vlgmr.msra.gmra.mxu1 %v8756_v3  ;;  %v78_v3 = vld [vmem:[#allocation2 + $0x28] sm:$0xff] }
 0x19c   :  { %v156_v41 = vmul.f32 %v149_v42, %v135_v28  ;;  %v99_v0 = vsel %vm92_vm15, %v78_v3, %v85_v32  ;;  %v172_v6 = vsel %vm144_vm8, %v158_v27, %v3217_v18 }
 0x19d   :  { %v106_v26 = vsub.f32 %v78_v3, %v99_v0 }
 0x19e   :  { %v170_v52 = vsel %vm142_vm13, %v156_v41, %v3215_v22 }
 0x19f   :  { %v129_v13 = vmul.f32 %v115_v5, %v106_v26 }
 0x1a1   :  { %v136_v49 = vand.u32 2147483647, %v129_v13 }
 0x1a3   :  { %v150_v38 = vmul.f32 4.5, %v136_v49  ;;  %v3216_v48 = vadd.f32 -0.055555556, %v136_v49  ;;  %vm143_vm7 = vcmp.lt.f32.partialorder %v136_v49, 0.11111111 }
 0x1a5   :  { %v157_v62 = vmul.f32 %v150_v38, %v136_v49 }
 0x1a7   :  { %v171_v30 = vsel %vm143_vm7, %v157_v62, %v3216_v48 }
 0x1ad   :  { %v2193_v36 = vpop.f32.mrf.mxu0 }
 0x1ae   :  { %v2348_v2 = vpop.f32.mrf.mxu2 }
 0x1b0   :  { %v2294_v4 = vpop.f32.mrf.mxu1 }
 0x1b1   :  { %v2295_v54 = vadd.f32 %v2294_v4, %v2193_v36 }
 0x1b3   :  { %v2349_v14 = vadd.f32 %v2348_v2, %v2295_v54  ;;  %v2387_v51 = vpop.f32.mrf.mxu3 }
 0x1b5   :  { %v2388_v34 = vadd.f32 %v2387_v51, %v2349_v14 }
 0x1b6   :  { %v2456_v61 = vpop.f32.mrf.mxu0 }
 0x1b7   :  { %v2457_v21 = vadd.f32 %v2456_v61, %v2388_v34 }
 0x1b9   :  { %v2493_v47 = vpop.f32.mrf.mxu1 }
 0x1ba   :  { %v2494_v57 = vadd.f32 %v2493_v47, %v2457_v21 }
 0x1bc   :  { %v3182_v23 = vmul.f32 %v2494_v57, %v170_v52 }
 0x1be   :  { %3189 = vst [vmem:[#allocation10 + $0x20] sm:$0xff] %v3182_v23 }
 0x1ed   :  { %v2534_v50 = vpop.f32.mrf.mxu2 }
 0x1ef   :  { %v2635_v35 = vpop.f32.mrf.mxu3 }
 0x1f0   :  { %v2636_v39 = vadd.f32 %v2635_v35, %v2534_v50 }
 0x1f2   :  { %v2689_v37 = vpop.f32.mrf.mxu0 }
 0x1f3   :  { %v2690_v17 = vadd.f32 %v2689_v37, %v2636_v39 }
 0x1f6   :  { %v2728_v46 = vpop.f32.mrf.mxu1  ;;  %v2797_v63 = vpop.f32.mrf.mxu2 }
 0x1f7   :  { %v2729_v55 = vadd.f32 %v2728_v46, %v2690_v17 }
 0x1f9   :  { %v2798_v7 = vadd.f32 %v2797_v63, %v2729_v55  ;;  %v2834_v40 = vpop.f32.mrf.mxu3 }
 0x1fb   :  { %v2835_v56 = vadd.f32 %v2834_v40, %v2798_v7 }
 0x1fd   :  { %v3183_v16 = vmul.f32 %v2835_v56, %v171_v30 }
 0x1ff   :  { %3190 = vst [vmem:[#allocation10 + $0x28] sm:$0xff] %v3183_v16 }
 0x20c   :  { %v2875_v19 = vpop.f32.mrf.mxu0 }
 0x20e   :  { %v2976_v44 = vpop.f32.mrf.mxu1 }
 0x20f   :  { %v2977_v59 = vadd.f32 %v2976_v44, %v2875_v19 }
 0x210   :  { %v3030_v25 = vpop.f32.mrf.mxu2 }
 0x211   :  { %v3031_v29 = vadd.f32 %v3030_v25, %v2977_v59 }
 0x212   :  { %v3069_v20 = vpop.f32.mrf.mxu3 }
 0x213   :  { %v3070_v58 = vadd.f32 %v3069_v20, %v3031_v29 }
 0x214   :  { %v3138_v9 = vpop.f32.mrf.mxu0 }
 0x215   :  { %v3139_v43 = vadd.f32 %v3138_v9, %v3070_v58 }
 0x218   :  { %v3175_v33 = vpop.f32.mrf.mxu1 }
 0x219   :  { %v3176_v12 = vadd.f32 %v3175_v33, %v3139_v43 }
 0x21b   :  { %v3184_v31 = vmul.f32 %v3176_v12, %v172_v6 }
 0x21d   :  { %3191 = vst [vmem:[#allocation10 + $0x30] sm:$0xff] %v3184_v31 }
 0x21e   :  { %3202 = dma.vmem_to_hbm [thread:$0]  %s3198_s3, 896, %s3200_s9, [#allocation4]  }
 0x21f   :  { %3800 = dma.done.wait [#allocation4], 896  }
 0x220   :  { %3801 = vsyncadd [#allocation4], 4294966400 }
 0x221   :  { %3207 = vsyncpa [#allocation3], 1 }
 0x222   :  { %3208 = vsyncpa [#allocation6], 1 }
 0x223   :  { %3209 = vsyncpa [#allocation9], 1 }
 0x224   :  { %3210 = vsyncpa [#allocation4], 1 }

</bundles_post_ra>
